<compile_context>
chip_gen: v5e
topology: v5e:2x2
jax: 0.10.0
libtpu: 0.0.40
codegen_flags: <defaults>
</compile_context>

<pallas_src>
import math
from functools import partial

import jax
import jax.numpy as jnp
from jax.experimental import pallas as pl
from jax.experimental.pallas import tpu as pltpu


# Safe on every TPU generation; raise toward ~100 MiB on v5e/v6e for bigger tiles.
_VMEM_LIMIT = 64 * 1024 * 1024


def _cparams(sem):
    return pltpu.CompilerParams(dimension_semantics=sem,
                                vmem_limit_bytes=_VMEM_LIMIT)


# ----------------------------------------------------------------------------
# Tiling helpers
# ----------------------------------------------------------------------------

def _pick_tm(m):
    """Largest row tile (multiple of 8) dividing m, preferring >=2 grid steps."""
    cands = (512, 384, 256, 128, 64, 32, 16, 8)
    for tm in cands:
        if m % tm == 0 and m // tm >= 2:
            return tm
    for tm in cands:
        if m % tm == 0:
            return tm
    return None


def _pick_row_tile(rows, row_bytes, budget_bytes=8 << 20):
    """Largest row tile dividing `rows` whose per-tile working set fits budget."""
    cap = max(8, budget_bytes // max(row_bytes, 1))
    for t in (1024, 768, 640, 512, 480, 384, 320, 256, 192, 160, 128, 96, 64,
              32, 16, 8):
        if t <= cap and rows % t == 0:
            return t
    return rows


def _row_tiles(m, *arrays):
    """Pick a row tile for M; pad only as a fallback when no divisor exists."""
    tm = _pick_tm(m)
    if tm is not None:
        return tm, m, arrays
    tm = 64
    mp = ((m + tm - 1) // tm) * tm
    arrays = tuple(jnp.pad(a, ((0, mp - m), (0, 0))) for a in arrays)
    return tm, mp, arrays


# ----------------------------------------------------------------------------
# Projection matmul kernels (bf16 MXU, f32 accumulation, fused epilogues)
# ----------------------------------------------------------------------------

def _matmul_kernel(a_ref, w_ref, o_ref, *, activation):
    acc = jnp.dot(a_ref[...], w_ref[...], preferred_element_type=jnp.float32)
    if activation == 'relu':
        acc = jnp.maximum(acc, 0.0)
    o_ref[...] = acc.astype(o_ref.dtype)


def _matmul2_kernel(a_ref, wa_ref, b_ref, wb_ref, o_ref, *, activation):
    # y = a @ Wa + b @ Wb  (replaces concat([a, b]) @ W)
    acc = jnp.dot(a_ref[...], wa_ref[...], preferred_element_type=jnp.float32)
    acc = acc + jnp.dot(b_ref[...], wb_ref[...], preferred_element_type=jnp.float32)
    if activation == 'relu':
        acc = jnp.maximum(acc, 0.0)
    o_ref[...] = acc.astype(o_ref.dtype)


def _matmul_ln_kernel(*refs, eps, has_residual):
    # y = [residual +] LayerNorm(a @ W) * gamma + beta, fused in the epilogue.
    if has_residual:
        a_ref, w_ref, g_ref, b_ref, r_ref, o_ref = refs
    else:
        a_ref, w_ref, g_ref, b_ref, o_ref = refs
    acc = jnp.dot(a_ref[...], w_ref[...], preferred_element_type=jnp.float32)
    mu = jnp.mean(acc, axis=-1, keepdims=True)
    var = jnp.mean((acc - mu) ** 2, axis=-1, keepdims=True)
    y = (acc - mu) * jax.lax.rsqrt(var + eps)
    y = y * g_ref[...] + b_ref[...]
    if has_residual:
        y = y + r_ref[...].astype(jnp.float32)
    o_ref[...] = y.astype(o_ref.dtype)


def matmul_pallas(a, w_t, activation=None, out_dtype=jnp.bfloat16):
    """(M, K) @ (K, N); weights pre-transposed bf16, fused ReLU."""
    m, k = a.shape
    _, n = w_t.shape
    a = a.astype(jnp.bfloat16)
    tm, mp, (a,) = _row_tiles(m, a)
    out = pl.pallas_call(
        partial(_matmul_kernel, activation=activation),
        out_shape=jax.ShapeDtypeStruct((mp, n), out_dtype),
        grid=(mp // tm,),
        in_specs=[pl.BlockSpec((tm, k), lambda i: (i, 0)),
                  pl.BlockSpec((k, n), lambda i: (0, 0))],
        out_specs=pl.BlockSpec((tm, n), lambda i: (i, 0)),
        compiler_params=_cparams(("parallel",)),
    )(a, w_t)
    return out if mp == m else out[:m]


def matmul2_pallas(a, wa_t, b, wb_t, activation=None, out_dtype=jnp.bfloat16):
    m, ka = a.shape
    _, n = wa_t.shape
    a = a.astype(jnp.bfloat16)
    b = b.astype(jnp.bfloat16)
    tm, mp, (a, b) = _row_tiles(m, a, b)
    kb = b.shape[1]
    out = pl.pallas_call(
        partial(_matmul2_kernel, activation=activation),
        out_shape=jax.ShapeDtypeStruct((mp, n), out_dtype),
        grid=(mp // tm,),
        in_specs=[pl.BlockSpec((tm, ka), lambda i: (i, 0)),
                  pl.BlockSpec((ka, n), lambda i: (0, 0)),
                  pl.BlockSpec((tm, kb), lambda i: (i, 0)),
                  pl.BlockSpec((kb, n), lambda i: (0, 0))],
        out_specs=pl.BlockSpec((tm, n), lambda i: (i, 0)),
        compiler_params=_cparams(("parallel",)),
    )(a, wa_t, b, wb_t)
    return out if mp == m else out[:m]


def matmul_ln_pallas(a, w_t, gamma, beta, residual=None, eps=1e-5,
                     out_dtype=jnp.bfloat16):
    m, k = a.shape
    _, n = w_t.shape
    a = a.astype(jnp.bfloat16)
    arrays = (a,) if residual is None else (a, residual.astype(jnp.bfloat16))
    tm, mp, arrays = _row_tiles(m, *arrays)
    a = arrays[0]
    in_specs = [pl.BlockSpec((tm, k), lambda i: (i, 0)),
                pl.BlockSpec((k, n), lambda i: (0, 0)),
                pl.BlockSpec((1, n), lambda i: (0, 0)),
                pl.BlockSpec((1, n), lambda i: (0, 0))]
    args = [a, w_t, gamma, beta]
    if residual is not None:
        in_specs.append(pl.BlockSpec((tm, n), lambda i: (i, 0)))
        args.append(arrays[1])
    out = pl.pallas_call(
        partial(_matmul_ln_kernel, eps=eps, has_residual=residual is not None),
        out_shape=jax.ShapeDtypeStruct((mp, n), out_dtype),
        grid=(mp // tm,),
        in_specs=in_specs,
        out_specs=pl.BlockSpec((tm, n), lambda i: (i, 0)),
        compiler_params=_cparams(("parallel",)),
    )(*args)
    return out if mp == m else out[:m]


# ----------------------------------------------------------------------------
# Linear attention (two tiled kernels: kv accumulation + apply)
# ----------------------------------------------------------------------------

def _feat_map_f32(x):
    xf = x.astype(jnp.float32)
    return jnp.where(xf > 0, xf + 1.0, jnp.exp(xf))     # elu(x) + 1


def _kv_accum_kernel(k_ref, v_ref, mask_ref, kvz_ref, kv_acc, ks_acc, *, inv_s):
    i = pl.program_id(1)

    @pl.when(i == 0)
    def _():
        kv_acc[...] = jnp.zeros_like(kv_acc)
        ks_acc[...] = jnp.zeros_like(ks_acc)

    kf = _feat_map_f32(k_ref[0])                          # (ts, C) f32
    kb = kf.astype(jnp.bfloat16)
    vb = (v_ref[0].astype(jnp.float32) * inv_s).astype(jnp.bfloat16)
    # Accumulate (v^T k) = (k^T v)^T so phase B needs only one last-dim
    # contraction for both o and z.
    kv_acc[...] += jax.lax.dot_general(
        vb, kb, (((0,), (0,)), ((), ())), preferred_element_type=jnp.float32)
    ks_acc[...] += jnp.sum(kf, axis=0, keepdims=True)     # (1, C) f32

    @pl.when(i == pl.num_programs(1) - 1)
    def _():
        mask = mask_ref[...]                              # (C, C) symmetric block-diag
        # rows 0..C-1   : per-head (k^T v)^T
        # rows C..2C-1  : mask * ksum  (weights that broadcast the z normalizer)
        kvz_ref[0] = jnp.concatenate(
            [kv_acc[...] * mask, ks_acc[...] * mask], axis=0)


def _attn_apply_kernel(q_ref, kvz_ref, o_ref, *, eps, length):
    c = q_ref.shape[2]
    qf = _feat_map_f32(q_ref[0])                          # (tl, C) f32
    kvz = kvz_ref[0].astype(jnp.bfloat16)                 # (2C, C)
    res = jax.lax.dot_general(
        qf.astype(jnp.bfloat16), kvz, (((1,), (1,)), ((), ())),
        preferred_element_type=jnp.float32)               # (tl, 2C) = [o | z]
    o = res[:, :c]
    z = res[:, c:]
    o_ref[0] = (o * pl.reciprocal(z + eps, approx=True) * length).astype(o_ref.dtype)


def linear_attention_pallas(q, k, v, head_mask, eps=1e-6):
    """q: (N, L, C), k/v: (N, S, C) -> (N, L, C) bf16 (per-head linear attn)."""
    n, l, c = q.shape
    s = k.shape[1]
    ts = _pick_row_tile(s, row_bytes=4 * c * 4)
    tl = _pick_row_tile(l, row_bytes=4 * c * 4)

    kvz = pl.pallas_call(
        partial(_kv_accum_kernel, inv_s=1.0 / s),
        out_shape=jax.ShapeDtypeStruct((n, 2 * c, c), jnp.float32),
        grid=(n, s // ts),
        in_specs=[pl.BlockSpec((1, ts, c), lambda b, i: (b, i, 0)),
                  pl.BlockSpec((1, ts, c), lambda b, i: (b, i, 0)),
                  pl.BlockSpec((c, c), lambda b, i: (0, 0))],
        out_specs=pl.BlockSpec((1, 2 * c, c), lambda b, i: (b, 0, 0)),
        scratch_shapes=[pltpu.VMEM((c, c), jnp.float32),
                        pltpu.VMEM((1, c), jnp.float32)],
        compiler_params=_cparams(("parallel", "arbitrary")),
    )(k, v, head_mask)

    return pl.pallas_call(
        partial(_attn_apply_kernel, eps=eps, length=float(s)),
        out_shape=jax.ShapeDtypeStruct((n, l, c), jnp.bfloat16),
        grid=(n, l // tl),
        in_specs=[pl.BlockSpec((1, tl, c), lambda b, i: (b, i, 0)),
                  pl.BlockSpec((1, 2 * c, c), lambda b, i: (b, 0, 0))],
        out_specs=pl.BlockSpec((1, tl, c), lambda b, i: (b, i, 0)),
        compiler_params=_cparams(("parallel", "parallel")),
    )(q, kvz)


# ----------------------------------------------------------------------------
# Dual-softmax coarse matching (two-pass, L-tiled)
# ----------------------------------------------------------------------------

def _sim_colstats_kernel(f0_ref, f1_ref, sim_ref, cmax_ref, csum_ref, *, scale):
    i = pl.program_id(1)

    @pl.when(i == 0)
    def _():
        cmax_ref[...] = jnp.full(cmax_ref.shape, -jnp.inf, jnp.float32)
        csum_ref[...] = jnp.zeros_like(csum_ref)

    sim = jax.lax.dot_general(
        f0_ref[0], f1_ref[0], (((1,), (1,)), ((), ())),
        preferred_element_type=jnp.float32) * scale       # (tl, S)
    sim_ref[0] = sim
    # online column (over-L) softmax statistics
    m_old = cmax_ref[0]                                    # (1, S)
    m_new = jnp.maximum(m_old, jnp.max(sim, axis=0, keepdims=True))
    csum_ref[0] = (csum_ref[0] * jnp.exp(m_old - m_new)
                   + jnp.sum(jnp.exp(sim - m_new), axis=0, keepdims=True))
    cmax_ref[0] = m_new


def _dual_softmax_kernel(sim_ref, cmax_ref, csum_ref, conf_ref):
    sim = sim_ref[0]                                       # (tl, S) f32
    cmax = cmax_ref[0]                                     # (1, S)
    csum = csum_ref[0]                                     # (1, S)
    e0 = jnp.exp(sim - cmax)                               # single full exp pass
    sm0 = e0 / csum                                        # softmax over L (columns)
    # Row softmax via a rank-1 correction of e0 (only tl + S extra exps):
    #   exp(sim - rmax) = e0 * exp(cmax - g) * exp(g - rmax),  g = global max.
    # The per-row factor cancels in the normalization; clamping it only guards
    # against overflow for rows far below the global max.
    rmax = jnp.max(sim, axis=1, keepdims=True)             # (tl, 1)
    g = jnp.max(cmax, axis=1, keepdims=True)               # (1, 1)
    fac_col = jnp.exp(cmax - g)                            # (1, S), <= 1
    fac_row = jnp.exp(jnp.minimum(g - rmax, 80.0))         # (tl, 1)
    e1 = e0 * fac_col * fac_row
    sm1 = e1 / jnp.sum(e1, axis=1, keepdims=True)          # softmax over S (rows)
    conf_ref[0] = sm0 * sm1


def coarse_matching_pallas(f0, f1, temperature):
    """f0: (N, L, C), f1: (N, S, C) -> (conf (N,L,S) f32, sim (N,L,S) f32)."""
    n, l, c = f0.shape
    s = f1.shape[1]
    scale = 1.0 / (float(c) * float(temperature))          # (f0/sqrt(c))@(f1/sqrt(c))/T
    f0 = f0.astype(jnp.bfloat16)
    f1 = f1.astype(jnp.bfloat16)
    tl = _pick_row_tile(l, row_bytes=4 * s * 4)

    # pass 1: sim tiles (required module output) + online column stats
    sim, cmax, csum = pl.pallas_call(
        partial(_sim_colstats_kernel, scale=scale),
        out_shape=(jax.ShapeDtypeStruct((n, l, s), jnp.float32),
                   jax.ShapeDtypeStruct((n, 1, s), jnp.float32),
                   jax.ShapeDtypeStruct((n, 1, s), jnp.float32)),
        grid=(n, l // tl),
        in_specs=[pl.BlockSpec((1, tl, c), lambda b, i: (b, i, 0)),
                  pl.BlockSpec((1, s, c), lambda b, i: (b, 0, 0))],
        out_specs=(pl.BlockSpec((1, tl, s), lambda b, i: (b, i, 0)),
                   pl.BlockSpec((1, 1, s), lambda b, i: (b, 0, 0)),
                   pl.BlockSpec((1, 1, s), lambda b, i: (b, 0, 0))),
        compiler_params=_cparams(("parallel", "arbitrary")),
    )(f0, f1)

    # pass 2: dual softmax per L tile (fully parallel)
    conf = pl.pallas_call(
        _dual_softmax_kernel,
        out_shape=jax.ShapeDtypeStruct((n, l, s), jnp.float32),
        grid=(n, l // tl),
        in_specs=[pl.BlockSpec((1, tl, s), lambda b, i: (b, i, 0)),
                  pl.BlockSpec((1, 1, s), lambda b, i: (b, 0, 0)),
                  pl.BlockSpec((1, 1, s), lambda b, i: (b, 0, 0))],
        out_specs=pl.BlockSpec((1, tl, s), lambda b, i: (b, i, 0)),
        compiler_params=_cparams(("parallel", "parallel")),
    )(sim, cmax, csum)
    return conf, sim


# ----------------------------------------------------------------------------
# Backbone (NHWC convs, eval-mode BN folded into weights, bf16 activations)
# ----------------------------------------------------------------------------

def conv2d(x, w_hwio, bias=None, stride=1, pad=0, act=None):
    y = jax.lax.conv_general_dilated(
        x, w_hwio, window_strides=(stride, stride),
        padding=[(pad, pad), (pad, pad)],
        dimension_numbers=('NHWC', 'HWIO', 'NHWC'),
        preferred_element_type=jnp.float32)
    if bias is not None:
        y = y + bias
    if act == 'relu':
        y = jax.nn.relu(y)
    elif act == 'leaky':
        y = jax.nn.leaky_relu(y, 0.01)
    return y.astype(jnp.bfloat16)


def basic_block(x, p, stride):
    y = conv2d(x, p['conv1_w'], p['conv1_b'], stride, 1, act='relu')
    y = conv2d(y, p['conv2_w'], p['conv2_b'], 1, 1)
    if 'down_w' in p:
        x = conv2d(x, p['down_w'], p['down_b'], stride, 0)
    return jax.nn.relu(x + y).astype(jnp.bfloat16)


def bilinear_up2_align_corners(x):
    """F.interpolate(scale_factor=2, mode='bilinear', align_corners=True), NHWC."""
    n, h, w, c = x.shape
    oh, ow = 2 * h, 2 * w
    xf = x.astype(jnp.float32)
    ys = jnp.linspace(0.0, h - 1.0, oh)
    xs = jnp.linspace(0.0, w - 1.0, ow)
    y0 = jnp.floor(ys).astype(jnp.int32)
    y1 = jnp.minimum(y0 + 1, h - 1)
    x0 = jnp.floor(xs).astype(jnp.int32)
    x1 = jnp.minimum(x0 + 1, w - 1)
    wy = (ys - y0.astype(jnp.float32))[None, :, None, None]
    wx = (xs - x0.astype(jnp.float32))[None, None, :, None]
    g = lambda yi, xi: xf[:, yi, :, :][:, :, xi, :]
    top = g(y0, x0) * (1.0 - wx) + g(y0, x1) * wx
    bot = g(y1, x0) * (1.0 - wx) + g(y1, x1) * wx
    return (top * (1.0 - wy) + bot * wy).astype(x.dtype)


def backbone_fpn_8_2(x, p):
    x0 = conv2d(x, p['conv1_w'], p['conv1_b'], 2, 3, act='relu')   # 1/2

    def run_layer(h, blocks, strides):
        for bp, s in zip(blocks, strides):
            h = basic_block(h, bp, s)
        return h

    x1 = run_layer(x0, p['layer1'], [1, 1])   # 1/2
    x2 = run_layer(x1, p['layer2'], [2, 1])   # 1/4
    x3 = run_layer(x2, p['layer3'], [2, 1])   # 1/8

    x3_out = conv2d(x3, p['layer3_outconv_w'], None, 1, 0)
    x3_out_2x = bilinear_up2_align_corners(x3_out)

    x2_out = conv2d(x2, p['layer2_outconv_w'], None, 1, 0)
    t = x2_out + x3_out_2x
    t = conv2d(t, p['layer2_outconv2']['conv1_w'],
               p['layer2_outconv2']['conv1_b'], 1, 1, act='leaky')
    x2_out = conv2d(t, p['layer2_outconv2']['conv2_w'], None, 1, 1)
    x2_out_2x = bilinear_up2_align_corners(x2_out)

    x1_out = conv2d(x1, p['layer1_outconv_w'], None, 1, 0)
    t = x1_out + x2_out_2x
    t = conv2d(t, p['layer1_outconv2']['conv1_w'],
               p['layer1_outconv2']['conv1_b'], 1, 1, act='leaky')
    x1_out = conv2d(t, p['layer1_outconv2']['conv2_w'], None, 1, 1)

    return x3_out, x1_out   # (coarse 1/8, fine 1/2)


# ----------------------------------------------------------------------------
# Position encoding / transformer / matching glue
# ----------------------------------------------------------------------------

def make_pos_encoding(d_model, max_shape=(256, 256), temp_bug_fix=True):
    y_pos = jnp.cumsum(jnp.ones(max_shape, jnp.float32), axis=0)[None]
    x_pos = jnp.cumsum(jnp.ones(max_shape, jnp.float32), axis=1)[None]
    idx = jnp.arange(0, d_model // 2, 2, dtype=jnp.float32)
    if temp_bug_fix:
        div = jnp.exp(idx * (-math.log(10000.0) / (d_model // 2)))
    else:  # reproduce original LoFTR precedence bug
        div = jnp.exp(idx * ((-math.log(10000.0) / d_model) // 2))
    div = div[:, None, None]
    pe = jnp.zeros((d_model,) + max_shape, jnp.float32)
    pe = pe.at[0::4].set(jnp.sin(x_pos * div))
    pe = pe.at[1::4].set(jnp.cos(x_pos * div))
    pe = pe.at[2::4].set(jnp.sin(y_pos * div))
    pe = pe.at[3::4].set(jnp.cos(y_pos * div))
    return pe[None]   # (1, d_model, H, W)


def make_head_mask(c, nhead):
    d = c // nhead
    row = jnp.arange(c, dtype=jnp.int32)[:, None] // d
    col = jnp.arange(c, dtype=jnp.int32)[None, :] // d
    return (row == col).astype(jnp.float32)   # (C, C) block-diagonal


def loftr_encoder_layer(x, source, p, head_mask):
    n, l, c = x.shape
    s = source.shape[1]
    x2 = x.reshape(n * l, c)
    src2 = source.reshape(n * s, c)
    q = matmul_pallas(x2, p['q_w']).reshape(n, l, c)
    k = matmul_pallas(src2, p['k_w']).reshape(n, s, c)
    v = matmul_pallas(src2, p['v_w']).reshape(n, s, c)
    msg = linear_attention_pallas(q, k, v, head_mask)                 # (n, l, c)
    msg = matmul_ln_pallas(msg.reshape(n * l, c), p['merge_w'],
                           p['norm1_g'], p['norm1_b'])                # LN(merge(msg))
    h = matmul2_pallas(x2, p['mlp0_x_w'], msg, p['mlp0_m_w'],
                       activation='relu')                             # mlp[0:2]([x, msg])
    y = matmul_ln_pallas(h, p['mlp1_w'], p['norm2_g'], p['norm2_b'],
                         residual=x2)                                 # x + LN(mlp1(h))
    return y.reshape(n, l, c)


def local_feature_transformer(f0, f1, layers, layer_names, head_mask):
    for p, name in zip(layers, layer_names):
        if name == 'self':
            f0 = loftr_encoder_layer(f0, f0, p, head_mask)
            f1 = loftr_encoder_layer(f1, f1, p, head_mask)
        elif name == 'cross':
            f0 = loftr_encoder_layer(f0, f1, p, head_mask)  # f1 sees updated f0,
            f1 = loftr_encoder_layer(f1, f0, p, head_mask)  # matching PyTorch order
    return f0, f1


def loftr_forward(params, img0, img1, config):
    bs = config['input_batch_size']
    d = config['coarse']['d_model']

    x = jnp.concatenate([img0, img1], axis=0)                 # (2N, 1, H, W)
    x = jnp.transpose(x, (0, 2, 3, 1)).astype(jnp.bfloat16)   # NHWC, bf16
    feat_c, feat_f = backbone_fpn_8_2(x, params['backbone'])
    feat_c0, feat_c1 = feat_c[:bs], feat_c[bs:]
    del feat_f   # fine 1/2 features are produced but unused by this forward

    h, w = feat_c0.shape[1], feat_c0.shape[2]
    pe = params['pe'][:, :h, :w, :]

    def add_pe_flatten(f):                                    # NHWC -> (N, HW, C)
        return (f + pe).reshape(f.shape[0], h * w, d)

    fc0 = add_pe_flatten(feat_c0)
    fc1 = add_pe_flatten(feat_c1)
    fc0, fc1 = local_feature_transformer(
        fc0, fc1, params['loftr_coarse'],
        config['coarse']['layer_names'], params['head_mask'])

    # TODO(synk): only the default 'dual_softmax' match type is implemented
    # (the optional sinkhorn / optimal-transport branch is not).
    conf, sim = coarse_matching_pallas(
        fc0, fc1, config['match_coarse']['dsmax_temperature'])
    return conf, sim


# ----------------------------------------------------------------------------
# Deterministic parameter init (PyTorch-like raw params) + inference prep
# ----------------------------------------------------------------------------

def conv_init(key, cout, cin, kh, kw):
    fan_in = cin * kh * kw
    return jax.random.normal(key, (cout, cin, kh, kw), jnp.float32) / math.sqrt(fan_in)


def bn_init(c):
    return {'weight': jnp.ones(c, jnp.float32), 'bias': jnp.zeros(c, jnp.float32),
            'mean': jnp.zeros(c, jnp.float32), 'var': jnp.ones(c, jnp.float32)}


def linear_init(key, dout, din):
    return jax.random.normal(key, (dout, din), jnp.float32) / math.sqrt(din)


def init_backbone(key, cfg):
    d0, b = cfg['initial_dim'], cfg['block_dims']
    keys = iter(jax.random.split(key, 64))

    def block(cin, cout, stride):
        bp = {'conv1': conv_init(next(keys), cout, cin, 3, 3), 'bn1': bn_init(cout),
              'conv2': conv_init(next(keys), cout, cout, 3, 3), 'bn2': bn_init(cout)}
        if stride != 1:
            bp['down_conv'] = conv_init(next(keys), cout, cin, 1, 1)
            bp['down_bn'] = bn_init(cout)
        return bp

    return {
        'conv1': conv_init(next(keys), d0, 1, 7, 7), 'bn1': bn_init(d0),
        'layer1': [block(d0, b[0], 1), block(b[0], b[0], 1)],
        'layer2': [block(b[0], b[1], 2), block(b[1], b[1], 1)],
        'layer3': [block(b[1], b[2], 2), block(b[2], b[2], 1)],
        'layer3_outconv': conv_init(next(keys), b[2], b[2], 1, 1),
        'layer2_outconv': conv_init(next(keys), b[2], b[1], 1, 1),
        'layer2_outconv2': {'conv1': conv_init(next(keys), b[2], b[2], 3, 3),
                            'bn': bn_init(b[2]),
                            'conv2': conv_init(next(keys), b[1], b[2], 3, 3)},
        # ResNetFPN_8_2: layer1_outconv maps block_dims[0] -> block_dims[1]
        'layer1_outconv': conv_init(next(keys), b[1], b[0], 1, 1),
        'layer1_outconv2': {'conv1': conv_init(next(keys), b[1], b[1], 3, 3),
                            'bn': bn_init(b[1]),
                            'conv2': conv_init(next(keys), b[0], b[1], 3, 3)},
    }


def init_transformer(key, cfg):
    d = cfg['d_model']
    layers = []
    for lk in jax.random.split(key, len(cfg['layer_names'])):
        ks = jax.random.split(lk, 6)
        layers.append({
            'q_proj': linear_init(ks[0], d, d),
            'k_proj': linear_init(ks[1], d, d),
            'v_proj': linear_init(ks[2], d, d),
            'merge': linear_init(ks[3], d, d),
            'mlp0': linear_init(ks[4], 2 * d, 2 * d),
            'mlp1': linear_init(ks[5], d, 2 * d),
            'norm1': {'weight': jnp.ones(d, jnp.float32),
                      'bias': jnp.zeros(d, jnp.float32)},
            'norm2': {'weight': jnp.ones(d, jnp.float32),
                      'bias': jnp.zeros(d, jnp.float32)},
        })
    return layers


def init_params(key, config):
    kb, kt = jax.random.split(key)
    return {
        'backbone': init_backbone(kb, config['backbone']),
        'pe': make_pos_encoding(config['coarse']['d_model'], max_shape=(256, 256),
                                temp_bug_fix=config['coarse']['temp_bug_fix']),
        'loftr_coarse': init_transformer(kt, config['coarse']),
    }


def _fold_conv_bn(w_oihw, bn=None, eps=1e-5):
    """Fold eval-mode BatchNorm into the conv weight; return (HWIO bf16, bias)."""
    if bn is None:
        w, b = w_oihw, None
    else:
        s = bn['weight'] / jnp.sqrt(bn['var'] + eps)
        w = w_oihw * s[:, None, None, None]
        b = (bn['bias'] - bn['mean'] * s).astype(jnp.float32)
    return jnp.transpose(w, (2, 3, 1, 0)).astype(jnp.bfloat16), b


def prepare_params(raw, config):
    """One-time inference prep: fold BN, transpose / split / bf16-cast weights."""
    bb = raw['backbone']

    def prep_block(bp):
        out = {}
        out['conv1_w'], out['conv1_b'] = _fold_conv_bn(bp['conv1'], bp['bn1'])
        out['conv2_w'], out['conv2_b'] = _fold_conv_bn(bp['conv2'], bp['bn2'])
        if 'down_conv' in bp:
            out['down_w'], out['down_b'] = _fold_conv_bn(bp['down_conv'], bp['down_bn'])
        return out

    def prep_outconv2(op):
        w1, b1 = _fold_conv_bn(op['conv1'], op['bn'])
        w2, _ = _fold_conv_bn(op['conv2'])
        return {'conv1_w': w1, 'conv1_b': b1, 'conv2_w': w2}

    backbone = {}
    backbone['conv1_w'], backbone['conv1_b'] = _fold_conv_bn(bb['conv1'], bb['bn1'])
    for name in ('layer1', 'layer2', 'layer3'):
        backbone[name] = [prep_block(bp) for bp in bb[name]]
    backbone['layer3_outconv_w'], _ = _fold_conv_bn(bb['layer3_outconv'])
    backbone['layer2_outconv_w'], _ = _fold_conv_bn(bb['layer2_outconv'])
    backbone['layer2_outconv2'] = prep_outconv2(bb['layer2_outconv2'])
    backbone['layer1_outconv_w'], _ = _fold_conv_bn(bb['layer1_outconv'])
    backbone['layer1_outconv2'] = prep_outconv2(bb['layer1_outconv2'])

    d = config['coarse']['d_model']
    layers = []
    for lp in raw['loftr_coarse']:
        mlp0_t = lp['mlp0'].T.astype(jnp.bfloat16)        # (2d, 2d), rows = inputs
        layers.append({
            'q_w': lp['q_proj'].T.astype(jnp.bfloat16),
            'k_w': lp['k_proj'].T.astype(jnp.bfloat16),
            'v_w': lp['v_proj'].T.astype(jnp.bfloat16),
            'merge_w': lp['merge'].T.astype(jnp.bfloat16),
            'mlp0_x_w': mlp0_t[:d, :],                    # acts on x
            'mlp0_m_w': mlp0_t[d:, :],                    # acts on msg
            'mlp1_w': lp['mlp1'].T.astype(jnp.bfloat16),
            'norm1_g': lp['norm1']['weight'].reshape(1, d).astype(jnp.float32),
            'norm1_b': lp['norm1']['bias'].reshape(1, d).astype(jnp.float32),
            'norm2_g': lp['norm2']['weight'].reshape(1, d).astype(jnp.float32),
            'norm2_b': lp['norm2']['bias'].reshape(1, d).astype(jnp.float32),
        })

    pe = jnp.transpose(raw['pe'], (0, 2, 3, 1)).astype(jnp.bfloat16)   # NHWC
    head_mask = make_head_mask(d, config['coarse']['nhead'])
    return {'backbone': backbone, 'loftr_coarse': layers, 'pe': pe,
            'head_mask': head_mask}


CONFIG = {
    'input_batch_size': 2,
    'backbone': {'initial_dim': 16, 'block_dims': [16, 32, 64]},
    'coarse': {'d_model': 64, 'nhead': 4, 'layer_names': ['self', 'cross'],
               'attention': 'linear', 'temp_bug_fix': True},
    'match_coarse': {'dsmax_temperature': 0.1},
}


if __name__ == "__main__":
    key = jax.random.PRNGKey(0)
    k_img0, k_img1, k_params = jax.random.split(key, 3)
    N, H, W = CONFIG['input_batch_size'], 64, 64
    img0 = jax.random.normal(k_img0, (N, 1, H, W), jnp.float32)
    img1 = jax.random.normal(k_img1, (N, 1, H, W), jnp.float32)
    params = prepare_params(init_params(k_params, CONFIG), CONFIG)

    fwd = jax.jit(partial(loftr_forward, config=CONFIG))
    conf_matrix, sim_matrix = fwd(params, img0, img1)
    jax.block_until_ready((conf_matrix, sim_matrix))

    L = (H // 8) * (W // 8)
    assert conf_matrix.shape == (N, L, L) and sim_matrix.shape == (N, L, L)
    assert bool(jnp.all(jnp.isfinite(conf_matrix)))
    assert bool(jnp.all(jnp.isfinite(sim_matrix)))
    print("KERNEL_OK")
</pallas_src>

<mosaic_0001>
module attributes {stable_mosaic.version = 11 : i64} {
  func.func @_matmul_kernel(%arg0: i32, %arg1: memref<64x64xbf16, #tpu.memory_space<vmem>>, %arg2: memref<64x64xbf16, #tpu.memory_space<vmem>>, %arg3: memref<64x64xbf16, #tpu.memory_space<vmem>>) attributes {dimension_semantics = [#tpu.dimension_semantics<parallel>], iteration_bounds = array<i64: 2>, scalar_prefetch = 0 : i64, scratch_operands = 0 : i64, tpu.core_type = #tpu.core_type<tc>, window_params = [{transform_indices = @transform_0, window_bounds = array<i64: 64, 64>}, {pipeline_mode = #tpu.pipeline_mode<synchronous>, transform_indices = @transform_1, window_bounds = array<i64: 64, 64>}, {transform_indices = @transform_2, window_bounds = array<i64: 64, 64>}]} {
    %c0 = arith.constant 0 : index
    %c0_0 = arith.constant 0 : index
    %0 = vector.load %arg1[%c0, %c0_0] : memref<64x64xbf16, #tpu.memory_space<vmem>>, vector<64x64xbf16>
    %c0_1 = arith.constant 0 : index
    %c0_2 = arith.constant 0 : index
    %1 = vector.load %arg2[%c0_1, %c0_2] : memref<64x64xbf16, #tpu.memory_space<vmem>>, vector<64x64xbf16>
    %cst = arith.constant dense<0.000000e+00> : vector<64x64xf32>
    %2 = tpu.matmul %0, %1, %cst {dimension_numbers = #tpu.dot_dimension_numbers<[1], [0], [0], [1], [0, 0, 1, 1], [], []>} : vector<64x64xbf16>, vector<64x64xbf16>, vector<64x64xf32> -> vector<64x64xf32>
    %3 = arith.truncf %2 : vector<64x64xf32> to vector<64x64xbf16>
    %c0_3 = arith.constant 0 : index
    %c0_4 = arith.constant 0 : index
    %4 = vector.load %arg3[%c0_3, %c0_4] : memref<64x64xbf16, #tpu.memory_space<vmem>>, vector<64x64xbf16>
    tpu.vector_store %arg3[%c0_3, %c0_4], %3 {strides = array<i32>} : memref<64x64xbf16, #tpu.memory_space<vmem>>, vector<64x64xbf16>,
    return
  }
  func.func @transform_0(%arg0: i32) -> (i32, i32) {
    %c0_i32 = arith.constant 0 : i32
    %c0_i32_0 = arith.constant 0 : i32
    return %arg0, %c0_i32 : i32, i32
  }
  func.func @transform_1(%arg0: i32) -> (i32, i32) {
    %c0_i32 = arith.constant 0 : i32
    %c0_i32_0 = arith.constant 0 : i32
    %c0_i32_1 = arith.constant 0 : i32
    return %c0_i32, %c0_i32_0 : i32, i32
  }
  func.func @transform_2(%arg0: i32) -> (i32, i32) {
    %c0_i32 = arith.constant 0 : i32
    %c0_i32_0 = arith.constant 0 : i32
    return %arg0, %c0_i32 : i32, i32
  }
}

module attributes {stable_mosaic.version = 11 : i64} {
  func.func @_kv_accum_kernel(%arg0: i32, %arg1: i32, %arg2: memref<1x64x64xbf16, #tpu.memory_space<vmem>>, %arg3: memref<1x64x64xbf16, #tpu.memory_space<vmem>>, %arg4: memref<64x64xf32, #tpu.memory_space<vmem>>, %arg5: memref<1x128x64xf32, #tpu.memory_space<vmem>>, %arg6: memref<64x64xf32, #tpu.memory_space<vmem>>, %arg7: memref<1x64xf32, #tpu.memory_space<vmem>>) attributes {dimension_semantics = [#tpu.dimension_semantics<parallel>, #tpu.dimension_semantics<arbitrary>], iteration_bounds = array<i64: 2, 1>, scalar_prefetch = 0 : i64, scratch_operands = 2 : i64, tpu.core_type = #tpu.core_type<tc>, window_params = [{transform_indices = @transform_0, window_bounds = array<i64: 1, 64, 64>}, {transform_indices = @transform_1, window_bounds = array<i64: 1, 64, 64>}, {pipeline_mode = #tpu.pipeline_mode<synchronous>, transform_indices = @transform_2, window_bounds = array<i64: 64, 64>}, {transform_indices = @transform_3, window_bounds = array<i64: 1, 128, 64>}]} {
    %c0_i32 = arith.constant 0 : i32
    %0 = arith.cmpi eq, %arg1, %c0_i32 : i32
    %1 = arith.extui %0 : i1 to i32
    %c0_i32_0 = arith.constant 0 : i32
    %2 = arith.cmpi ne, %1, %c0_i32_0 : i32
    scf.if %2 {
      %cst_20 = arith.constant 0.000000e+00 : f32
      %31 = vector.broadcast %cst_20 : f32 to vector<64x64xf32>
      %c0_21 = arith.constant 0 : index
      %c0_22 = arith.constant 0 : index
      %32 = vector.load %arg6[%c0_21, %c0_22] : memref<64x64xf32, #tpu.memory_space<vmem>>, vector<64x64xf32>
      tpu.vector_store %arg6[%c0_21, %c0_22], %31 {strides = array<i32>} : memref<64x64xf32, #tpu.memory_space<vmem>>, vector<64x64xf32>,
      %cst_23 = arith.constant 0.000000e+00 : f32
      %33 = vector.broadcast %cst_23 : f32 to vector<1x64xf32>
      %c0_24 = arith.constant 0 : index
      %c0_25 = arith.constant 0 : index
      %34 = vector.load %arg7[%c0_24, %c0_25] : memref<1x64xf32, #tpu.memory_space<vmem>>, vector<1x64xf32>
      tpu.vector_store %arg7[%c0_24, %c0_25], %33 {strides = array<i32>} : memref<1x64xf32, #tpu.memory_space<vmem>>, vector<1x64xf32>,
    } else {
    }
    %c0 = arith.constant 0 : index
    %c0_1 = arith.constant 0 : index
    %c0_2 = arith.constant 0 : index
    %3 = vector.load %arg2[%c0, %c0_1, %c0_2] : memref<1x64x64xbf16, #tpu.memory_space<vmem>>, vector<1x64x64xbf16>
    %4 = vector.shape_cast %3 : vector<1x64x64xbf16> to vector<64x64xbf16>
    %5 = arith.extf %4 : vector<64x64xbf16> to vector<64x64xf32>
    %cst = arith.constant 0.000000e+00 : f32
    %6 = vector.broadcast %cst : f32 to vector<64x64xf32>
    %7 = arith.cmpf ogt, %5, %6 : vector<64x64xf32>
    %cst_3 = arith.constant 1.000000e+00 : f32
    %8 = vector.broadcast %cst_3 : f32 to vector<64x64xf32>
    %9 = arith.addf %5, %8 : vector<64x64xf32>
    %10 = math.exp %5 : vector<64x64xf32>
    %11 = arith.select %7, %9, %10 : vector<64x64xi1>, vector<64x64xf32>
    %12 = arith.truncf %11 : vector<64x64xf32> to vector<64x64xbf16>
    %c0_4 = arith.constant 0 : index
    %c0_5 = arith.constant 0 : index
    %c0_6 = arith.constant 0 : index
    %13 = vector.load %arg3[%c0_4, %c0_5, %c0_6] : memref<1x64x64xbf16, #tpu.memory_space<vmem>>, vector<1x64x64xbf16>
    %14 = vector.shape_cast %13 : vector<1x64x64xbf16> to vector<64x64xbf16>
    %15 = arith.extf %14 : vector<64x64xbf16> to vector<64x64xf32>
    %cst_7 = arith.constant 1.562500e-02 : f32
    %16 = vector.broadcast %cst_7 : f32 to vector<64x64xf32>
    %17 = arith.mulf %15, %16 : vector<64x64xf32>
    %18 = arith.truncf %17 : vector<64x64xf32> to vector<64x64xbf16>
    %c0_8 = arith.constant 0 : index
    %c0_9 = arith.constant 0 : index
    %19 = vector.load %arg6[%c0_8, %c0_9] : memref<64x64xf32, #tpu.memory_space<vmem>>, vector<64x64xf32>
    %cst_10 = arith.constant dense<0.000000e+00> : vector<64x64xf32>
    %20 = tpu.matmul %18, %12, %cst_10 {dimension_numbers = #tpu.dot_dimension_numbers<[0], [0], [1], [1], [0, 1, 1, 1], [], []>} : vector<64x64xbf16>, vector<64x64xbf16>, vector<64x64xf32> -> vector<64x64xf32>
    %21 = arith.addf %19, %20 : vector<64x64xf32>
    %c0_11 = arith.constant 0 : index
    %c0_12 = arith.constant 0 : index
    %22 = vector.load %arg6[%c0_11, %c0_12] : memref<64x64xf32, #tpu.memory_space<vmem>>, vector<64x64xf32>
    tpu.vector_store %arg6[%c0_11, %c0_12], %21 {strides = array<i32>} : memref<64x64xf32, #tpu.memory_space<vmem>>, vector<64x64xf32>,
    %c0_13 = arith.constant 0 : index
    %c0_14 = arith.constant 0 : index
    %23 = vector.load %arg7[%c0_13, %c0_14] : memref<1x64xf32, #tpu.memory_space<vmem>>, vector<1x64xf32>
    %cst_15 = arith.constant dense<0.000000e+00> : vector<64xf32>
    %24 = vector.multi_reduction <add>, %11, %cst_15 [0] : vector<64x64xf32> to vector<64xf32>
    %25 = vector.shape_cast %24 : vector<64xf32> to vector<1x64xf32>
    %26 = arith.addf %23, %25 : vector<1x64xf32>
    %c0_16 = arith.constant 0 : index
    %c0_17 = arith.constant 0 : index
    %27 = vector.load %arg7[%c0_16, %c0_17] : memref<1x64xf32, #tpu.memory_space<vmem>>, vector<1x64xf32>
    tpu.vector_store %arg7[%c0_16, %c0_17], %26 {strides = array<i32>} : memref<1x64xf32, #tpu.memory_space<vmem>>, vector<1x64xf32>,
    %c0_i32_18 = arith.constant 0 : i32
    %28 = arith.cmpi eq, %arg1, %c0_i32_18 : i32
    %29 = arith.extui %28 : i1 to i32
    %c0_i32_19 = arith.constant 0 : i32
    %30 = arith.cmpi ne, %29, %c0_i32_19 : i32
    scf.if %30 {
      %c0_20 = arith.constant 0 : index
      %c0_21 = arith.constant 0 : index
      %31 = vector.load %arg4[%c0_20, %c0_21] : memref<64x64xf32, #tpu.memory_space<vmem>>, vector<64x64xf32>
      %c0_22 = arith.constant 0 : index
      %c0_23 = arith.constant 0 : index
      %32 = vector.load %arg6[%c0_22, %c0_23] : memref<64x64xf32, #tpu.memory_space<vmem>>, vector<64x64xf32>
      %33 = arith.mulf %32, %31 : vector<64x64xf32>
      %c0_24 = arith.constant 0 : index
      %c0_25 = arith.constant 0 : index
      %34 = vector.load %arg7[%c0_24, %c0_25] : memref<1x64xf32, #tpu.memory_space<vmem>>, vector<1x64xf32>
      %35 = vector.broadcast %34 : vector<1x64xf32> to vector<64x64xf32>
      %36 = arith.mulf %35, %31 : vector<64x64xf32>
      %37 = tpu.concatenate %33, %36 in 0 : vector<64x64xf32>, vector<64x64xf32> -> vector<128x64xf32>
      %c0_26 = arith.constant 0 : index
      %c0_27 = arith.constant 0 : index
      %c0_28 = arith.constant 0 : index
      %38 = vector.load %arg5[%c0_26, %c0_27, %c0_28] : memref<1x128x64xf32, #tpu.memory_space<vmem>>, vector<1x128x64xf32>
      %39 = vector.shape_cast %38 : vector<1x128x64xf32> to vector<128x64xf32>
      %40 = vector.shape_cast %37 : vector<128x64xf32> to vector<1x128x64xf32>
      tpu.vector_store %arg5[%c0_26, %c0_27, %c0_28], %40 {strides = array<i32>} : memref<1x128x64xf32, #tpu.memory_space<vmem>>, vector<1x128x64xf32>,
    } else {
    }
    return
  }
  func.func @transform_0(%arg0: i32, %arg1: i32) -> (i32, i32, i32) {
    %c0_i32 = arith.constant 0 : i32
    %c0_i32_0 = arith.constant 0 : i32
    return %arg0, %arg1, %c0_i32 : i32, i32, i32
  }
  func.func @transform_1(%arg0: i32, %arg1: i32) -> (i32, i32, i32) {
    %c0_i32 = arith.constant 0 : i32
    %c0_i32_0 = arith.constant 0 : i32
    return %arg0, %arg1, %c0_i32 : i32, i32, i32
  }
  func.func @transform_2(%arg0: i32, %arg1: i32) -> (i32, i32) {
    %c0_i32 = arith.constant 0 : i32
    %c0_i32_0 = arith.constant 0 : i32
    %c0_i32_1 = arith.constant 0 : i32
    return %c0_i32, %c0_i32_0 : i32, i32
  }
  func.func @transform_3(%arg0: i32, %arg1: i32) -> (i32, i32, i32) {
    %c0_i32 = arith.constant 0 : i32
    %c0_i32_0 = arith.constant 0 : i32
    %c0_i32_1 = arith.constant 0 : i32
    return %arg0, %c0_i32, %c0_i32_0 : i32, i32, i32
  }
}

module attributes {stable_mosaic.version = 11 : i64} {
  func.func @_attn_apply_kernel(%arg0: i32, %arg1: i32, %arg2: memref<1x64x64xbf16, #tpu.memory_space<vmem>>, %arg3: memref<1x128x64xf32, #tpu.memory_space<vmem>>, %arg4: memref<1x64x64xbf16, #tpu.memory_space<vmem>>) attributes {dimension_semantics = [#tpu.dimension_semantics<parallel>, #tpu.dimension_semantics<parallel>], iteration_bounds = array<i64: 2, 1>, scalar_prefetch = 0 : i64, scratch_operands = 0 : i64, tpu.core_type = #tpu.core_type<tc>, window_params = [{transform_indices = @transform_0, window_bounds = array<i64: 1, 64, 64>}, {transform_indices = @transform_1, window_bounds = array<i64: 1, 128, 64>}, {transform_indices = @transform_2, window_bounds = array<i64: 1, 64, 64>}]} {
    %c0 = arith.constant 0 : index
    %c0_0 = arith.constant 0 : index
    %c0_1 = arith.constant 0 : index
    %0 = vector.load %arg2[%c0, %c0_0, %c0_1] : memref<1x64x64xbf16, #tpu.memory_space<vmem>>, vector<1x64x64xbf16>
    %1 = vector.shape_cast %0 : vector<1x64x64xbf16> to vector<64x64xbf16>
    %2 = arith.extf %1 : vector<64x64xbf16> to vector<64x64xf32>
    %cst = arith.constant 0.000000e+00 : f32
    %3 = vector.broadcast %cst : f32 to vector<64x64xf32>
    %4 = arith.cmpf ogt, %2, %3 : vector<64x64xf32>
    %cst_2 = arith.constant 1.000000e+00 : f32
    %5 = vector.broadcast %cst_2 : f32 to vector<64x64xf32>
    %6 = arith.addf %2, %5 : vector<64x64xf32>
    %7 = math.exp %2 : vector<64x64xf32>
    %8 = arith.select %4, %6, %7 : vector<64x64xi1>, vector<64x64xf32>
    %c0_3 = arith.constant 0 : index
    %c0_4 = arith.constant 0 : index
    %c0_5 = arith.constant 0 : index
    %9 = vector.load %arg3[%c0_3, %c0_4, %c0_5] : memref<1x128x64xf32, #tpu.memory_space<vmem>>, vector<1x128x64xf32>
    %10 = vector.shape_cast %9 : vector<1x128x64xf32> to vector<128x64xf32>
    %11 = arith.truncf %10 : vector<128x64xf32> to vector<128x64xbf16>
    %12 = arith.truncf %8 : vector<64x64xf32> to vector<64x64xbf16>
    %cst_6 = arith.constant dense<0.000000e+00> : vector<64x128xf32>
    %13 = tpu.matmul %12, %11, %cst_6 {dimension_numbers = #tpu.dot_dimension_numbers<[1], [1], [0], [0], [0, 0, 1, 0], [], []>} : vector<64x64xbf16>, vector<128x64xbf16>, vector<64x128xf32> -> vector<64x128xf32>
    %14 = vector.extract_strided_slice %13 {offsets = [0, 0], sizes = [64, 64], strides = [1, 1]} : vector<64x128xf32> to vector<64x64xf32>
    %15 = vector.extract_strided_slice %13 {offsets = [0, 64], sizes = [64, 64], strides = [1, 1]} : vector<64x128xf32> to vector<64x64xf32>
    %cst_7 = arith.constant 9.99999997E-7 : f32
    %16 = vector.broadcast %cst_7 : f32 to vector<64x64xf32>
    %17 = arith.addf %15, %16 : vector<64x64xf32>
    %18 = tpu.reciprocal %17 {approx = true} : vector<64x64xf32> -> vector<64x64xf32>
    %19 = arith.mulf %14, %18 : vector<64x64xf32>
    %cst_8 = arith.constant 6.400000e+01 : f32
    %20 = vector.broadcast %cst_8 : f32 to vector<64x64xf32>
    %21 = arith.mulf %19, %20 : vector<64x64xf32>
    %22 = arith.truncf %21 : vector<64x64xf32> to vector<64x64xbf16>
    %c0_9 = arith.constant 0 : index
    %c0_10 = arith.constant 0 : index
    %c0_11 = arith.constant 0 : index
    %23 = vector.load %arg4[%c0_9, %c0_10, %c0_11] : memref<1x64x64xbf16, #tpu.memory_space<vmem>>, vector<1x64x64xbf16>
    %24 = vector.shape_cast %23 : vector<1x64x64xbf16> to vector<64x64xbf16>
    %25 = vector.shape_cast %22 : vector<64x64xbf16> to vector<1x64x64xbf16>
    tpu.vector_store %arg4[%c0_9, %c0_10, %c0_11], %25 {strides = array<i32>} : memref<1x64x64xbf16, #tpu.memory_space<vmem>>, vector<1x64x64xbf16>,
    return
  }
  func.func @transform_0(%arg0: i32, %arg1: i32) -> (i32, i32, i32) {
    %c0_i32 = arith.constant 0 : i32
    %c0_i32_0 = arith.constant 0 : i32
    return %arg0, %arg1, %c0_i32 : i32, i32, i32
  }
  func.func @transform_1(%arg0: i32, %arg1: i32) -> (i32, i32, i32) {
    %c0_i32 = arith.constant 0 : i32
    %c0_i32_0 = arith.constant 0 : i32
    %c0_i32_1 = arith.constant 0 : i32
    return %arg0, %c0_i32, %c0_i32_0 : i32, i32, i32
  }
  func.func @transform_2(%arg0: i32, %arg1: i32) -> (i32, i32, i32) {
    %c0_i32 = arith.constant 0 : i32
    %c0_i32_0 = arith.constant 0 : i32
    return %arg0, %arg1, %c0_i32 : i32, i32, i32
  }
}

module attributes {stable_mosaic.version = 11 : i64} {
  func.func @_matmul_ln_kernel(%arg0: i32, %arg1: memref<64x64xbf16, #tpu.memory_space<vmem>>, %arg2: memref<64x64xbf16, #tpu.memory_space<vmem>>, %arg3: memref<1x64xf32, #tpu.memory_space<vmem>>, %arg4: memref<1x64xf32, #tpu.memory_space<vmem>>, %arg5: memref<64x64xbf16, #tpu.memory_space<vmem>>) attributes {dimension_semantics = [#tpu.dimension_semantics<parallel>], iteration_bounds = array<i64: 2>, scalar_prefetch = 0 : i64, scratch_operands = 0 : i64, tpu.core_type = #tpu.core_type<tc>, window_params = [{transform_indices = @transform_0, window_bounds = array<i64: 64, 64>}, {pipeline_mode = #tpu.pipeline_mode<synchronous>, transform_indices = @transform_1, window_bounds = array<i64: 64, 64>}, {pipeline_mode = #tpu.pipeline_mode<synchronous>, transform_indices = @transform_2, window_bounds = array<i64: 1, 64>}, {pipeline_mode = #tpu.pipeline_mode<synchronous>, transform_indices = @transform_3, window_bounds = array<i64: 1, 64>}, {transform_indices = @transform_4, window_bounds = array<i64: 64, 64>}]} {
    %c0 = arith.constant 0 : index
    %c0_0 = arith.constant 0 : index
    %0 = vector.load %arg1[%c0, %c0_0] : memref<64x64xbf16, #tpu.memory_space<vmem>>, vector<64x64xbf16>
    %c0_1 = arith.constant 0 : index
    %c0_2 = arith.constant 0 : index
    %1 = vector.load %arg2[%c0_1, %c0_2] : memref<64x64xbf16, #tpu.memory_space<vmem>>, vector<64x64xbf16>
    %cst = arith.constant dense<0.000000e+00> : vector<64x64xf32>
    %2 = tpu.matmul %0, %1, %cst {dimension_numbers = #tpu.dot_dimension_numbers<[1], [0], [0], [1], [0, 0, 1, 1], [], []>} : vector<64x64xbf16>, vector<64x64xbf16>, vector<64x64xf32> -> vector<64x64xf32>
    %cst_3 = arith.constant dense<0.000000e+00> : vector<64xf32>
    %3 = vector.multi_reduction <add>, %2, %cst_3 [1] : vector<64x64xf32> to vector<64xf32>
    %4 = vector.shape_cast %3 : vector<64xf32> to vector<64x1xf32>
    %cst_4 = arith.constant 6.400000e+01 : f32
    %5 = vector.broadcast %cst_4 : f32 to vector<64x1xf32>
    %6 = arith.divf %4, %5 : vector<64x1xf32>
    %7 = vector.broadcast %6 : vector<64x1xf32> to vector<64x64xf32>
    %8 = arith.subf %2, %7 : vector<64x64xf32>
    %9 = arith.mulf %8, %8 : vector<64x64xf32>
    %cst_5 = arith.constant dense<0.000000e+00> : vector<64xf32>
    %10 = vector.multi_reduction <add>, %9, %cst_5 [1] : vector<64x64xf32> to vector<64xf32>
    %11 = vector.shape_cast %10 : vector<64xf32> to vector<64x1xf32>
    %cst_6 = arith.constant 6.400000e+01 : f32
    %12 = vector.broadcast %cst_6 : f32 to vector<64x1xf32>
    %13 = arith.divf %11, %12 : vector<64x1xf32>
    %14 = vector.broadcast %6 : vector<64x1xf32> to vector<64x64xf32>
    %15 = arith.subf %2, %14 : vector<64x64xf32>
    %cst_7 = arith.constant 9.99999974E-6 : f32
    %16 = vector.broadcast %cst_7 : f32 to vector<64x1xf32>
    %17 = arith.addf %13, %16 : vector<64x1xf32>
    %18 = math.rsqrt %17 : vector<64x1xf32>
    %19 = vector.broadcast %18 : vector<64x1xf32> to vector<64x64xf32>
    %20 = arith.mulf %15, %19 : vector<64x64xf32>
    %c0_8 = arith.constant 0 : index
    %c0_9 = arith.constant 0 : index
    %21 = vector.load %arg3[%c0_8, %c0_9] : memref<1x64xf32, #tpu.memory_space<vmem>>, vector<1x64xf32>
    %22 = vector.broadcast %21 : vector<1x64xf32> to vector<64x64xf32>
    %23 = arith.mulf %20, %22 : vector<64x64xf32>
    %c0_10 = arith.constant 0 : index
    %c0_11 = arith.constant 0 : index
    %24 = vector.load %arg4[%c0_10, %c0_11] : memref<1x64xf32, #tpu.memory_space<vmem>>, vector<1x64xf32>
    %25 = vector.broadcast %24 : vector<1x64xf32> to vector<64x64xf32>
    %26 = arith.addf %23, %25 : vector<64x64xf32>
    %27 = arith.truncf %26 : vector<64x64xf32> to vector<64x64xbf16>
    %c0_12 = arith.constant 0 : index
    %c0_13 = arith.constant 0 : index
    %28 = vector.load %arg5[%c0_12, %c0_13] : memref<64x64xbf16, #tpu.memory_space<vmem>>, vector<64x64xbf16>
    tpu.vector_store %arg5[%c0_12, %c0_13], %27 {strides = array<i32>} : memref<64x64xbf16, #tpu.memory_space<vmem>>, vector<64x64xbf16>,
    return
  }
  func.func @transform_0(%arg0: i32) -> (i32, i32) {
    %c0_i32 = arith.constant 0 : i32
    %c0_i32_0 = arith.constant 0 : i32
    return %arg0, %c0_i32 : i32, i32
  }
  func.func @transform_1(%arg0: i32) -> (i32, i32) {
    %c0_i32 = arith.constant 0 : i32
    %c0_i32_0 = arith.constant 0 : i32
    %c0_i32_1 = arith.constant 0 : i32
    return %c0_i32, %c0_i32_0 : i32, i32
  }
  func.func @transform_2(%arg0: i32) -> (i32, i32) {
    %c0_i32 = arith.constant 0 : i32
    %c0_i32_0 = arith.constant 0 : i32
    %c0_i32_1 = arith.constant 0 : i32
    return %c0_i32, %c0_i32_0 : i32, i32
  }
  func.func @transform_3(%arg0: i32) -> (i32, i32) {
    %c0_i32 = arith.constant 0 : i32
    %c0_i32_0 = arith.constant 0 : i32
    %c0_i32_1 = arith.constant 0 : i32
    return %c0_i32, %c0_i32_0 : i32, i32
  }
  func.func @transform_4(%arg0: i32) -> (i32, i32) {
    %c0_i32 = arith.constant 0 : i32
    %c0_i32_0 = arith.constant 0 : i32
    return %arg0, %c0_i32 : i32, i32
  }
}

module attributes {stable_mosaic.version = 11 : i64} {
  func.func @_matmul2_kernel(%arg0: i32, %arg1: memref<64x64xbf16, #tpu.memory_space<vmem>>, %arg2: memref<64x128xbf16, #tpu.memory_space<vmem>>, %arg3: memref<64x64xbf16, #tpu.memory_space<vmem>>, %arg4: memref<64x128xbf16, #tpu.memory_space<vmem>>, %arg5: memref<64x128xbf16, #tpu.memory_space<vmem>>) attributes {dimension_semantics = [#tpu.dimension_semantics<parallel>], iteration_bounds = array<i64: 2>, scalar_prefetch = 0 : i64, scratch_operands = 0 : i64, tpu.core_type = #tpu.core_type<tc>, window_params = [{transform_indices = @transform_0, window_bounds = array<i64: 64, 64>}, {pipeline_mode = #tpu.pipeline_mode<synchronous>, transform_indices = @transform_1, window_bounds = array<i64: 64, 128>}, {transform_indices = @transform_2, window_bounds = array<i64: 64, 64>}, {pipeline_mode = #tpu.pipeline_mode<synchronous>, transform_indices = @transform_3, window_bounds = array<i64: 64, 128>}, {transform_indices = @transform_4, window_bounds = array<i64: 64, 128>}]} {
    %c0 = arith.constant 0 : index
    %c0_0 = arith.constant 0 : index
    %0 = vector.load %arg1[%c0, %c0_0] : memref<64x64xbf16, #tpu.memory_space<vmem>>, vector<64x64xbf16>
    %c0_1 = arith.constant 0 : index
    %c0_2 = arith.constant 0 : index
    %1 = vector.load %arg2[%c0_1, %c0_2] : memref<64x128xbf16, #tpu.memory_space<vmem>>, vector<64x128xbf16>
    %cst = arith.constant dense<0.000000e+00> : vector<64x128xf32>
    %2 = tpu.matmul %0, %1, %cst {dimension_numbers = #tpu.dot_dimension_numbers<[1], [0], [0], [1], [0, 0, 1, 1], [], []>} : vector<64x64xbf16>, vector<64x128xbf16>, vector<64x128xf32> -> vector<64x128xf32>
    %c0_3 = arith.constant 0 : index
    %c0_4 = arith.constant 0 : index
    %3 = vector.load %arg3[%c0_3, %c0_4] : memref<64x64xbf16, #tpu.memory_space<vmem>>, vector<64x64xbf16>
    %c0_5 = arith.constant 0 : index
    %c0_6 = arith.constant 0 : index
    %4 = vector.load %arg4[%c0_5, %c0_6] : memref<64x128xbf16, #tpu.memory_space<vmem>>, vector<64x128xbf16>
    %cst_7 = arith.constant dense<0.000000e+00> : vector<64x128xf32>
    %5 = tpu.matmul %3, %4, %cst_7 {dimension_numbers = #tpu.dot_dimension_numbers<[1], [0], [0], [1], [0, 0, 1, 1], [], []>} : vector<64x64xbf16>, vector<64x128xbf16>, vector<64x128xf32> -> vector<64x128xf32>
    %6 = arith.addf %2, %5 : vector<64x128xf32>
    %cst_8 = arith.constant 0.000000e+00 : f32
    %7 = vector.broadcast %cst_8 : f32 to vector<64x128xf32>
    %8 = arith.maximumf %6, %7 : vector<64x128xf32>
    %9 = arith.truncf %8 : vector<64x128xf32> to vector<64x128xbf16>
    %c0_9 = arith.constant 0 : index
    %c0_10 = arith.constant 0 : index
    %10 = vector.load %arg5[%c0_9, %c0_10] : memref<64x128xbf16, #tpu.memory_space<vmem>>, vector<64x128xbf16>
    tpu.vector_store %arg5[%c0_9, %c0_10], %9 {strides = array<i32>} : memref<64x128xbf16, #tpu.memory_space<vmem>>, vector<64x128xbf16>,
    return
  }
  func.func @transform_0(%arg0: i32) -> (i32, i32) {
    %c0_i32 = arith.constant 0 : i32
    %c0_i32_0 = arith.constant 0 : i32
    return %arg0, %c0_i32 : i32, i32
  }
  func.func @transform_1(%arg0: i32) -> (i32, i32) {
    %c0_i32 = arith.constant 0 : i32
    %c0_i32_0 = arith.constant 0 : i32
    %c0_i32_1 = arith.constant 0 : i32
    return %c0_i32, %c0_i32_0 : i32, i32
  }
  func.func @transform_2(%arg0: i32) -> (i32, i32) {
    %c0_i32 = arith.constant 0 : i32
    %c0_i32_0 = arith.constant 0 : i32
    return %arg0, %c0_i32 : i32, i32
  }
  func.func @transform_3(%arg0: i32) -> (i32, i32) {
    %c0_i32 = arith.constant 0 : i32
    %c0_i32_0 = arith.constant 0 : i32
    %c0_i32_1 = arith.constant 0 : i32
    return %c0_i32, %c0_i32_0 : i32, i32
  }
  func.func @transform_4(%arg0: i32) -> (i32, i32) {
    %c0_i32 = arith.constant 0 : i32
    %c0_i32_0 = arith.constant 0 : i32
    return %arg0, %c0_i32 : i32, i32
  }
}

module attributes {stable_mosaic.version = 11 : i64} {
  func.func @_matmul_ln_kernel(%arg0: i32, %arg1: memref<64x128xbf16, #tpu.memory_space<vmem>>, %arg2: memref<128x64xbf16, #tpu.memory_space<vmem>>, %arg3: memref<1x64xf32, #tpu.memory_space<vmem>>, %arg4: memref<1x64xf32, #tpu.memory_space<vmem>>, %arg5: memref<64x64xbf16, #tpu.memory_space<vmem>>, %arg6: memref<64x64xbf16, #tpu.memory_space<vmem>>) attributes {dimension_semantics = [#tpu.dimension_semantics<parallel>], iteration_bounds = array<i64: 2>, scalar_prefetch = 0 : i64, scratch_operands = 0 : i64, tpu.core_type = #tpu.core_type<tc>, window_params = [{transform_indices = @transform_0, window_bounds = array<i64: 64, 128>}, {pipeline_mode = #tpu.pipeline_mode<synchronous>, transform_indices = @transform_1, window_bounds = array<i64: 128, 64>}, {pipeline_mode = #tpu.pipeline_mode<synchronous>, transform_indices = @transform_2, window_bounds = array<i64: 1, 64>}, {pipeline_mode = #tpu.pipeline_mode<synchronous>, transform_indices = @transform_3, window_bounds = array<i64: 1, 64>}, {transform_indices = @transform_4, window_bounds = array<i64: 64, 64>}, {transform_indices = @transform_5, window_bounds = array<i64: 64, 64>}]} {
    %c0 = arith.constant 0 : index
    %c0_0 = arith.constant 0 : index
    %0 = vector.load %arg1[%c0, %c0_0] : memref<64x128xbf16, #tpu.memory_space<vmem>>, vector<64x128xbf16>
    %c0_1 = arith.constant 0 : index
    %c0_2 = arith.constant 0 : index
    %1 = vector.load %arg2[%c0_1, %c0_2] : memref<128x64xbf16, #tpu.memory_space<vmem>>, vector<128x64xbf16>
    %cst = arith.constant dense<0.000000e+00> : vector<64x64xf32>
    %2 = tpu.matmul %0, %1, %cst {dimension_numbers = #tpu.dot_dimension_numbers<[1], [0], [0], [1], [0, 0, 1, 1], [], []>} : vector<64x128xbf16>, vector<128x64xbf16>, vector<64x64xf32> -> vector<64x64xf32>
    %cst_3 = arith.constant dense<0.000000e+00> : vector<64xf32>
    %3 = vector.multi_reduction <add>, %2, %cst_3 [1] : vector<64x64xf32> to vector<64xf32>
    %4 = vector.shape_cast %3 : vector<64xf32> to vector<64x1xf32>
    %cst_4 = arith.constant 6.400000e+01 : f32
    %5 = vector.broadcast %cst_4 : f32 to vector<64x1xf32>
    %6 = arith.divf %4, %5 : vector<64x1xf32>
    %7 = vector.broadcast %6 : vector<64x1xf32> to vector<64x64xf32>
    %8 = arith.subf %2, %7 : vector<64x64xf32>
    %9 = arith.mulf %8, %8 : vector<64x64xf32>
    %cst_5 = arith.constant dense<0.000000e+00> : vector<64xf32>
    %10 = vector.multi_reduction <add>, %9, %cst_5 [1] : vector<64x64xf32> to vector<64xf32>
    %11 = vector.shape_cast %10 : vector<64xf32> to vector<64x1xf32>
    %cst_6 = arith.constant 6.400000e+01 : f32
    %12 = vector.broadcast %cst_6 : f32 to vector<64x1xf32>
    %13 = arith.divf %11, %12 : vector<64x1xf32>
    %14 = vector.broadcast %6 : vector<64x1xf32> to vector<64x64xf32>
    %15 = arith.subf %2, %14 : vector<64x64xf32>
    %cst_7 = arith.constant 9.99999974E-6 : f32
    %16 = vector.broadcast %cst_7 : f32 to vector<64x1xf32>
    %17 = arith.addf %13, %16 : vector<64x1xf32>
    %18 = math.rsqrt %17 : vector<64x1xf32>
    %19 = vector.broadcast %18 : vector<64x1xf32> to vector<64x64xf32>
    %20 = arith.mulf %15, %19 : vector<64x64xf32>
    %c0_8 = arith.constant 0 : index
    %c0_9 = arith.constant 0 : index
    %21 = vector.load %arg3[%c0_8, %c0_9] : memref<1x64xf32, #tpu.memory_space<vmem>>, vector<1x64xf32>
    %22 = vector.broadcast %21 : vector<1x64xf32> to vector<64x64xf32>
    %23 = arith.mulf %20, %22 : vector<64x64xf32>
    %c0_10 = arith.constant 0 : index
    %c0_11 = arith.constant 0 : index
    %24 = vector.load %arg4[%c0_10, %c0_11] : memref<1x64xf32, #tpu.memory_space<vmem>>, vector<1x64xf32>
    %25 = vector.broadcast %24 : vector<1x64xf32> to vector<64x64xf32>
    %26 = arith.addf %23, %25 : vector<64x64xf32>
    %c0_12 = arith.constant 0 : index
    %c0_13 = arith.constant 0 : index
    %27 = vector.load %arg5[%c0_12, %c0_13] : memref<64x64xbf16, #tpu.memory_space<vmem>>, vector<64x64xbf16>
    %28 = arith.extf %27 : vector<64x64xbf16> to vector<64x64xf32>
    %29 = arith.addf %26, %28 : vector<64x64xf32>
    %30 = arith.truncf %29 : vector<64x64xf32> to vector<64x64xbf16>
    %c0_14 = arith.constant 0 : index
    %c0_15 = arith.constant 0 : index
    %31 = vector.load %arg6[%c0_14, %c0_15] : memref<64x64xbf16, #tpu.memory_space<vmem>>, vector<64x64xbf16>
    tpu.vector_store %arg6[%c0_14, %c0_15], %30 {strides = array<i32>} : memref<64x64xbf16, #tpu.memory_space<vmem>>, vector<64x64xbf16>,
    return
  }
  func.func @transform_0(%arg0: i32) -> (i32, i32) {
    %c0_i32 = arith.constant 0 : i32
    %c0_i32_0 = arith.constant 0 : i32
    return %arg0, %c0_i32 : i32, i32
  }
  func.func @transform_1(%arg0: i32) -> (i32, i32) {
    %c0_i32 = arith.constant 0 : i32
    %c0_i32_0 = arith.constant 0 : i32
    %c0_i32_1 = arith.constant 0 : i32
    return %c0_i32, %c0_i32_0 : i32, i32
  }
  func.func @transform_2(%arg0: i32) -> (i32, i32) {
    %c0_i32 = arith.constant 0 : i32
    %c0_i32_0 = arith.constant 0 : i32
    %c0_i32_1 = arith.constant 0 : i32
    return %c0_i32, %c0_i32_0 : i32, i32
  }
  func.func @transform_3(%arg0: i32) -> (i32, i32) {
    %c0_i32 = arith.constant 0 : i32
    %c0_i32_0 = arith.constant 0 : i32
    %c0_i32_1 = arith.constant 0 : i32
    return %c0_i32, %c0_i32_0 : i32, i32
  }
  func.func @transform_4(%arg0: i32) -> (i32, i32) {
    %c0_i32 = arith.constant 0 : i32
    %c0_i32_0 = arith.constant 0 : i32
    return %arg0, %c0_i32 : i32, i32
  }
  func.func @transform_5(%arg0: i32) -> (i32, i32) {
    %c0_i32 = arith.constant 0 : i32
    %c0_i32_0 = arith.constant 0 : i32
    return %arg0, %c0_i32 : i32, i32
  }
}

module attributes {stable_mosaic.version = 11 : i64} {
  func.func @_dual_softmax_kernel(%arg0: i32, %arg1: i32, %arg2: memref<1x64x64xf32, #tpu.memory_space<vmem>>, %arg3: memref<1x1x64xf32, #tpu.memory_space<vmem>>, %arg4: memref<1x1x64xf32, #tpu.memory_space<vmem>>, %arg5: memref<1x64x64xf32, #tpu.memory_space<vmem>>) attributes {dimension_semantics = [#tpu.dimension_semantics<parallel>, #tpu.dimension_semantics<parallel>], iteration_bounds = array<i64: 2, 1>, scalar_prefetch = 0 : i64, scratch_operands = 0 : i64, tpu.core_type = #tpu.core_type<tc>, window_params = [{transform_indices = @transform_0, window_bounds = array<i64: 1, 64, 64>}, {transform_indices = @transform_1, window_bounds = array<i64: 1, 1, 64>}, {transform_indices = @transform_2, window_bounds = array<i64: 1, 1, 64>}, {transform_indices = @transform_3, window_bounds = array<i64: 1, 64, 64>}]} {
    %c0 = arith.constant 0 : index
    %c0_0 = arith.constant 0 : index
    %c0_1 = arith.constant 0 : index
    %0 = vector.load %arg2[%c0, %c0_0, %c0_1] : memref<1x64x64xf32, #tpu.memory_space<vmem>>, vector<1x64x64xf32>
    %1 = vector.shape_cast %0 : vector<1x64x64xf32> to vector<64x64xf32>
    %c0_2 = arith.constant 0 : index
    %c0_3 = arith.constant 0 : index
    %c0_4 = arith.constant 0 : index
    %2 = vector.load %arg3[%c0_2, %c0_3, %c0_4] : memref<1x1x64xf32, #tpu.memory_space<vmem>>, vector<1x1x64xf32>
    %3 = vector.shape_cast %2 : vector<1x1x64xf32> to vector<1x64xf32>
    %c0_5 = arith.constant 0 : index
    %c0_6 = arith.constant 0 : index
    %c0_7 = arith.constant 0 : index
    %4 = vector.load %arg4[%c0_5, %c0_6, %c0_7] : memref<1x1x64xf32, #tpu.memory_space<vmem>>, vector<1x1x64xf32>
    %5 = vector.shape_cast %4 : vector<1x1x64xf32> to vector<1x64xf32>
    %6 = vector.broadcast %3 : vector<1x64xf32> to vector<64x64xf32>
    %7 = arith.subf %1, %6 : vector<64x64xf32>
    %8 = math.exp %7 : vector<64x64xf32>
    %9 = vector.broadcast %5 : vector<1x64xf32> to vector<64x64xf32>
    %10 = arith.divf %8, %9 : vector<64x64xf32>
    %cst = arith.constant dense<0xFF800000> : vector<64xf32>
    %11 = vector.multi_reduction <maximumf>, %1, %cst [1] : vector<64x64xf32> to vector<64xf32>
    %12 = vector.shape_cast %11 : vector<64xf32> to vector<64x1xf32>
    %cst_8 = arith.constant dense<0xFF800000> : vector<1xf32>
    %13 = vector.multi_reduction <maximumf>, %3, %cst_8 [1] : vector<1x64xf32> to vector<1xf32>
    %14 = vector.shape_cast %13 : vector<1xf32> to vector<1x1xf32>
    %15 = vector.broadcast %14 : vector<1x1xf32> to vector<1x64xf32>
    %16 = arith.subf %3, %15 : vector<1x64xf32>
    %17 = math.exp %16 : vector<1x64xf32>
    %18 = vector.broadcast %14 : vector<1x1xf32> to vector<64x1xf32>
    %19 = arith.subf %18, %12 : vector<64x1xf32>
    %cst_9 = arith.constant 8.000000e+01 : f32
    %20 = vector.broadcast %cst_9 : f32 to vector<64x1xf32>
    %21 = arith.minimumf %19, %20 : vector<64x1xf32>
    %22 = math.exp %21 : vector<64x1xf32>
    %23 = vector.broadcast %17 : vector<1x64xf32> to vector<64x64xf32>
    %24 = arith.mulf %8, %23 : vector<64x64xf32>
    %25 = vector.broadcast %22 : vector<64x1xf32> to vector<64x64xf32>
    %26 = arith.mulf %24, %25 : vector<64x64xf32>
    %cst_10 = arith.constant dense<0.000000e+00> : vector<64xf32>
    %27 = vector.multi_reduction <add>, %26, %cst_10 [1] : vector<64x64xf32> to vector<64xf32>
    %28 = vector.shape_cast %27 : vector<64xf32> to vector<64x1xf32>
    %29 = vector.broadcast %28 : vector<64x1xf32> to vector<64x64xf32>
    %30 = arith.divf %26, %29 : vector<64x64xf32>
    %31 = arith.mulf %10, %30 : vector<64x64xf32>
    %c0_11 = arith.constant 0 : index
    %c0_12 = arith.constant 0 : index
    %c0_13 = arith.constant 0 : index
    %32 = vector.load %arg5[%c0_11, %c0_12, %c0_13] : memref<1x64x64xf32, #tpu.memory_space<vmem>>, vector<1x64x64xf32>
    %33 = vector.shape_cast %32 : vector<1x64x64xf32> to vector<64x64xf32>
    %34 = vector.shape_cast %31 : vector<64x64xf32> to vector<1x64x64xf32>
    tpu.vector_store %arg5[%c0_11, %c0_12, %c0_13], %34 {strides = array<i32>} : memref<1x64x64xf32, #tpu.memory_space<vmem>>, vector<1x64x64xf32>,
    return
  }
  func.func @transform_0(%arg0: i32, %arg1: i32) -> (i32, i32, i32) {
    %c0_i32 = arith.constant 0 : i32
    %c0_i32_0 = arith.constant 0 : i32
    return %arg0, %arg1, %c0_i32 : i32, i32, i32
  }
  func.func @transform_1(%arg0: i32, %arg1: i32) -> (i32, i32, i32) {
    %c0_i32 = arith.constant 0 : i32
    %c0_i32_0 = arith.constant 0 : i32
    %c0_i32_1 = arith.constant 0 : i32
    return %arg0, %c0_i32, %c0_i32_0 : i32, i32, i32
  }
  func.func @transform_2(%arg0: i32, %arg1: i32) -> (i32, i32, i32) {
    %c0_i32 = arith.constant 0 : i32
    %c0_i32_0 = arith.constant 0 : i32
    %c0_i32_1 = arith.constant 0 : i32
    return %arg0, %c0_i32, %c0_i32_0 : i32, i32, i32
  }
  func.func @transform_3(%arg0: i32, %arg1: i32) -> (i32, i32, i32) {
    %c0_i32 = arith.constant 0 : i32
    %c0_i32_0 = arith.constant 0 : i32
    return %arg0, %arg1, %c0_i32 : i32, i32, i32
  }
}

module attributes {stable_mosaic.version = 11 : i64} {
  func.func @_sim_colstats_kernel(%arg0: i32, %arg1: i32, %arg2: memref<1x64x64xbf16, #tpu.memory_space<vmem>>, %arg3: memref<1x64x64xbf16, #tpu.memory_space<vmem>>, %arg4: memref<1x64x64xf32, #tpu.memory_space<vmem>>, %arg5: memref<1x1x64xf32, #tpu.memory_space<vmem>>, %arg6: memref<1x1x64xf32, #tpu.memory_space<vmem>>) attributes {dimension_semantics = [#tpu.dimension_semantics<parallel>, #tpu.dimension_semantics<arbitrary>], iteration_bounds = array<i64: 2, 1>, scalar_prefetch = 0 : i64, scratch_operands = 0 : i64, tpu.core_type = #tpu.core_type<tc>, window_params = [{transform_indices = @transform_0, window_bounds = array<i64: 1, 64, 64>}, {transform_indices = @transform_1, window_bounds = array<i64: 1, 64, 64>}, {transform_indices = @transform_2, window_bounds = array<i64: 1, 64, 64>}, {transform_indices = @transform_3, window_bounds = array<i64: 1, 1, 64>}, {transform_indices = @transform_4, window_bounds = array<i64: 1, 1, 64>}]} {
    %c0_i32 = arith.constant 0 : i32
    %0 = arith.cmpi eq, %arg1, %c0_i32 : i32
    %1 = arith.extui %0 : i1 to i32
    %c0_i32_0 = arith.constant 0 : i32
    %2 = arith.cmpi ne, %1, %c0_i32_0 : i32
    scf.if %2 {
      %cst_24 = arith.constant 0xFF800000 : f32
      %35 = vector.broadcast %cst_24 : f32 to vector<1x1x64xf32>
      %c0_25 = arith.constant 0 : index
      %c0_26 = arith.constant 0 : index
      %c0_27 = arith.constant 0 : index
      %36 = vector.load %arg5[%c0_25, %c0_26, %c0_27] : memref<1x1x64xf32, #tpu.memory_space<vmem>>, vector<1x1x64xf32>
      tpu.vector_store %arg5[%c0_25, %c0_26, %c0_27], %35 {strides = array<i32>} : memref<1x1x64xf32, #tpu.memory_space<vmem>>, vector<1x1x64xf32>,
      %cst_28 = arith.constant 0.000000e+00 : f32
      %37 = vector.broadcast %cst_28 : f32 to vector<1x1x64xf32>
      %c0_29 = arith.constant 0 : index
      %c0_30 = arith.constant 0 : index
      %c0_31 = arith.constant 0 : index
      %38 = vector.load %arg6[%c0_29, %c0_30, %c0_31] : memref<1x1x64xf32, #tpu.memory_space<vmem>>, vector<1x1x64xf32>
      tpu.vector_store %arg6[%c0_29, %c0_30, %c0_31], %37 {strides = array<i32>} : memref<1x1x64xf32, #tpu.memory_space<vmem>>, vector<1x1x64xf32>,
    } else {
    }
    %c0 = arith.constant 0 : index
    %c0_1 = arith.constant 0 : index
    %c0_2 = arith.constant 0 : index
    %3 = vector.load %arg2[%c0, %c0_1, %c0_2] : memref<1x64x64xbf16, #tpu.memory_space<vmem>>, vector<1x64x64xbf16>
    %4 = vector.shape_cast %3 : vector<1x64x64xbf16> to vector<64x64xbf16>
    %c0_3 = arith.constant 0 : index
    %c0_4 = arith.constant 0 : index
    %c0_5 = arith.constant 0 : index
    %5 = vector.load %arg3[%c0_3, %c0_4, %c0_5] : memref<1x64x64xbf16, #tpu.memory_space<vmem>>, vector<1x64x64xbf16>
    %6 = vector.shape_cast %5 : vector<1x64x64xbf16> to vector<64x64xbf16>
    %cst = arith.constant dense<0.000000e+00> : vector<64x64xf32>
    %7 = tpu.matmul %4, %6, %cst {dimension_numbers = #tpu.dot_dimension_numbers<[1], [1], [0], [0], [0, 0, 1, 0], [], []>} : vector<64x64xbf16>, vector<64x64xbf16>, vector<64x64xf32> -> vector<64x64xf32>
    %cst_6 = arith.constant 1.562500e-01 : f32
    %8 = vector.broadcast %cst_6 : f32 to vector<64x64xf32>
    %9 = arith.mulf %7, %8 : vector<64x64xf32>
    %c0_7 = arith.constant 0 : index
    %c0_8 = arith.constant 0 : index
    %c0_9 = arith.constant 0 : index
    %10 = vector.load %arg4[%c0_7, %c0_8, %c0_9] : memref<1x64x64xf32, #tpu.memory_space<vmem>>, vector<1x64x64xf32>
    %11 = vector.shape_cast %10 : vector<1x64x64xf32> to vector<64x64xf32>
    %12 = vector.shape_cast %9 : vector<64x64xf32> to vector<1x64x64xf32>
    tpu.vector_store %arg4[%c0_7, %c0_8, %c0_9], %12 {strides = array<i32>} : memref<1x64x64xf32, #tpu.memory_space<vmem>>, vector<1x64x64xf32>,
    %c0_10 = arith.constant 0 : index
    %c0_11 = arith.constant 0 : index
    %c0_12 = arith.constant 0 : index
    %13 = vector.load %arg5[%c0_10, %c0_11, %c0_12] : memref<1x1x64xf32, #tpu.memory_space<vmem>>, vector<1x1x64xf32>
    %14 = vector.shape_cast %13 : vector<1x1x64xf32> to vector<1x64xf32>
    %cst_13 = arith.constant dense<0xFF800000> : vector<64xf32>
    %15 = vector.multi_reduction <maximumf>, %9, %cst_13 [0] : vector<64x64xf32> to vector<64xf32>
    %16 = vector.shape_cast %15 : vector<64xf32> to vector<1x64xf32>
    %17 = arith.maximumf %14, %16 : vector<1x64xf32>
    %c0_14 = arith.constant 0 : index
    %c0_15 = arith.constant 0 : index
    %c0_16 = arith.constant 0 : index
    %18 = vector.load %arg6[%c0_14, %c0_15, %c0_16] : memref<1x1x64xf32, #tpu.memory_space<vmem>>, vector<1x1x64xf32>
    %19 = vector.shape_cast %18 : vector<1x1x64xf32> to vector<1x64xf32>
    %20 = arith.subf %14, %17 : vector<1x64xf32>
    %21 = math.exp %20 : vector<1x64xf32>
    %22 = arith.mulf %19, %21 : vector<1x64xf32>
    %23 = vector.broadcast %17 : vector<1x64xf32> to vector<64x64xf32>
    %24 = arith.subf %9, %23 : vector<64x64xf32>
    %25 = math.exp %24 : vector<64x64xf32>
    %cst_17 = arith.constant dense<0.000000e+00> : vector<64xf32>
    %26 = vector.multi_reduction <add>, %25, %cst_17 [0] : vector<64x64xf32> to vector<64xf32>
    %27 = vector.shape_cast %26 : vector<64xf32> to vector<1x64xf32>
    %28 = arith.addf %22, %27 : vector<1x64xf32>
    %c0_18 = arith.constant 0 : index
    %c0_19 = arith.constant 0 : index
    %c0_20 = arith.constant 0 : index
    %29 = vector.load %arg6[%c0_18, %c0_19, %c0_20] : memref<1x1x64xf32, #tpu.memory_space<vmem>>, vector<1x1x64xf32>
    %30 = vector.shape_cast %29 : vector<1x1x64xf32> to vector<1x64xf32>
    %31 = vector.shape_cast %28 : vector<1x64xf32> to vector<1x1x64xf32>
    tpu.vector_store %arg6[%c0_18, %c0_19, %c0_20], %31 {strides = array<i32>} : memref<1x1x64xf32, #tpu.memory_space<vmem>>, vector<1x1x64xf32>,
    %c0_21 = arith.constant 0 : index
    %c0_22 = arith.constant 0 : index
    %c0_23 = arith.constant 0 : index
    %32 = vector.load %arg5[%c0_21, %c0_22, %c0_23] : memref<1x1x64xf32, #tpu.memory_space<vmem>>, vector<1x1x64xf32>
    %33 = vector.shape_cast %32 : vector<1x1x64xf32> to vector<1x64xf32>
    %34 = vector.shape_cast %17 : vector<1x64xf32> to vector<1x1x64xf32>
    tpu.vector_store %arg5[%c0_21, %c0_22, %c0_23], %34 {strides = array<i32>} : memref<1x1x64xf32, #tpu.memory_space<vmem>>, vector<1x1x64xf32>,
    return
  }
  func.func @transform_0(%arg0: i32, %arg1: i32) -> (i32, i32, i32) {
    %c0_i32 = arith.constant 0 : i32
    %c0_i32_0 = arith.constant 0 : i32
    return %arg0, %arg1, %c0_i32 : i32, i32, i32
  }
  func.func @transform_1(%arg0: i32, %arg1: i32) -> (i32, i32, i32) {
    %c0_i32 = arith.constant 0 : i32
    %c0_i32_0 = arith.constant 0 : i32
    %c0_i32_1 = arith.constant 0 : i32
    return %arg0, %c0_i32, %c0_i32_0 : i32, i32, i32
  }
  func.func @transform_2(%arg0: i32, %arg1: i32) -> (i32, i32, i32) {
    %c0_i32 = arith.constant 0 : i32
    %c0_i32_0 = arith.constant 0 : i32
    return %arg0, %arg1, %c0_i32 : i32, i32, i32
  }
  func.func @transform_3(%arg0: i32, %arg1: i32) -> (i32, i32, i32) {
    %c0_i32 = arith.constant 0 : i32
    %c0_i32_0 = arith.constant 0 : i32
    %c0_i32_1 = arith.constant 0 : i32
    return %arg0, %c0_i32, %c0_i32_0 : i32, i32, i32
  }
  func.func @transform_4(%arg0: i32, %arg1: i32) -> (i32, i32, i32) {
    %c0_i32 = arith.constant 0 : i32
    %c0_i32_0 = arith.constant 0 : i32
    %c0_i32_1 = arith.constant 0 : i32
    return %arg0, %c0_i32, %c0_i32_0 : i32, i32, i32
  }
}

</mosaic_0001>

<bundles_post_ra>
// kernel: loftr_forward.43
= control target key start
LH: loop header
LB: loop body
LE: loop exit
PB: predicated region body
PF: predicated region fallthrough
CT: control target
= control target key end

     0   :  { %s421_s9 = smov 0   ;;  %s458_s0 = inlined_call_operand.vmem [shape: bf16[128,64], index: 0, kind: input, shape index: {}]   ;;  %s459_s1 = inlined_call_operand.vmem [shape: bf16[64,64], index: 1, kind: input, shape index: {}]   ;;  %s460_s2 = inlined_call_operand.vmem [shape: bf16[128,64], index: 2, kind: output, shape index: {}]  }
   0x1 LB: > { %s323_s10 = sadd.s32 4294967295, %s404_s9   ;;  %p327_p0 = scmp.ge.s32.totalorder %s404_s9, 1  ;;  %s404_s9 = sphi %s421_s9, %s12_s9  }
   0x2   : > { %p113_p1 = scmp.lt.s32.totalorder %s404_s9, 3 }
   0x4   : > { %p114_p2 = pnand %p327_p0, %p113_p1 }
   0x5   : > { %s328_s13 = sshll.u32 (!%p114_p2), %s323_s10, 3 }
   0x6   : > { %117 = sbr.rel (%p114_p2) target bundleno = 172 (0xac), region = 28  ;;  %p136_p3 = scmp.lt.s32.totalorder (!%p114_p2), %s328_s13, 15 }
   0xb   : > { %v377_v0 = vld [vmem:[%s459_s1 + $0x18] sm:$0xff]  ;;  %v376_v1 = vld [vmem:[%s459_s1 + $0x10] sm:$0xff]  ;;  %s462_s13 = smov (!%p136_p3, %s328_s13), 15  ;;  %v375_v2 = vld [vmem:[%s459_s1 + $0x8] sm:$0xff]  ;;  %vm208_vm0 = vcmask 523264   ;;  %vm258_vm1 = vcmask 519168  }
   0xc   : > { %225 = vmatpush.bf16.msra.mxu0 %v377_v0  ;;  %378 = vmatpush.bf16.msra.mxu1 %v377_v0  ;;  %s329_s18 = sshll.u32 %s462_s13, 2  ;;  %v374_v3 = vld [vmem:[%s459_s1] sm:$0xff] }
   0xd   : > { %379 = vmatpush.bf16.msra.mxu2 %v377_v0  ;;  %380 = vmatpush.bf16.msra.mxu3 %v377_v0  ;;  %s139_s23 = scalar_lea.vmem %s458_s0, %s329_s18  ;;  %s145_s26 = scalar_lea.vmem %s460_s2, %s329_s18 }
   0xe   : > { %v370_v4 = vld [vmem:[%s139_s23] sm:$0xff]  ;;  %v371_v5 = vld [vmem:[%s139_s23 + $0x8] sm:$0xff]  ;;  %v372_v6 = vld [vmem:[%s139_s23 + $0x10] sm:$0xff] }
   0xf   : > { %v373_v7 = vld [vmem:[%s139_s23 + $0x18] sm:$0xff] }
  0x10   : > { %226 = vmatpush.bf16.msra.mxu0 %v376_v1  ;;  %381 = vmatpush.bf16.msra.mxu1 %v376_v1 }
  0x11   : > { %382 = vmatpush.bf16.msra.mxu2 %v376_v1  ;;  %383 = vmatpush.bf16.msra.mxu3 %v376_v1 }
  0x14   : > { %227 = vmatpush.bf16.msra.mxu0 %v375_v2  ;;  %384 = vmatpush.bf16.msra.mxu1 %v375_v2 }
  0x15   : > { %385 = vmatpush.bf16.msra.mxu2 %v375_v2  ;;  %386 = vmatpush.bf16.msra.mxu3 %v375_v2 }
  0x18   : > { %228 = vmatpush.bf16.msra.mxu0 %v374_v3  ;;  %387 = vmatpush.bf16.msra.mxu1 %v374_v3 }
  0x19   : > { %388 = vmatpush.bf16.msra.mxu2 %v374_v3  ;;  %389 = vmatpush.bf16.msra.mxu3 %v374_v3 }
  0x1b   : > { %364 = vmatmul.msk.bf16.vlgmr.msra.gmra.mxu0 %vm208_vm0, %v370_v4  ;;  %365 = vmatmul.msk.bf16.vlgmr.msra.gmra.mxu1 %vm208_vm0, %v371_v5 }
  0x1c   : > { %366 = vmatmul.msk.bf16.vlgmr.msra.gmra.mxu2 %vm208_vm0, %v372_v6  ;;  %367 = vmatmul.msk.bf16.vlgmr.msra.gmra.mxu3 %vm208_vm0, %v373_v7 }
  0x98   : > { %v230_v8 = vpop.f32.mrf.mxu0  ;;  %v235_v9 = vpop.f32.mrf.mxu1 }
  0x99   : > { %v250_v10 = vpack.c.bf16 %v230_v8, %v230_v8  ;;  %v252_v11 = vpack.c.bf16 %v235_v9, %v235_v9 }
  0x9b   : > { %259 = vst.msk [vmem:[%s145_s26] sm:$0xf] %vm258_vm1, %v250_v10 }
  0x9c   : > { %261 = vst.msk [vmem:[%s145_s26 + $0x8] sm:$0xf] %vm258_vm1, %v252_v11 }
  0x9f   : > { %v240_v12 = vpop.f32.mrf.mxu2  ;;  %v245_v13 = vpop.f32.mrf.mxu3 }
  0xa0   : > { %v254_v14 = vpack.c.bf16 %v240_v12, %v240_v12  ;;  %v256_v15 = vpack.c.bf16 %v245_v13, %v245_v13  ;;  %v232_v16 = vpop.f32.mrf.mxu0  ;;  %v237_v17 = vpop.f32.mrf.mxu1 }
  0xa1   : > { %v251_v18 = vpack.c.bf16 %v232_v16, %v232_v16  ;;  %v253_v19 = vpack.c.bf16 %v237_v17, %v237_v17 }
  0xa2   : > { %263 = vst.msk [vmem:[%s145_s26 + $0x10] sm:$0xf] %vm258_vm1, %v254_v14 }
  0xa3   : > { %265 = vst.msk [vmem:[%s145_s26 + $0x18] sm:$0xf] %vm258_vm1, %v256_v15 }
  0xa4   : > { %260 = vst.msk [vmem:[%s145_s26 + $0x4] sm:$0xf] %vm258_vm1, %v251_v18 }
  0xa5   : > { %262 = vst.msk [vmem:[%s145_s26 + $0xc] sm:$0xf] %vm258_vm1, %v253_v19 }
  0xa7   : > { %v242_v20 = vpop.f32.mrf.mxu2  ;;  %v247_v21 = vpop.f32.mrf.mxu3 }
  0xa8   : > { %v255_v22 = vpack.c.bf16 %v242_v20, %v242_v20  ;;  %v257_v23 = vpack.c.bf16 %v247_v21, %v247_v21 }
  0xaa   : > { %264 = vst.msk [vmem:[%s145_s26 + $0x14] sm:$0xf] %vm258_vm1, %v255_v22 }
  0xab   : > { %266 = vst.msk [vmem:[%s145_s26 + $0x1c] sm:$0xf] %vm258_vm1, %v257_v23 }
  0xac PF: > { %s12_s9 = sadd.s32 1, %s404_s9  }
  0xad   : > { %p9_p4 = scmp.ge.s32.totalorder %s12_s9, 4  }
  0xaf   :  { %11 = sbr.rel (!%p9_p4) target bundleno = 1 (0x1), region = 58 }

// kernel: loftr_forward.45
= control target key start
LH: loop header
LB: loop body
LE: loop exit
PB: predicated region body
PF: predicated region fallthrough
CT: control target
= control target key end

     0   :  { %s746_s12 = smov 0   ;;  %s748_s13 = smov 0   ;;  %s898_s0 = inlined_call_operand.vmem [shape: bf16[2,64,64], index: 0, kind: input, shape index: {}]   ;;  %s899_s1 = inlined_call_operand.vmem [shape: bf16[2,64,64], index: 1, kind: input, shape index: {}]   ;;  %s900_s2 = inlined_call_operand.vmem [shape: f32[64,64], index: 2, kind: input, shape index: {}]   ;;  %s901_s3 = inlined_call_operand.vmem [shape: f32[2,128,64], index: 3, kind: output, shape index: {}]  }
   0x1   :  { %s750_s14 = smov 0  }
   0x2 LB: > { %s25_s15 = sadd.s32 1, %s719_s13  ;;  %p592_p0 = scmp.ge.s32.totalorder %s723_s14, 1  ;;  %s723_s14 = sphi %s750_s14, %s13_s14   ;;  %s719_s13 = sphi %s748_s13, %s903_s13   ;;  %s715_s12 = sphi %s746_s12, %s902_s12  }
   0x3   : > { %p27_p1 = scmp.ge.s32.totalorder %s25_s15, 2  ;;  %p173_p2 = scmp.lt.s32.totalorder %s723_s14, 3 }
   0x5   : > { %s905_s15 = smov (%p27_p1, %s25_s15), 0  ;;  %p174_p3 = pnand %p592_p0, %p173_p2 }
   0x6   : > { %p211_p4 = scmp.lt.s32.totalorder (!%p174_p3), %s715_s12, 1 }
   0x7   : > { %177 = sbr.rel (%p174_p3) target bundleno = 396 (0x18c), region = 32 }
   0xc   : > { %s907_s12 = smov (!%p211_p4, %s715_s12), 1  ;;  %vm240_vm6 = vcmask 523264   ;;  %vm249_vm7 = vcmask 516096   ;;  %v725_v57 = vmov 0.0  }
   0xd   : > { %s605_s16 = sshll.u32 %s907_s12, 5  ;;  %250 = vst.msk [vmem:[#allocation3] sm:$0x1] %vm249_vm7, %v725_v57  ;;  %s607_s23 = sshll.u32 %s907_s12, 7 }
   0xe   : > { %s770_s19 = scalar_lea.vmem %s899_s1, %s605_s16  ;;  %s218_s22 = scalar_lea.vmem %s898_s0, %s605_s16  ;;  %241 = vst.msk [vmem:[#allocation2] sm:$0xff] %vm240_vm6, %v725_v57 }
   0xf   : > { %v625_v0 = vld [vmem:[%s770_s19] sm:$0xff]   ;;  %v641_v5 = vld [vmem:[%s218_s22 + $0x10] sm:$0xff]   ;;  %v642_v7 = vld [vmem:[%s218_s22 + $0x18] sm:$0xff]   ;;  %242 = vst.msk [vmem:[#allocation2 + $0x8] sm:$0xff] %vm240_vm6, %v725_v57  ;;  %s826_s28 = scalar_lea.vmem %s901_s3, %s607_s23 }
  0x10   : > { %v626_v1 = vunpack.c.l.bf16 %v625_v0  ;;  %v627_v2 = vunpack.c.h.bf16 %v625_v0  ;;  %v618_v8 = vunpack.c.l.bf16 %v641_v5  ;;  %v622_v9 = vunpack.c.l.bf16 %v642_v7  ;;  %v643_v10 = vld [vmem:[%s770_s19 + $0x8] sm:$0xff]   ;;  %v609_v14 = vld [vmem:[%s218_s22] sm:$0xff]   ;;  %v644_v34 = vld [vmem:[%s770_s19 + $0x10] sm:$0xff]   ;;  %243 = vst.msk [vmem:[#allocation2 + $0x10] sm:$0xff] %vm240_vm6, %v725_v57 }
  0x11   : > { %v640_v11 = vld [vmem:[%s218_s22 + $0x8] sm:$0xff]   ;;  %v623_v12 = vunpack.c.h.bf16 %v642_v7  ;;  %v619_v13 = vunpack.c.h.bf16 %v641_v5  ;;  %v630_v16 = vunpack.c.l.bf16 %v643_v10  ;;  %v631_v17 = vunpack.c.h.bf16 %v643_v10  ;;  %244 = vst.msk [vmem:[#allocation2 + $0x18] sm:$0xff] %vm240_vm6, %v725_v57 }
  0x12   : > { %v327_v3 = vmul.f32 0.015625, %v626_v1  ;;  %v328_v4 = vmul.f32 0.015625, %v627_v2  ;;  %v291_v15 = vmul.f32 1.442695, %v618_v8  ;;  %v614_v18 = vunpack.c.l.bf16 %v640_v11  ;;  %245 = vst.msk [vmem:[#allocation2 + $0x20] sm:$0xff] %vm240_vm6, %v725_v57 }
  0x13   : > { %v295_v19 = vmul.f32 1.442695, %v622_v9  ;;  %v615_v20 = vunpack.c.h.bf16 %v640_v11  ;;  %v297_v21 = vmul.f32 1.442695, %v623_v12  ;;  %v777_v22 = vunpack.c.l.bf16 %v609_v14  ;;  %246 = vst.msk [vmem:[#allocation2 + $0x28] sm:$0xff] %vm240_vm6, %v725_v57 }
  0x14   : > { %v335_v6 = vpack.c.bf16 %v328_v4, %v327_v3  ;;  %v293_v23 = vmul.f32 1.442695, %v619_v13  ;;  %v779_v24 = vunpack.c.h.bf16 %v609_v14  ;;  %685 = vpow2.f32 %v291_v15  ;;  %247 = vst.msk [vmem:[#allocation2 + $0x30] sm:$0xff] %vm240_vm6, %v725_v57 }
  0x15   : > { %v329_v25 = vmul.f32 0.015625, %v630_v16  ;;  %v330_v26 = vmul.f32 0.015625, %v631_v17  ;;  %v287_v27 = vmul.f32 1.442695, %v614_v18  ;;  %687 = vpow2.f32 %v295_v19  ;;  %248 = vst.msk [vmem:[#allocation2 + $0x38] sm:$0xff] %vm240_vm6, %v725_v57 }
  0x16   : > { %347 = vxpose.xlu0.c.b16.start [1/4] (short) (narrow) %v335_v6, 64  ;;  %v289_v28 = vmul.f32 1.442695, %v615_v20  ;;  %689 = vpow2.f32 %v297_v21  ;;  %v283_v29 = vmul.f32 1.442695, %v777_v22  ;;  %vm273_vm0 = vcmp.gt.f32.partialorder %v622_v9, 0.0 }
  0x17   : > { %691 = vpow2.f32 %v293_v23  ;;  %v285_v30 = vmul.f32 1.442695, %v779_v24  ;;  %v336_v31 = vpack.c.bf16 %v330_v26, %v329_v25  ;;  %vm274_vm1 = vcmp.gt.f32.partialorder %v623_v12, 0.0 }
  0x18   : > { %693 = vpow2.f32 %v287_v27  ;;  %v281_v36 = vadd.f32 1.0, %v622_v9  ;;  %v282_v38 = vadd.f32 1.0, %v623_v12  ;;  %vm271_vm2 = vcmp.gt.f32.partialorder %v618_v8, 0.0  ;;  %v645_v12 = vld [vmem:[%s770_s19 + $0x18] sm:$0xff]  }
  0x19   : > { %695 = vpow2.f32 %v289_v28  ;;  %vm272_vm3 = vcmp.gt.f32.partialorder %v619_v13, 0.0  ;;  %v279_v39 = vadd.f32 1.0, %v618_v8  ;;  %v634_v40 = vunpack.c.l.bf16 %v644_v34 }
  0x1a   : > { %v686_v32 = vpop.eup %685  ;;  %697 = vpow2.f32 %v283_v29  ;;  %v280_v42 = vadd.f32 1.0, %v619_v13  ;;  %vm269_vm4 = vcmp.gt.f32.partialorder %v614_v18, 0.0  ;;  %v277_v46 = vadd.f32 1.0, %v614_v18  ;;  %v421_v29 = vld [vmem:[#allocation3] sm:$0x1] }
  0x1b   : > { %v688_v33 = vpop.eup %687  ;;  %699 = vpow2.f32 %v285_v30  ;;  %v303_v45 = vsel %vm271_vm2, %v279_v39, %v686_v32  ;;  %v635_v48 = vunpack.c.h.bf16 %v644_v34  ;;  %vm270_vm5 = vcmp.gt.f32.partialorder %v615_v20, 0.0  ;;  %v450_v39 = vld [vmem:[%s900_s2 + $0x8] sm:$0xff] }
  0x1c   : > { %v690_v35 = vpop.eup %689  ;;  %v784_v41 = vsel %vm273_vm0, %v281_v36, %v688_v33  ;;  %v278_v53 = vadd.f32 1.0, %v615_v20  ;;  %vm267_vm8 = vcmp.gt.f32.partialorder %v777_v22, 0.0  ;;  %vm268_vm9 = vcmp.gt.f32.partialorder %v779_v24, 0.0 }
  0x1d   : > { %v692_v37 = vpop.eup %691  ;;  %v786_v44 = vsel %vm274_vm1, %v282_v38, %v690_v35  ;;  %v275_v58 = vadd.f32 1.0, %v777_v22  ;;  %v276_v59 = vadd.f32 1.0, %v779_v24  ;;  %v331_v60 = vmul.f32 0.015625, %v634_v40 }
  0x1e   : > { %v694_v43 = vpop.eup %693  ;;  %v310_v49 = vpack.c.bf16 %v786_v44, %v784_v41  ;;  %v304_v50 = vsel %vm272_vm3, %v280_v42, %v692_v37  ;;  %v332_v61 = vmul.f32 0.015625, %v635_v48  ;;  %v429_v8 = vsel %vm240_vm6, %v303_v45, 0.0  ;;  %v449_v37 = vld [vmem:[%s900_s2] sm:$0xff]  ;;  %v340_v48 = vld [vmem:[#allocation2 + $0x8] sm:$0xff] }
  0x1f   : > { %v696_v47 = vpop.eup %695  ;;  %v309_v52 = vpack.c.bf16 %v304_v50, %v303_v45  ;;  %v301_v55 = vsel %vm269_vm4, %v277_v46, %v694_v43  ;;  %v431_v11 = vsel %vm240_vm6, %v304_v50, 0.0  ;;  %v433_v14 = vsel %vm240_vm6, %v784_v41, 0.0  ;;  %v451_v41 = vld [vmem:[%s900_s2 + $0x10] sm:$0xff]  ;;  %v339_v43 = vld [vmem:[#allocation2] sm:$0xff]  ;;  %v452_v46 = vld [vmem:[%s900_s2 + $0x18] sm:$0xff] }
  0x20   : > { %v698_v51 = vpop.eup %697  ;;  %380 = vmatpush.bf16.msra.mxu0 %v310_v49  ;;  %646 = vmatpush.bf16.msra.mxu1 %v310_v49  ;;  %v302_v56 = vsel %vm270_vm5, %v278_v53, %v696_v47  ;;  %v425_v1 = vsel %vm240_vm6, %v301_v55, 0.0  ;;  %v337_v5 = vpack.c.bf16 %v332_v61, %v331_v60  ;;  %v638_v16 = vunpack.c.l.bf16 %v645_v12  ;;  %v341_v53 = vld [vmem:[#allocation2 + $0x10] sm:$0xff]  ;;  %v342_v60 = vld [vmem:[#allocation2 + $0x18] sm:$0xff] }
  0x21   : > { %v700_v54 = vpop.eup %699  ;;  %647 = vmatpush.bf16.msra.mxu2 %v310_v49  ;;  %648 = vmatpush.bf16.msra.mxu3 %v310_v49  ;;  %v299_v62 = vsel %vm267_vm8, %v275_v58, %v698_v51  ;;  %v308_v0 = vpack.c.bf16 %v302_v56, %v301_v55  ;;  %v427_v6 = vsel %vm240_vm6, %v302_v56, 0.0  ;;  %v639_v17 = vunpack.c.h.bf16 %v645_v12  ;;  %v453_v55 = vld [vmem:[%s900_s2 + $0x20] sm:$0xff]  ;;  %v344_v12 = vld [vmem:[#allocation2 + $0x28] sm:$0xff] }
  0x22   : > { %v300_v63 = vsel %vm268_vm9, %v276_v59, %v700_v54  ;;  %v422_v2 = vsel %vm240_vm6, %v299_v62, 0.0  ;;  %v435_v18 = vsel %vm240_vm6, %v786_v44, 0.0  ;;  %v333_v21 = vmul.f32 0.015625, %v638_v16 }
  0x23   : > { %v423_v3 = vsel %vm240_vm6, %v300_v63, 0.0  ;;  %v307_v9 = vpack.c.bf16 %v300_v63, %v299_v62  ;;  %v334_v22 = vmul.f32 0.015625, %v639_v17  ;;  %v454_v62 = vld [vmem:[%s900_s2 + $0x28] sm:$0xff]  ;;  %v345_v17 = vld [vmem:[#allocation2 + $0x30] sm:$0xff] }
  0x24   : > { %381 = vmatpush.bf16.msra.mxu0 %v309_v52  ;;  %649 = vmatpush.bf16.msra.mxu1 %v309_v52  ;;  %v424_v4 = vadd.f32 %v423_v3, %v422_v2  ;;  %v455_v3 = vld [vmem:[%s900_s2 + $0x30] sm:$0xff] }
  0x25   : > { %650 = vmatpush.bf16.msra.mxu2 %v309_v52  ;;  %651 = vmatpush.bf16.msra.mxu3 %v309_v52  ;;  %v338_v25 = vpack.c.bf16 %v334_v22, %v333_v21  ;;  %v346_v22 = vld [vmem:[#allocation2 + $0x38] sm:$0xff] }
  0x26   : > { %348 = vxpose.xlu0.c.b16.cont [2/4] (short) (narrow) %v336_v31, 64  ;;  %v426_v7 = vadd.f32 %v425_v1, %v424_v4 }
  0x28   : > { %382 = vmatpush.bf16.msra.mxu0 %v308_v0  ;;  %652 = vmatpush.bf16.msra.mxu1 %v308_v0  ;;  %v428_v10 = vadd.f32 %v427_v6, %v426_v7  ;;  %v343_v7 = vld [vmem:[#allocation2 + $0x20] sm:$0xff] }
  0x29   : > { %653 = vmatpush.bf16.msra.mxu2 %v308_v0  ;;  %654 = vmatpush.bf16.msra.mxu3 %v308_v0 }
  0x2a   : > { %v430_v13 = vadd.f32 %v429_v8, %v428_v10 }
  0x2c   : > { %383 = vmatpush.bf16.msra.mxu0 %v307_v9  ;;  %655 = vmatpush.bf16.msra.mxu1 %v307_v9  ;;  %v432_v15 = vadd.f32 %v431_v11, %v430_v13 }
  0x2d   : > { %656 = vmatpush.bf16.msra.mxu2 %v307_v9  ;;  %657 = vmatpush.bf16.msra.mxu3 %v307_v9  ;;  %v456_v9 = vld [vmem:[%s900_s2 + $0x38] sm:$0xff] }
  0x2e   : > { %v434_v19 = vadd.f32 %v433_v14, %v432_v15 }
  0x30   : > { %v436_v20 = vadd.f32 %v435_v18, %v434_v19 }
  0x32   : > { %v437_v23 = vrot.slane %v436_v20, 4 }
  0x34   : > { %v438_v24 = vadd.f32 %v437_v23, %v436_v20 }
  0x36   : > { %349 = vxpose.xlu0.c.b16.cont [3/4] (short) (narrow) %v337_v5, 64  ;;  %v439_v26 = vrot.slane %v438_v24, 2 }
  0x38   : > { %v440_v27 = vadd.f32 %v439_v26, %v438_v24 }
  0x3a   : > { %v441_v28 = vrot.slane %v440_v27, 1 }
  0x3c   : > { %v442_v30 = vadd.f32 %v441_v28, %v440_v27 }
  0x3e   : > { %v443_v31 = vadd.f32 %v442_v30, %v421_v29 }
  0x40   : > { %445 = vst.msk [vmem:[#allocation3] sm:$0x1] %vm249_vm7, %v443_v31 }
  0x46   : > { %350 = vxpose.xlu0.c.b16.end [4/4] (short) (narrow) %v338_v25, 64 }
  0x47   : > { %v684_v36 = vld [vmem:[#allocation3] ss:$0 sm:$0xff] }
  0x48   : > { %v477_v38 = vmul.f32 %v684_v36, %v449_v37  ;;  %v478_v40 = vmul.f32 %v684_v36, %v450_v39  ;;  %v479_v42 = vmul.f32 %v684_v36, %v451_v41  ;;  %v480_v47 = vmul.f32 %v684_v36, %v452_v46 }
  0x49   : > { %v481_v57 = vmul.f32 %v684_v36, %v453_v55  ;;  %v482_v0 = vmul.f32 %v684_v36, %v454_v62  ;;  %v483_v4 = vmul.f32 %v684_v36, %v455_v3  ;;  %v484_v11 = vmul.f32 %v684_v36, %v456_v9 }
  0x4a   : > { %493 = vst.msk [vmem:[%s826_s28 + $0x40] sm:$0xff] %vm240_vm6, %v477_v38 }
  0x4b   : > { %494 = vst.msk [vmem:[%s826_s28 + $0x48] sm:$0xff] %vm240_vm6, %v478_v40 }
  0x4c   : > { %495 = vst.msk [vmem:[%s826_s28 + $0x50] sm:$0xff] %vm240_vm6, %v479_v42 }
  0x4d   : > { %496 = vst.msk [vmem:[%s826_s28 + $0x58] sm:$0xff] %vm240_vm6, %v480_v47 }
  0x4e   : > { %497 = vst.msk [vmem:[%s826_s28 + $0x60] sm:$0xff] %vm240_vm6, %v481_v57 }
  0x4f   : > { %498 = vst.msk [vmem:[%s826_s28 + $0x68] sm:$0xff] %vm240_vm6, %v482_v0 }
  0x50   : > { %499 = vst.msk [vmem:[%s826_s28 + $0x70] sm:$0xff] %vm240_vm6, %v483_v4 }
  0x51   : > { %500 = vst.msk [vmem:[%s826_s28 + $0x78] sm:$0xff] %vm240_vm6, %v484_v11 }
  0xc2   : > { %v355_v32 = vpop.trf.xlu0 }
  0xc3   : > { %599 = vmatmul.msk.bf16.vlgmr.msra.gmra.mxu0 %vm240_vm6, %v355_v32 }
  0xd2   : > { %v356_v33 = vpop.trf.xlu0 }
  0xd3   : > { %600 = vmatmul.msk.bf16.vlgmr.msra.gmra.mxu1 %vm240_vm6, %v356_v33 }
  0xe2   : > { %v357_v34 = vpop.trf.xlu0 }
  0xe3   : > { %601 = vmatmul.msk.bf16.vlgmr.msra.gmra.mxu2 %vm240_vm6, %v357_v34 }
  0xf2   : > { %v358_v35 = vpop.trf.xlu0 }
  0xf3   : > { %602 = vmatmul.msk.bf16.vlgmr.msra.gmra.mxu3 %vm240_vm6, %v358_v35 }
 0x140   : > { %v385_v44 = vpop.f32.mrf.mxu0 }
 0x141   : > { %v405_v45 = vadd.f32 %v385_v44, %v339_v43 }
 0x143   : > { %413 = vst.msk [vmem:[#allocation2] sm:$0xff] %vm240_vm6, %v405_v45 }
 0x148   : > { %v387_v49 = vpop.f32.mrf.mxu0 }
 0x149   : > { %v406_v50 = vadd.f32 %v387_v49, %v340_v48 }
 0x14a   : > { %v457_v51 = vld [vmem:[#allocation2] sm:$0xff] }
 0x14b   : > { %v465_v52 = vmul.f32 %v457_v51, %v449_v37  ;;  %414 = vst.msk [vmem:[#allocation2 + $0x8] sm:$0xff] %vm240_vm6, %v406_v50 }
 0x14d   : > { %485 = vst.msk [vmem:[%s826_s28] sm:$0xff] %vm240_vm6, %v465_v52 }
 0x150   : > { %v390_v54 = vpop.f32.mrf.mxu1 }
 0x151   : > { %v407_v56 = vadd.f32 %v390_v54, %v341_v53 }
 0x152   : > { %v458_v58 = vld [vmem:[#allocation2 + $0x8] sm:$0xff] }
 0x153   : > { %v466_v59 = vmul.f32 %v458_v58, %v450_v39  ;;  %415 = vst.msk [vmem:[#allocation2 + $0x10] sm:$0xff] %vm240_vm6, %v407_v56 }
 0x155   : > { %486 = vst.msk [vmem:[%s826_s28 + $0x8] sm:$0xff] %vm240_vm6, %v466_v59 }
 0x158   : > { %v392_v61 = vpop.f32.mrf.mxu1 }
 0x159   : > { %v408_v63 = vadd.f32 %v392_v61, %v342_v60 }
 0x15a   : > { %v459_v1 = vld [vmem:[#allocation2 + $0x10] sm:$0xff] }
 0x15b   : > { %v467_v2 = vmul.f32 %v459_v1, %v451_v41  ;;  %416 = vst.msk [vmem:[#allocation2 + $0x18] sm:$0xff] %vm240_vm6, %v408_v63 }
 0x15d   : > { %487 = vst.msk [vmem:[%s826_s28 + $0x10] sm:$0xff] %vm240_vm6, %v467_v2 }
 0x162   : > { %v460_v5 = vld [vmem:[#allocation2 + $0x18] sm:$0xff] }
 0x163   : > { %v468_v6 = vmul.f32 %v460_v5, %v452_v46 }
 0x165   : > { %488 = vst.msk [vmem:[%s826_s28 + $0x18] sm:$0xff] %vm240_vm6, %v468_v6 }
 0x166   : > { %v395_v8 = vpop.f32.mrf.mxu2 }
 0x167   : > { %v409_v10 = vadd.f32 %v395_v8, %v343_v7 }
 0x169   : > { %417 = vst.msk [vmem:[#allocation2 + $0x20] sm:$0xff] %vm240_vm6, %v409_v10 }
 0x16e   : > { %v397_v13 = vpop.f32.mrf.mxu2 }
 0x16f   : > { %v410_v14 = vadd.f32 %v397_v13, %v344_v12 }
 0x170   : > { %v461_v15 = vld [vmem:[#allocation2 + $0x20] sm:$0xff] }
 0x171   : > { %v469_v16 = vmul.f32 %v461_v15, %v453_v55  ;;  %418 = vst.msk [vmem:[#allocation2 + $0x28] sm:$0xff] %vm240_vm6, %v410_v14 }
 0x173   : > { %489 = vst.msk [vmem:[%s826_s28 + $0x20] sm:$0xff] %vm240_vm6, %v469_v16 }
 0x176   : > { %v400_v18 = vpop.f32.mrf.mxu3 }
 0x177   : > { %v411_v19 = vadd.f32 %v400_v18, %v345_v17 }
 0x178   : > { %v462_v20 = vld [vmem:[#allocation2 + $0x28] sm:$0xff] }
 0x179   : > { %v470_v21 = vmul.f32 %v462_v20, %v454_v62  ;;  %419 = vst.msk [vmem:[#allocation2 + $0x30] sm:$0xff] %vm240_vm6, %v411_v19 }
 0x17b   : > { %490 = vst.msk [vmem:[%s826_s28 + $0x28] sm:$0xff] %vm240_vm6, %v470_v21 }
 0x17e   : > { %v402_v23 = vpop.f32.mrf.mxu3 }
 0x17f   : > { %v412_v24 = vadd.f32 %v402_v23, %v346_v22 }
 0x180   : > { %v463_v25 = vld [vmem:[#allocation2 + $0x30] sm:$0xff] }
 0x181   : > { %v471_v26 = vmul.f32 %v463_v25, %v455_v3  ;;  %420 = vst.msk [vmem:[#allocation2 + $0x38] sm:$0xff] %vm240_vm6, %v412_v24 }
 0x183   : > { %491 = vst.msk [vmem:[%s826_s28 + $0x30] sm:$0xff] %vm240_vm6, %v471_v26 }
 0x188   : > { %v464_v27 = vld [vmem:[#allocation2 + $0x38] sm:$0xff] }
 0x189   : > { %v472_v28 = vmul.f32 %v464_v27, %v456_v9 }
 0x18b   : > { %492 = vst.msk [vmem:[%s826_s28 + $0x38] sm:$0xff] %vm240_vm6, %v472_v28 }
 0x18c PF: > { %s13_s14 = sadd.s32 1, %s723_s14   ;;  %s902_s12 = smov %s719_s13 }
 0x18d   : > { %p10_p5 = scmp.ge.s32.totalorder %s13_s14, 4   ;;  %s903_s13 = smov %s905_s15 }
 0x18f   :  { %12 = sbr.rel (!%p10_p5) target bundleno = 2 (0x2), region = 73 }

// kernel: loftr_forward.46
= control target key start
LH: loop header
LB: loop body
LE: loop exit
PB: predicated region body
PF: predicated region fallthrough
CT: control target
= control target key end

     0   :  { %s693_s9 = smov 0   ;;  %s695_s10 = smov 0   ;;  %s830_s0 = inlined_call_operand.vmem [shape: bf16[2,64,64], index: 0, kind: input, shape index: {}]   ;;  %s831_s1 = inlined_call_operand.vmem [shape: f32[2,128,64], index: 1, kind: input, shape index: {}]   ;;  %s832_s2 = inlined_call_operand.vmem [shape: bf16[2,64,64], index: 2, kind: output, shape index: {}]  }
   0x1   :  { %s697_s11 = smov 0  }
   0x2 LB: > { %s24_s12 = sadd.s32 1, %s671_s10  ;;  %p537_p0 = scmp.ge.s32.totalorder %s675_s11, 1  ;;  %s675_s11 = sphi %s697_s11, %s12_s11   ;;  %s671_s10 = sphi %s695_s10, %s834_s10   ;;  %s667_s9 = sphi %s693_s9, %s833_s9  }
   0x3   : > { %p26_p1 = scmp.ge.s32.totalorder %s24_s12, 2  ;;  %p143_p2 = scmp.lt.s32.totalorder %s675_s11, 3 }
   0x5   : > { %s836_s12 = smov (%p26_p1, %s24_s12), 0  ;;  %p144_p3 = pnand %p537_p0, %p143_p2 }
   0x6   : > { %p179_p4 = scmp.lt.s32.totalorder (!%p144_p3), %s667_s9, 1  ;;  %s677_s21 = smov (!%p144_p3), 64  }
   0x7   : > { %147 = sbr.rel (%p144_p3) target bundleno = 356 (0x164), region = 28 }
   0xc   : > { %s838_s9 = smov (!%p179_p4, %s667_s9), 1  ;;  %vm287_vm0 = vcmask 523264   ;;  %vm425_vm9 = vcmask 519168  }
   0xd   : > { %s551_s13 = sshll.u32 %s838_s9, 7  ;;  %s550_s17 = sshll.u32 %s838_s9, 5 }
   0xe   : > { %s717_s16 = scalar_lea.vmem %s831_s1, %s551_s13  ;;  %s186_s20 = scalar_lea.vmem %s830_s0, %s550_s17 }
   0xf   : > { %v273_v0 = vld [vmem:[%s717_s16 + $0x70] sm:$0xff]  ;;  %v274_v1 = vld [vmem:[%s717_s16 + $0x78] sm:$0xff]  ;;  %v271_v3 = vld [vmem:[%s717_s16 + $0x60] sm:$0xff]  ;;  %s802_s24 = scalar_lea.vmem %s832_s2, %s550_s17 }
  0x10   : > { %v282_v2 = vpack.c.bf16 %v274_v1, %v273_v0  ;;  %v272_v4 = vld [vmem:[%s717_s16 + $0x68] sm:$0xff]  ;;  %v269_v8 = vld [vmem:[%s717_s16 + $0x50] sm:$0xff]  ;;  %v270_v9 = vld [vmem:[%s717_s16 + $0x58] sm:$0xff] }
  0x11   : > { %v281_v6 = vpack.c.bf16 %v272_v4, %v271_v3  ;;  %v280_v10 = vpack.c.bf16 %v270_v9, %v269_v8  ;;  %v267_v12 = vld [vmem:[%s717_s16 + $0x40] sm:$0xff]  ;;  %v268_v13 = vld [vmem:[%s717_s16 + $0x48] sm:$0xff]  ;;  %v265_v16 = vld [vmem:[%s717_s16 + $0x30] sm:$0xff] }
  0x12   : > { %v322_v5 = vsel %vm287_vm0, %v282_v2, 0  ;;  %v279_v14 = vpack.c.bf16 %v268_v13, %v267_v12  ;;  %v266_v17 = vld [vmem:[%s717_s16 + $0x38] sm:$0xff]  ;;  %v263_v20 = vld [vmem:[%s717_s16 + $0x20] sm:$0xff]  ;;  %v264_v21 = vld [vmem:[%s717_s16 + $0x28] sm:$0xff] }
  0x13   : > { %324 = vmatpush.bf16.xpose.msra.mxu0 %v322_v5  ;;  %572 = vmatpush.bf16.xpose.msra.mxu1 %v322_v5  ;;  %v319_v7 = vsel %vm287_vm0, %v281_v6, 0  ;;  %v316_v11 = vsel %vm287_vm0, %v280_v10, 0  ;;  %v278_v18 = vpack.c.bf16 %v266_v17, %v265_v16  ;;  %v554_v22 = vld [vmem:[%s186_s20] sm:$0xff]   ;;  %v569_v23 = vld [vmem:[%s186_s20 + $0x8] sm:$0xff]   ;;  %v277_v24 = vpack.c.bf16 %v264_v21, %v263_v20  ;;  %v570_v27 = vld [vmem:[%s186_s20 + $0x10] sm:$0xff]  }
  0x14   : > { %573 = vmatpush.bf16.xpose.msra.mxu2 %v322_v5  ;;  %574 = vmatpush.bf16.xpose.msra.mxu3 %v322_v5  ;;  %v313_v15 = vsel %vm287_vm0, %v279_v14, 0  ;;  %v742_v25 = vunpack.c.l.bf16 %v554_v22  ;;  %v744_v26 = vunpack.c.h.bf16 %v554_v22  ;;  %v746_v28 = vunpack.c.l.bf16 %v569_v23  ;;  %v571_v30 = vld [vmem:[%s186_s20 + $0x18] sm:$0xff]   ;;  %v261_v34 = vld [vmem:[%s717_s16 + $0x10] sm:$0xff]  ;;  %v259_v45 = vld [vmem:[%s717_s16] sm:$0xff] }
  0x15   : > { %v310_v19 = vsel %vm287_vm0, %v278_v18, 0  ;;  %v748_v29 = vunpack.c.h.bf16 %v569_v23  ;;  %v307_v31 = vsel %vm287_vm0, %v277_v24, 0  ;;  %v752_v33 = vunpack.c.l.bf16 %v570_v27  ;;  %v262_v35 = vld [vmem:[%s717_s16 + $0x18] sm:$0xff]  ;;  %v260_v46 = vld [vmem:[%s717_s16 + $0x8] sm:$0xff] }
  0x16   : > { %v235_v32 = vmul.f32 1.442695, %v742_v25  ;;  %v237_v36 = vmul.f32 1.442695, %v744_v26  ;;  %v757_v37 = vunpack.c.h.bf16 %v570_v27  ;;  %v239_v38 = vmul.f32 1.442695, %v746_v28 }
  0x17   : > { %v760_v39 = vunpack.c.l.bf16 %v571_v30  ;;  %v241_v40 = vmul.f32 1.442695, %v748_v29  ;;  %v568_v41 = vunpack.c.h.bf16 %v571_v30  ;;  %v276_v42 = vpack.c.bf16 %v262_v35, %v261_v34 }
  0x18   : > { %621 = vpow2.f32 %v235_v32  ;;  %v243_v43 = vmul.f32 1.442695, %v752_v33  ;;  %v245_v44 = vmul.f32 1.442695, %v757_v37  ;;  %v275_v50 = vpack.c.bf16 %v260_v46, %v259_v45 }
  0x19   : > { %623 = vpow2.f32 %v237_v36  ;;  %v247_v47 = vmul.f32 1.442695, %v760_v39  ;;  %v249_v48 = vmul.f32 1.442695, %v568_v41  ;;  %v304_v49 = vsel %vm287_vm0, %v276_v42, 0 }
  0x1a   : > { %625 = vpow2.f32 %v239_v38  ;;  %v301_v55 = vsel %vm287_vm0, %v275_v50, 0  ;;  %vm219_vm1 = vcmp.gt.f32.partialorder %v742_v25, 0.0  ;;  %vm220_vm2 = vcmp.gt.f32.partialorder %v744_v26, 0.0 }
  0x1b   : > { %325 = vmatpush.bf16.xpose.msra.mxu0 %v319_v7  ;;  %575 = vmatpush.bf16.xpose.msra.mxu1 %v319_v7  ;;  %627 = vpow2.f32 %v241_v40  ;;  %v227_v57 = vadd.f32 1.0, %v742_v25  ;;  %v228_v58 = vadd.f32 1.0, %v744_v26  ;;  %v229_v59 = vadd.f32 1.0, %v746_v28 }
  0x1c   : > { %576 = vmatpush.bf16.xpose.msra.mxu2 %v319_v7  ;;  %577 = vmatpush.bf16.xpose.msra.mxu3 %v319_v7  ;;  %629 = vpow2.f32 %v243_v43  ;;  %vm221_vm3 = vcmp.gt.f32.partialorder %v746_v28, 0.0  ;;  %v230_v61 = vadd.f32 1.0, %v748_v29  ;;  %v231_v62 = vadd.f32 1.0, %v752_v33 }
  0x1d   : > { %631 = vpow2.f32 %v245_v44  ;;  %v232_v63 = vadd.f32 1.0, %v757_v37  ;;  %vm222_vm4 = vcmp.gt.f32.partialorder %v748_v29, 0.0  ;;  %vm223_vm5 = vcmp.gt.f32.partialorder %v752_v33, 0.0 }
  0x1e   : > { %v622_v51 = vpop.eup %621  ;;  %633 = vpow2.f32 %v247_v47  ;;  %v233_v1 = vadd.f32 1.0, %v760_v39  ;;  %v234_v2 = vadd.f32 1.0, %v568_v41  ;;  %vm224_vm6 = vcmp.gt.f32.partialorder %v757_v37, 0.0 }
  0x1f   : > { %v624_v52 = vpop.eup %623  ;;  %635 = vpow2.f32 %v249_v48  ;;  %vm225_vm7 = vcmp.gt.f32.partialorder %v760_v39, 0.0  ;;  %vm226_vm8 = vcmp.gt.f32.partialorder %v568_v41, 0.0  ;;  %v251_v4 = vsel %vm219_vm1, %v227_v57, %v622_v51 }
  0x20   : > { %v626_v53 = vpop.eup %625  ;;  %v252_v5 = vsel %vm220_vm2, %v228_v58, %v624_v52 }
  0x21   : > { %v628_v54 = vpop.eup %627  ;;  %v253_v6 = vsel %vm221_vm3, %v229_v59, %v626_v53  ;;  %v283_v12 = vpack.c.bf16 %v252_v5, %v251_v4 }
  0x22   : > { %v630_v56 = vpop.eup %629  ;;  %v254_v7 = vsel %vm222_vm4, %v230_v61, %v628_v54 }
  0x23   : > { %326 = vmatpush.bf16.xpose.msra.mxu0 %v316_v11  ;;  %578 = vmatpush.bf16.xpose.msra.mxu1 %v316_v11  ;;  %v632_v60 = vpop.eup %631  ;;  %v255_v8 = vsel %vm223_vm5, %v231_v62, %v630_v56  ;;  %v284_v13 = vpack.c.bf16 %v254_v7, %v253_v6 }
  0x24   : > { %579 = vmatpush.bf16.xpose.msra.mxu2 %v316_v11  ;;  %580 = vmatpush.bf16.xpose.msra.mxu3 %v316_v11  ;;  %v634_v0 = vpop.eup %633  ;;  %v256_v9 = vsel %vm224_vm6, %v232_v63, %v632_v60 }
  0x25   : > { %v636_v3 = vpop.eup %635  ;;  %v257_v10 = vsel %vm225_vm7, %v233_v1, %v634_v0  ;;  %v285_v14 = vpack.c.bf16 %v256_v9, %v255_v8 }
  0x26   : > { %v258_v11 = vsel %vm226_vm8, %v234_v2, %v636_v3 }
  0x2b   : > { %327 = vmatpush.bf16.xpose.msra.mxu0 %v313_v15  ;;  %581 = vmatpush.bf16.xpose.msra.mxu1 %v313_v15 }
  0x2c   : > { %582 = vmatpush.bf16.xpose.msra.mxu2 %v313_v15  ;;  %583 = vmatpush.bf16.xpose.msra.mxu3 %v313_v15  ;;  %v286_v15 = vpack.c.bf16 %v258_v11, %v257_v10 }
  0x33   : > { %328 = vmatpush.bf16.xpose.msra.mxu0 %v310_v19  ;;  %584 = vmatpush.bf16.xpose.msra.mxu1 %v310_v19 }
  0x34   : > { %585 = vmatpush.bf16.xpose.msra.mxu2 %v310_v19  ;;  %586 = vmatpush.bf16.xpose.msra.mxu3 %v310_v19 }
  0x3b   : > { %329 = vmatpush.bf16.xpose.msra.mxu0 %v307_v31  ;;  %587 = vmatpush.bf16.xpose.msra.mxu1 %v307_v31 }
  0x3c   : > { %588 = vmatpush.bf16.xpose.msra.mxu2 %v307_v31  ;;  %589 = vmatpush.bf16.xpose.msra.mxu3 %v307_v31 }
  0x43   : > { %330 = vmatpush.bf16.xpose.msra.mxu0 %v304_v49  ;;  %590 = vmatpush.bf16.xpose.msra.mxu1 %v304_v49 }
  0x44   : > { %591 = vmatpush.bf16.xpose.msra.mxu2 %v304_v49  ;;  %592 = vmatpush.bf16.xpose.msra.mxu3 %v304_v49 }
  0x4b   : > { %331 = vmatpush.bf16.xpose.msra.mxu0 %v301_v55  ;;  %593 = vmatpush.bf16.xpose.msra.mxu1 %v301_v55 }
  0x4c   : > { %594 = vmatpush.bf16.xpose.msra.mxu2 %v301_v55  ;;  %595 = vmatpush.bf16.xpose.msra.mxu3 %v301_v55 }
  0x52   : > { %544 = vmatmul.msk.bf16.vlgmr.msra.gmra.mxu0 %vm287_vm0, %v283_v12  ;;  %545 = vmatmul.msk.bf16.vlgmr.msra.gmra.mxu1 %vm287_vm0, %v284_v13 }
  0x53   : > { %546 = vmatmul.msk.bf16.vlgmr.msra.gmra.mxu2 %vm287_vm0, %v285_v14  ;;  %547 = vmatmul.msk.bf16.vlgmr.msra.gmra.mxu3 %vm287_vm0, %v286_v15 }
  0xcf   : > { %v333_v16 = vpop.f32.mrf.mxu0  ;;  %v338_v17 = vpop.f32.mrf.mxu1 }
  0xd0   : > { %v353_v18 = vadd.f32 1e-06, %v333_v16  ;;  %v355_v19 = vadd.f32 1e-06, %v338_v17 }
  0xd2   : > { %637 = vrcp.f32 %v353_v18 }
  0xd3   : > { %639 = vrcp.f32 %v355_v19 }
  0xd6   : > { %v343_v20 = vpop.f32.mrf.mxu2  ;;  %v794_v21 = vpop.f32.mrf.mxu3 }
  0xd7   : > { %v357_v22 = vadd.f32 1e-06, %v343_v20  ;;  %v335_v23 = vpop.f32.mrf.mxu0  ;;  %v340_v24 = vpop.f32.mrf.mxu1  ;;  %v359_v32 = vadd.f32 1e-06, %v794_v21 }
  0xd8   : > { %v638_v25 = vpop.eup %637  ;;  %v354_v26 = vadd.f32 1e-06, %v335_v23  ;;  %v356_v27 = vadd.f32 1e-06, %v340_v24 }
  0xd9   : > { %v640_v28 = vpop.eup %639  ;;  %641 = vrcp.f32 %v357_v22  ;;  %377 = vrot.lane.b32.xlu0 %v638_v25, %s677_s21 }
  0xda   : > { %381 = vrot.lane.b32.xlu1 %v640_v28, %s677_s21  ;;  %643 = vrcp.f32 %v354_v26 }
  0xdb   : > { %645 = vrcp.f32 %v356_v27 }
  0xde   : > { %v345_v29 = vpop.f32.mrf.mxu2  ;;  %v350_v30 = vpop.f32.mrf.mxu3 }
  0xdf   : > { %v642_v31 = vpop.eup %641  ;;  %v358_v33 = vadd.f32 1e-06, %v345_v29  ;;  %v360_v34 = vadd.f32 1e-06, %v350_v30 }
  0xe0   : > { %385 = vrot.lane.b32.xlu2 %v642_v31, %s677_s21  ;;  %v644_v35 = vpop.eup %643 }
  0xe1   : > { %647 = vrcp.f32 %v358_v33  ;;  %v646_v36 = vpop.eup %645  ;;  %379 = vrot.lane.b32.xlu0 %v644_v35, %s677_s21 }
  0xe2   : > { %649 = vrcp.f32 %v359_v32  ;;  %383 = vrot.lane.b32.xlu1 %v646_v36, %s677_s21 }
  0xe3   : > { %651 = vrcp.f32 %v360_v34 }
  0xe7   : > { %v648_v37 = vpop.eup %647 }
  0xe8   : > { %387 = vrot.lane.b32.xlu2 %v648_v37, %s677_s21  ;;  %v650_v38 = vpop.eup %649 }
  0xe9   : > { %v652_v39 = vpop.eup %651  ;;  %389 = vrot.lane.b32.xlu0 %v650_v38, %s677_s21 }
  0xea   : > { %391 = vrot.lane.b32.xlu1 %v652_v39, %s677_s21 }
 0x13a   : > { %v386_v40 = vpop.permute.xlu2 %385 }
 0x13b   : > { %v405_v41 = vmul.f32 %v386_v40, %v343_v20 }
 0x13d   : > { %v413_v42 = vmul.f32 64.0, %v405_v41 }
 0x13f   : > { %v421_v43 = vpack.c.bf16 %v413_v42, %v413_v42 }
 0x141   : > { %430 = vst.msk [vmem:[%s802_s24 + $0x10] sm:$0xf] %vm425_vm9, %v421_v43 }
 0x142   : > { %v388_v44 = vpop.permute.xlu2 %387 }
 0x143   : > { %v406_v45 = vmul.f32 %v388_v44, %v345_v29 }
 0x145   : > { %v414_v46 = vmul.f32 64.0, %v406_v45 }
 0x147   : > { %v422_v47 = vpack.c.bf16 %v414_v46, %v414_v46 }
 0x149   : > { %431 = vst.msk [vmem:[%s802_s24 + $0x14] sm:$0xf] %vm425_vm9, %v422_v47 }
 0x14b   : > { %v378_v48 = vpop.permute.xlu0 %377 }
 0x14c   : > { %v382_v49 = vpop.permute.xlu1 %381  ;;  %v401_v50 = vmul.f32 %v378_v48, %v333_v16 }
 0x14d   : > { %v403_v51 = vmul.f32 %v382_v49, %v338_v17 }
 0x14e   : > { %v409_v52 = vmul.f32 64.0, %v401_v50 }
 0x14f   : > { %v411_v53 = vmul.f32 64.0, %v403_v51 }
 0x150   : > { %v417_v54 = vpack.c.bf16 %v409_v52, %v409_v52 }
 0x151   : > { %v419_v55 = vpack.c.bf16 %v411_v53, %v411_v53 }
 0x152   : > { %426 = vst.msk [vmem:[%s802_s24] sm:$0xf] %vm425_vm9, %v417_v54 }
 0x153   : > { %428 = vst.msk [vmem:[%s802_s24 + $0x8] sm:$0xf] %vm425_vm9, %v419_v55  ;;  %v380_v56 = vpop.permute.xlu0 %379 }
 0x154   : > { %v384_v57 = vpop.permute.xlu1 %383  ;;  %v402_v58 = vmul.f32 %v380_v56, %v335_v23 }
 0x155   : > { %v404_v59 = vmul.f32 %v384_v57, %v340_v24 }
 0x156   : > { %v410_v60 = vmul.f32 64.0, %v402_v58 }
 0x157   : > { %v412_v61 = vmul.f32 64.0, %v404_v59 }
 0x158   : > { %v418_v62 = vpack.c.bf16 %v410_v60, %v410_v60 }
 0x159   : > { %v420_v63 = vpack.c.bf16 %v412_v61, %v412_v61 }
 0x15a   : > { %427 = vst.msk [vmem:[%s802_s24 + $0x4] sm:$0xf] %vm425_vm9, %v418_v62 }
 0x15b   : > { %429 = vst.msk [vmem:[%s802_s24 + $0xc] sm:$0xf] %vm425_vm9, %v420_v63  ;;  %v390_v0 = vpop.permute.xlu0 %389 }
 0x15c   : > { %v392_v1 = vpop.permute.xlu1 %391  ;;  %v407_v2 = vmul.f32 %v390_v0, %v794_v21 }
 0x15d   : > { %v408_v3 = vmul.f32 %v392_v1, %v350_v30 }
 0x15e   : > { %v415_v4 = vmul.f32 64.0, %v407_v2 }
 0x15f   : > { %v416_v5 = vmul.f32 64.0, %v408_v3 }
 0x160   : > { %v423_v6 = vpack.c.bf16 %v415_v4, %v415_v4 }
 0x161   : > { %v424_v7 = vpack.c.bf16 %v416_v5, %v416_v5 }
 0x162   : > { %432 = vst.msk [vmem:[%s802_s24 + $0x18] sm:$0xf] %vm425_vm9, %v423_v6 }
 0x163   : > { %433 = vst.msk [vmem:[%s802_s24 + $0x1c] sm:$0xf] %vm425_vm9, %v424_v7 }
 0x164 PF: > { %s12_s11 = sadd.s32 1, %s675_s11   ;;  %s833_s9 = smov %s671_s10 }
 0x165   : > { %p9_p5 = scmp.ge.s32.totalorder %s12_s11, 4   ;;  %s834_s10 = smov %s836_s12 }
 0x167   :  { %11 = sbr.rel (!%p9_p5) target bundleno = 2 (0x2), region = 61 }

// kernel: loftr_forward.47
= control target key start
LH: loop header
LB: loop body
LE: loop exit
PB: predicated region body
PF: predicated region fallthrough
CT: control target
= control target key end

     0   :  { %s714_s15 = smov 0   ;;  %s903_s0 = inlined_call_operand.vmem [shape: bf16[128,64], index: 0, kind: input, shape index: {}]   ;;  %s904_s1 = inlined_call_operand.vmem [shape: bf16[64,64], index: 1, kind: input, shape index: {}]   ;;  %s905_s2 = inlined_call_operand.vmem [shape: f32[1,64], index: 2, kind: input, shape index: {}]   ;;  %s906_s3 = inlined_call_operand.vmem [shape: f32[1,64], index: 3, kind: input, shape index: {}]   ;;  %s907_s4 = inlined_call_operand.vmem [shape: bf16[128,64], index: 4, kind: output, shape index: {}]  }
   0x1 LB: > { %s584_s16 = sadd.s32 4294967295, %s686_s15   ;;  %p588_p0 = scmp.ge.s32.totalorder %s686_s15, 1  ;;  %s686_s15 = sphi %s714_s15, %s14_s15  }
   0x2   : > { %p163_p1 = scmp.lt.s32.totalorder %s686_s15, 3 }
   0x4   : > { %p164_p2 = pnand %p588_p0, %p163_p1 }
   0x5   : > { %s589_s19 = sshll.u32 (!%p164_p2), %s584_s16, 3 }
   0x6   : > { %167 = sbr.rel (%p164_p2) target bundleno = 447 (0x1bf), region = 36  ;;  %p190_p3 = scmp.lt.s32.totalorder (!%p164_p2), %s589_s19, 15 }
   0xb   : > { %v638_v0 = vld [vmem:[%s904_s1 + $0x18] sm:$0xff]  ;;  %v637_v1 = vld [vmem:[%s904_s1 + $0x10] sm:$0xff]  ;;  %s909_s19 = smov (!%p190_p3, %s589_s19), 15  ;;  %v636_v2 = vld [vmem:[%s904_s1 + $0x8] sm:$0xff]  ;;  %vm262_vm0 = vcmask 523264   ;;  %v688_v24 = vmov 64.0  }
   0xc   : > { %279 = vmatpush.bf16.msra.mxu0 %v638_v0  ;;  %639 = vmatpush.bf16.msra.mxu1 %v638_v0  ;;  %s590_s24 = sshll.u32 %s909_s19, 2  ;;  %v635_v3 = vld [vmem:[%s904_s1] sm:$0xff]  ;;  %662 = vrcp.f32 %v688_v24  ;;  %vm519_vm8 = vcmask 519168  }
   0xd   : > { %640 = vmatpush.bf16.msra.mxu2 %v638_v0  ;;  %641 = vmatpush.bf16.msra.mxu3 %v638_v0  ;;  %s193_s29 = scalar_lea.vmem %s903_s0, %s590_s24  ;;  %s852_s10 = scalar_lea.vmem %s907_s4, %s590_s24 }
   0xe   : > { %v631_v4 = vld [vmem:[%s193_s29] sm:$0xff]  ;;  %v632_v5 = vld [vmem:[%s193_s29 + $0x8] sm:$0xff]  ;;  %v633_v6 = vld [vmem:[%s193_s29 + $0x10] sm:$0xff] }
   0xf   : > { %v634_v7 = vld [vmem:[%s193_s29 + $0x18] sm:$0xff] }
  0x10   : > { %280 = vmatpush.bf16.msra.mxu0 %v637_v1  ;;  %642 = vmatpush.bf16.msra.mxu1 %v637_v1 }
  0x11   : > { %643 = vmatpush.bf16.msra.mxu2 %v637_v1  ;;  %644 = vmatpush.bf16.msra.mxu3 %v637_v1 }
  0x12   : > { %v663_v25 = vpop.eup %662 }
  0x13   : > { %v329_v26 = vmul.f32 64.0, %v663_v25  ;;  %vm333_vm1 = vweird.f32 %v663_v25 }
  0x14   : > { %281 = vmatpush.bf16.msra.mxu0 %v636_v2  ;;  %645 = vmatpush.bf16.msra.mxu1 %v636_v2 }
  0x15   : > { %646 = vmatpush.bf16.msra.mxu2 %v636_v2  ;;  %647 = vmatpush.bf16.msra.mxu3 %v636_v2  ;;  %v330_v27 = vsub.f32 1.0, %v329_v26 }
  0x17   : > { %v331_v28 = vmul.f32 %v663_v25, %v330_v27 }
  0x18   : > { %282 = vmatpush.bf16.msra.mxu0 %v635_v3  ;;  %648 = vmatpush.bf16.msra.mxu1 %v635_v3 }
  0x19   : > { %649 = vmatpush.bf16.msra.mxu2 %v635_v3  ;;  %650 = vmatpush.bf16.msra.mxu3 %v635_v3  ;;  %v332_v29 = vadd.f32 %v663_v25, %v331_v28 }
  0x1b   : > { %625 = vmatmul.msk.bf16.vlgmr.msra.gmra.mxu0 %vm262_vm0, %v631_v4  ;;  %626 = vmatmul.msk.bf16.vlgmr.msra.gmra.mxu1 %vm262_vm0, %v632_v5  ;;  %v754_v30 = vsel %vm333_vm1, %v663_v25, %v332_v29 }
  0x1c   : > { %627 = vmatmul.msk.bf16.vlgmr.msra.gmra.mxu2 %vm262_vm0, %v633_v6  ;;  %628 = vmatmul.msk.bf16.vlgmr.msra.gmra.mxu3 %vm262_vm0, %v634_v7 }
  0x98   : > { %v284_v8 = vpop.f32.mrf.mxu0  ;;  %v289_v9 = vpop.f32.mrf.mxu1 }
  0x99   : > { %v310_v10 = vsel %vm262_vm0, %v289_v9, 0.0  ;;  %v304_v11 = vsel %vm262_vm0, %v284_v8, 0.0 }
  0x9a   : > { %311 = vadd.xlane.f32.xlu1 %v310_v10  ;;  %305 = vadd.xlane.f32.xlu0 %v304_v11 }
  0x9f   : > { %v294_v12 = vpop.f32.mrf.mxu2  ;;  %v299_v13 = vpop.f32.mrf.mxu3 }
  0xa0   : > { %v316_v14 = vsel %vm262_vm0, %v294_v12, 0.0  ;;  %v286_v15 = vpop.f32.mrf.mxu0  ;;  %v291_v16 = vpop.f32.mrf.mxu1  ;;  %v322_v23 = vsel %vm262_vm0, %v299_v13, 0.0 }
  0xa1   : > { %317 = vadd.xlane.f32.xlu2 %v316_v14  ;;  %v313_v17 = vsel %vm262_vm0, %v291_v16, 0.0  ;;  %v307_v18 = vsel %vm262_vm0, %v286_v15, 0.0 }
  0xa2   : > { %314 = vadd.xlane.f32.xlu1 %v313_v17  ;;  %308 = vadd.xlane.f32.xlu0 %v307_v18 }
  0xa7   : > { %v296_v19 = vpop.f32.mrf.mxu2  ;;  %v301_v20 = vpop.f32.mrf.mxu3 }
  0xa8   : > { %v319_v21 = vsel %vm262_vm0, %v296_v19, 0.0  ;;  %v325_v22 = vsel %vm262_vm0, %v301_v20, 0.0 }
  0xa9   : > { %320 = vadd.xlane.f32.xlu2 %v319_v21 }
  0xaa   : > { %326 = vadd.xlane.f32.xlu1 %v325_v22  ;;  %323 = vadd.xlane.f32.xlu0 %v322_v23 }
 0x10d   : > { %v312_v31 = vpop.xlane.xlu1 %311  ;;  %v306_v32 = vpop.xlane.xlu0 %305 }
 0x10e   : > { %v337_v33 = vmul.f32 %v754_v30, %v312_v31  ;;  %v335_v34 = vmul.f32 %v754_v30, %v306_v32 }
 0x110   : > { %v758_v35 = vsub.f32 %v289_v9, %v337_v33  ;;  %v760_v36 = vsub.f32 %v284_v8, %v335_v34 }
 0x112   : > { %v353_v37 = vmul.f32 %v758_v35, %v758_v35  ;;  %v351_v38 = vmul.f32 %v760_v36, %v760_v36 }
 0x114   : > { %v318_v39 = vpop.xlane.xlu2 %317  ;;  %v365_v40 = vsel %vm262_vm0, %v353_v37, 0.0  ;;  %v359_v41 = vsel %vm262_vm0, %v351_v38, 0.0 }
 0x115   : > { %v339_v42 = vmul.f32 %v754_v30, %v318_v39  ;;  %366 = vadd.xlane.f32.xlu1 %v365_v40  ;;  %v315_v43 = vpop.xlane.xlu1 %314  ;;  %360 = vadd.xlane.f32.xlu2 %v359_v41  ;;  %v309_v44 = vpop.xlane.xlu0 %308 }
 0x116   : > { %v338_v45 = vmul.f32 %v754_v30, %v315_v43  ;;  %v336_v47 = vmul.f32 %v754_v30, %v309_v44 }
 0x117   : > { %v770_v46 = vsub.f32 %v294_v12, %v339_v42 }
 0x118   : > { %v773_v48 = vsub.f32 %v291_v16, %v338_v45  ;;  %v779_v51 = vsub.f32 %v286_v15, %v336_v47  ;;  %v829_v47 = vld [vmem:[%s905_s2] ss:$0 sm:$0xff] }
 0x119   : > { %v355_v49 = vmul.f32 %v770_v46, %v770_v46 }
 0x11a   : > { %v354_v50 = vmul.f32 %v773_v48, %v773_v48  ;;  %v352_v61 = vmul.f32 %v779_v51, %v779_v51 }
 0x11b   : > { %v371_v52 = vsel %vm262_vm0, %v355_v49, 0.0 }
 0x11c   : > { %v321_v53 = vpop.xlane.xlu2 %320  ;;  %372 = vadd.xlane.f32.xlu0 %v371_v52  ;;  %v368_v54 = vsel %vm262_vm0, %v354_v50, 0.0  ;;  %v362_v3 = vsel %vm262_vm0, %v352_v61, 0.0 }
 0x11d   : > { %v340_v55 = vmul.f32 %v754_v30, %v321_v53  ;;  %v327_v56 = vpop.xlane.xlu1 %326  ;;  %369 = vadd.xlane.f32.xlu2 %v368_v54  ;;  %v324_v57 = vpop.xlane.xlu0 %323  ;;  %v836_v54 = vld [vmem:[%s906_s3] ss:$0 sm:$0xff] }
 0x11e   : > { %v341_v58 = vmul.f32 %v754_v30, %v324_v57  ;;  %v342_v60 = vmul.f32 %v754_v30, %v327_v56 }
 0x11f   : > { %v785_v59 = vsub.f32 %v296_v19, %v340_v55 }
 0x120   : > { %v790_v62 = vsub.f32 %v299_v13, %v341_v58  ;;  %v796_v1 = vsub.f32 %v301_v20, %v342_v60 }
 0x121   : > { %v356_v63 = vmul.f32 %v785_v59, %v785_v59 }
 0x122   : > { %v357_v0 = vmul.f32 %v790_v62, %v790_v62  ;;  %v358_v5 = vmul.f32 %v796_v1, %v796_v1 }
 0x123   : > { %v374_v2 = vsel %vm262_vm0, %v356_v63, 0.0 }
 0x124   : > { %375 = vadd.xlane.f32.xlu1 %v374_v2  ;;  %363 = vadd.xlane.f32.xlu0 %v362_v3  ;;  %v377_v4 = vsel %vm262_vm0, %v357_v0, 0.0  ;;  %v380_v6 = vsel %vm262_vm0, %v358_v5, 0.0 }
 0x125   : > { %378 = vadd.xlane.f32.xlu2 %v377_v4 }
 0x12c   : > { %381 = vadd.xlane.f32.xlu0 %v380_v6 }
 0x188   : > { %v367_v7 = vpop.xlane.xlu1 %366  ;;  %v361_v8 = vpop.xlane.xlu2 %360 }
 0x189   : > { %v385_v9 = vmul.f32 %v367_v7, %v754_v30  ;;  %v383_v10 = vmul.f32 %v361_v8, %v754_v30 }
 0x18b   : > { %v393_v11 = vadd.f32 1e-05, %v385_v9  ;;  %v391_v12 = vadd.f32 1e-05, %v383_v10 }
 0x18d   : > { %664 = vrsqrt.f32 %v393_v11  ;;  %vm425_vm4 = vweird.f32 %v393_v11  ;;  %vm405_vm6 = vweird.f32 %v391_v12 }
 0x18e   : > { %666 = vrsqrt.f32 %v391_v12 }
 0x18f   : > { %v373_v13 = vpop.xlane.xlu0 %372 }
 0x190   : > { %v387_v14 = vmul.f32 %v373_v13, %v754_v30  ;;  %v370_v15 = vpop.xlane.xlu2 %369 }
 0x191   : > { %v386_v16 = vmul.f32 %v370_v15, %v754_v30 }
 0x192   : > { %v808_v17 = vadd.f32 1e-05, %v387_v14 }
 0x193   : > { %v665_v18 = vpop.eup %664  ;;  %v810_v19 = vadd.f32 1e-05, %v386_v16 }
 0x194   : > { %v667_v20 = vpop.eup %666  ;;  %v420_v21 = vmul.f32 %v665_v18, %v393_v11  ;;  %668 = vrsqrt.f32 %v808_v17  ;;  %vm426_vm2 = vweird.f32 %v665_v18  ;;  %vm445_vm10 = vweird.f32 %v808_v17 }
 0x195   : > { %v400_v22 = vmul.f32 %v667_v20, %v391_v12  ;;  %670 = vrsqrt.f32 %v810_v19  ;;  %vm406_vm3 = vweird.f32 %v667_v20  ;;  %vm427_vm5 = vmor %vm425_vm4, %vm426_vm2  ;;  %vm435_vm12 = vweird.f32 %v810_v19 }
 0x196   : > { %v421_v23 = vmul.f32 %v665_v18, %v420_v21  ;;  %vm407_vm7 = vmor %vm405_vm6, %vm406_vm3 }
 0x197   : > { %v401_v24 = vmul.f32 %v667_v20, %v400_v22  ;;  %v376_v25 = vpop.xlane.xlu1 %375  ;;  %v364_v26 = vpop.xlane.xlu0 %363 }
 0x198   : > { %v422_v27 = vmul.f32 0.5, %v421_v23  ;;  %v388_v28 = vmul.f32 %v376_v25, %v754_v30  ;;  %v384_v29 = vmul.f32 %v364_v26, %v754_v30  ;;  %v379_v31 = vpop.xlane.xlu2 %378 }
 0x199   : > { %v402_v32 = vmul.f32 0.5, %v401_v24  ;;  %v389_v33 = vmul.f32 %v379_v31, %v754_v30 }
 0x19a   : > { %v669_v34 = vpop.eup %668  ;;  %v423_v37 = vsub.f32 1.5, %v422_v27  ;;  %v817_v38 = vadd.f32 1e-05, %v388_v28  ;;  %v819_v39 = vadd.f32 1e-05, %v384_v29 }
 0x19b   : > { %v671_v40 = vpop.eup %670  ;;  %v403_v41 = vsub.f32 1.5, %v402_v32  ;;  %v440_v42 = vmul.f32 %v669_v34, %v808_v17  ;;  %v822_v43 = vadd.f32 1e-05, %v389_v33  ;;  %vm446_vm9 = vweird.f32 %v669_v34 }
 0x19c   : > { %v424_v44 = vmul.f32 %v665_v18, %v423_v37  ;;  %v430_v45 = vmul.f32 %v671_v40, %v810_v19  ;;  %672 = vrsqrt.f32 %v817_v38  ;;  %vm436_vm11 = vweird.f32 %v671_v40  ;;  %vm447_vm13 = vmor %vm445_vm10, %vm446_vm9 }
 0x19d   : > { %v404_v49 = vmul.f32 %v667_v20, %v403_v41  ;;  %v441_v50 = vmul.f32 %v669_v34, %v440_v42  ;;  %674 = vrsqrt.f32 %v819_v39  ;;  %vm437_vm14 = vmor %vm435_vm12, %vm436_vm11  ;;  %vm455_vm0 = vweird.f32 %v817_v38 }
 0x19e   : > { %v428_v52 = vsel %vm427_vm5, %v665_v18, %v424_v44  ;;  %v431_v53 = vmul.f32 %v671_v40, %v430_v45  ;;  %676 = vrsqrt.f32 %v822_v43  ;;  %vm415_vm4 = vweird.f32 %v819_v39 }
 0x19f   : > { %v481_v55 = vmul.f32 %v428_v52, %v758_v35  ;;  %v408_v56 = vsel %vm407_vm7, %v667_v20, %v404_v49  ;;  %v442_v57 = vmul.f32 0.5, %v441_v50  ;;  %v382_v58 = vpop.xlane.xlu0 %381  ;;  %vm465_vm6 = vweird.f32 %v822_v43 }
 0x1a0   : > { %v479_v60 = vmul.f32 %v408_v56, %v760_v36  ;;  %v432_v61 = vmul.f32 0.5, %v431_v53  ;;  %v390_v63 = vmul.f32 %v382_v58, %v754_v30 }
 0x1a1   : > { %v493_v0 = vmul.f32 %v829_v47, %v481_v55  ;;  %v443_v2 = vsub.f32 1.5, %v442_v57 }
 0x1a2   : > { %v673_v3 = vpop.eup %672  ;;  %v491_v4 = vmul.f32 %v829_v47, %v479_v60  ;;  %v433_v35 = vsub.f32 1.5, %v432_v61  ;;  %v856_v11 = vadd.f32 1e-05, %v390_v63 }
 0x1a3   : > { %v675_v5 = vpop.eup %674  ;;  %v505_v6 = vadd.f32 %v836_v54, %v493_v0  ;;  %v444_v36 = vmul.f32 %v669_v34, %v443_v2  ;;  %v450_v30 = vmul.f32 %v673_v3, %v817_v38  ;;  %vm456_vm15 = vweird.f32 %v673_v3 }
 0x1a4   : > { %v677_v7 = vpop.eup %676  ;;  %v503_v8 = vadd.f32 %v836_v54, %v491_v4  ;;  %v434_v9 = vmul.f32 %v671_v40, %v433_v35  ;;  %v410_v10 = vmul.f32 %v675_v5, %v819_v39  ;;  %678 = vrsqrt.f32 %v856_v11  ;;  %vm457_vm3 = vmor %vm455_vm0, %vm456_vm15 }
 0x1a5   : > { %v513_v12 = vpack.c.bf16 %v505_v6, %v505_v6  ;;  %v448_v13 = vsel %vm447_vm13, %v669_v34, %v444_v36  ;;  %v451_v14 = vmul.f32 %v673_v3, %v450_v30  ;;  %v460_v15 = vmul.f32 %v677_v7, %v822_v43 }
 0x1a6   : > { %v511_v16 = vpack.c.bf16 %v503_v8, %v503_v8  ;;  %v483_v17 = vmul.f32 %v448_v13, %v770_v46  ;;  %v438_v18 = vsel %vm437_vm14, %v671_v40, %v434_v9  ;;  %v411_v19 = vmul.f32 %v675_v5, %v410_v10 }
 0x1a7   : > { %522 = vst.msk [vmem:[%s852_s10 + $0x8] sm:$0xf] %vm519_vm8, %v513_v12  ;;  %v482_v20 = vmul.f32 %v438_v18, %v773_v48  ;;  %v452_v21 = vmul.f32 0.5, %v451_v14  ;;  %v461_v22 = vmul.f32 %v677_v7, %v460_v15  ;;  %vm416_vm1 = vweird.f32 %v675_v5 }
 0x1a8   : > { %520 = vst.msk [vmem:[%s852_s10] sm:$0xf] %vm519_vm8, %v511_v16  ;;  %v495_v23 = vmul.f32 %v829_v47, %v483_v17  ;;  %v412_v24 = vmul.f32 0.5, %v411_v19  ;;  %vm466_vm2 = vweird.f32 %v677_v7  ;;  %vm417_vm5 = vmor %vm415_vm4, %vm416_vm1  ;;  %vm475_vm10 = vweird.f32 %v856_v11 }
 0x1a9   : > { %v494_v25 = vmul.f32 %v829_v47, %v482_v20  ;;  %v453_v26 = vsub.f32 1.5, %v452_v21  ;;  %v462_v46 = vmul.f32 0.5, %v461_v22  ;;  %vm467_vm7 = vmor %vm465_vm6, %vm466_vm2 }
 0x1aa   : > { %v507_v27 = vadd.f32 %v836_v54, %v495_v23  ;;  %v413_v28 = vsub.f32 1.5, %v412_v24  ;;  %v679_v38 = vpop.eup %678 }
 0x1ab   : > { %v506_v48 = vadd.f32 %v836_v54, %v494_v25  ;;  %v454_v29 = vmul.f32 %v673_v3, %v453_v26  ;;  %v463_v31 = vsub.f32 1.5, %v462_v46  ;;  %v470_v39 = vmul.f32 %v679_v38, %v856_v11 }
 0x1ac   : > { %v515_v32 = vpack.c.bf16 %v507_v27, %v507_v27  ;;  %v414_v33 = vmul.f32 %v675_v5, %v413_v28  ;;  %vm476_vm9 = vweird.f32 %v679_v38 }
 0x1ad   : > { %v514_v34 = vpack.c.bf16 %v506_v48, %v506_v48  ;;  %v458_v37 = vsel %vm457_vm3, %v673_v3, %v454_v29  ;;  %v464_v40 = vmul.f32 %v677_v7, %v463_v31  ;;  %v471_v52 = vmul.f32 %v679_v38, %v470_v39  ;;  %vm477_vm11 = vmor %vm475_vm10, %vm476_vm9 }
 0x1ae   : > { %524 = vst.msk [vmem:[%s852_s10 + $0x10] sm:$0xf] %vm519_vm8, %v515_v32  ;;  %v484_v41 = vmul.f32 %v458_v37, %v785_v59  ;;  %v418_v42 = vsel %vm417_vm5, %v675_v5, %v414_v33 }
 0x1af   : > { %523 = vst.msk [vmem:[%s852_s10 + $0xc] sm:$0xf] %vm519_vm8, %v514_v34  ;;  %v480_v44 = vmul.f32 %v418_v42, %v779_v51  ;;  %v468_v45 = vsel %vm467_vm7, %v677_v7, %v464_v40  ;;  %v472_v51 = vmul.f32 0.5, %v471_v52 }
 0x1b0   : > { %v496_v49 = vmul.f32 %v829_v47, %v484_v41  ;;  %v485_v43 = vmul.f32 %v468_v45, %v790_v62 }
 0x1b1   : > { %v492_v50 = vmul.f32 %v829_v47, %v480_v44  ;;  %v473_v60 = vsub.f32 1.5, %v472_v51 }
 0x1b2   : > { %v508_v59 = vadd.f32 %v836_v54, %v496_v49  ;;  %v497_v53 = vmul.f32 %v829_v47, %v485_v43 }
 0x1b3   : > { %v504_v55 = vadd.f32 %v836_v54, %v492_v50  ;;  %v474_v61 = vmul.f32 %v679_v38, %v473_v60 }
 0x1b4   : > { %v516_v56 = vpack.c.bf16 %v508_v59, %v508_v59  ;;  %v509_v57 = vadd.f32 %v836_v54, %v497_v53 }
 0x1b5   : > { %v512_v58 = vpack.c.bf16 %v504_v55, %v504_v55  ;;  %v478_v63 = vsel %vm477_vm11, %v679_v38, %v474_v61 }
 0x1b6   : > { %525 = vst.msk [vmem:[%s852_s10 + $0x14] sm:$0xf] %vm519_vm8, %v516_v56  ;;  %v517_v62 = vpack.c.bf16 %v509_v57, %v509_v57  ;;  %v486_v0 = vmul.f32 %v478_v63, %v796_v1 }
 0x1b7   : > { %521 = vst.msk [vmem:[%s852_s10 + $0x4] sm:$0xf] %vm519_vm8, %v512_v58 }
 0x1b8   : > { %526 = vst.msk [vmem:[%s852_s10 + $0x18] sm:$0xf] %vm519_vm8, %v517_v62  ;;  %v498_v2 = vmul.f32 %v829_v47, %v486_v0 }
 0x1ba   : > { %v510_v3 = vadd.f32 %v836_v54, %v498_v2 }
 0x1bc   : > { %v518_v4 = vpack.c.bf16 %v510_v3, %v510_v3 }
 0x1be   : > { %527 = vst.msk [vmem:[%s852_s10 + $0x1c] sm:$0xf] %vm519_vm8, %v518_v4 }
 0x1bf PF: > { %s14_s15 = sadd.s32 1, %s686_s15  }
 0x1c0   : > { %p11_p4 = scmp.ge.s32.totalorder %s14_s15, 4  }
 0x1c2   :  { %13 = sbr.rel (!%p11_p4) target bundleno = 1 (0x1), region = 66 }

// kernel: loftr_forward.48
= control target key start
LH: loop header
LB: loop body
LE: loop exit
PB: predicated region body
PF: predicated region fallthrough
CT: control target
= control target key end

     0   :  { %s692_s15 = smov 0   ;;  %s749_s0 = inlined_call_operand.vmem [shape: bf16[128,64], index: 0, kind: input, shape index: {}]   ;;  %s750_s1 = inlined_call_operand.vmem [shape: bf16[64,128], index: 1, kind: input, shape index: {}]   ;;  %s751_s2 = inlined_call_operand.vmem [shape: bf16[128,64], index: 2, kind: input, shape index: {}]   ;;  %s752_s3 = inlined_call_operand.vmem [shape: bf16[64,128], index: 3, kind: input, shape index: {}]   ;;  %s753_s4 = inlined_call_operand.vmem [shape: bf16[128,128], index: 4, kind: output, shape index: {}]  }
   0x1 LB: > { %s519_s16 = sadd.s32 4294967295, %s665_s15   ;;  %p523_p0 = scmp.ge.s32.totalorder %s665_s15, 1  ;;  %s665_s15 = sphi %s692_s15, %s14_s15  }
   0x2   : > { %p174_p1 = scmp.lt.s32.totalorder %s665_s15, 3 }
   0x4   : > { %p175_p2 = pnand %p523_p0, %p174_p1 }
   0x5   : > { %s524_s21 = sshll.u32 (!%p175_p2), %s519_s16, 3 }
   0x6   : > { %178 = sbr.rel (%p175_p2) target bundleno = 191 (0xbf), region = 36  ;;  %p206_p3 = scmp.lt.s32.totalorder (!%p175_p2), %s524_s21, 15 }
   0xb   : > { %v619_v0 = vld [vmem:[%s752_s3 + $0x18] sm:$0xff]  ;;  %v618_v2 = vld [vmem:[%s752_s3 + $0x10] sm:$0xff]  ;;  %s755_s21 = smov (!%p206_p3, %s524_s21), 15  ;;  %v617_v4 = vld [vmem:[%s752_s3 + $0x8] sm:$0xff]  ;;  %vm300_vm0 = vcmask 523264  }
   0xc   : > { %v611_v1 = vld [vmem:[%s750_s1 + $0x18] sm:$0xff]  ;;  %317 = vmatpush.bf16.msra.mxu0 %v619_v0  ;;  %643 = vmatpush.bf16.msra.mxu2 %v619_v0  ;;  %v610_v3 = vld [vmem:[%s750_s1 + $0x10] sm:$0xff]  ;;  %v609_v5 = vld [vmem:[%s750_s1 + $0x8] sm:$0xff]  ;;  %s718_s30 = sshll.u32 %s755_s21, 2 }
   0xd   : > { %402 = vmatpush.bf16.msra.mxu1 %v611_v1  ;;  %647 = vmatpush.bf16.msra.mxu3 %v611_v1  ;;  %v616_v6 = vld [vmem:[%s752_s3] sm:$0xff]  ;;  %s215_s9 = scalar_lea.vmem %s751_s2, %s718_s30  ;;  %s209_s14 = scalar_lea.vmem %s749_s0, %s718_s30 }
   0xe   : > { %v608_v7 = vld [vmem:[%s750_s1] sm:$0xff]  ;;  %v614_v9 = vld [vmem:[%s215_s9 + $0x10] sm:$0xff]  ;;  %v613_v12 = vld [vmem:[%s215_s9 + $0x8] sm:$0xff]  ;;  %s221_s18 = scalar_lea.vmem %s753_s4, %s718_s30 }
   0xf   : > { %v612_v8 = vld [vmem:[%s215_s9] sm:$0xff]  ;;  %v606_v11 = vld [vmem:[%s209_s14 + $0x10] sm:$0xff]  ;;  %v615_v13 = vld [vmem:[%s215_s9 + $0x18] sm:$0xff] }
  0x10   : > { %318 = vmatpush.bf16.msra.mxu0 %v618_v2  ;;  %644 = vmatpush.bf16.msra.mxu2 %v618_v2  ;;  %v604_v10 = vld [vmem:[%s209_s14] sm:$0xff]  ;;  %v605_v14 = vld [vmem:[%s209_s14 + $0x8] sm:$0xff]  ;;  %v607_v15 = vld [vmem:[%s209_s14 + $0x18] sm:$0xff] }
  0x11   : > { %403 = vmatpush.bf16.msra.mxu1 %v610_v3  ;;  %648 = vmatpush.bf16.msra.mxu3 %v610_v3 }
  0x14   : > { %319 = vmatpush.bf16.msra.mxu0 %v617_v4  ;;  %645 = vmatpush.bf16.msra.mxu2 %v617_v4 }
  0x15   : > { %404 = vmatpush.bf16.msra.mxu1 %v609_v5  ;;  %649 = vmatpush.bf16.msra.mxu3 %v609_v5 }
  0x18   : > { %320 = vmatpush.bf16.msra.mxu0 %v616_v6  ;;  %646 = vmatpush.bf16.msra.mxu2 %v616_v6 }
  0x19   : > { %405 = vmatpush.bf16.msra.mxu1 %v608_v7  ;;  %650 = vmatpush.bf16.msra.mxu3 %v608_v7 }
  0x1b   : > { %562 = vmatmul.msk.bf16.vlgmr.msra.gmra.mxu0 %vm300_vm0, %v612_v8  ;;  %564 = vmatmul.msk.bf16.vlgmr.msra.gmra.mxu2 %vm300_vm0, %v614_v9 }
  0x1c   : > { %598 = vmatmul.msk.bf16.vlgmr.msra.gmra.mxu1 %vm300_vm0, %v604_v10  ;;  %600 = vmatmul.msk.bf16.vlgmr.msra.gmra.mxu3 %vm300_vm0, %v606_v11 }
  0x2b   : > { %563 = vmatmul.msk.bf16.gmra.mxu0 %vm300_vm0, %v613_v12  ;;  %565 = vmatmul.msk.bf16.gmra.mxu2 %vm300_vm0, %v615_v13 }
  0x2c   : > { %599 = vmatmul.msk.bf16.gmra.mxu1 %vm300_vm0, %v605_v14  ;;  %601 = vmatmul.msk.bf16.gmra.mxu3 %vm300_vm0, %v607_v15 }
  0x98   : > { %v322_v16 = vpop.f32.mrf.mxu0 }
  0x99   : > { %v407_v17 = vpop.f32.mrf.mxu1 }
  0x9a   : > { %v408_v20 = vadd.f32 %v407_v17, %v322_v16 }
  0x9c   : > { %v427_v24 = vmax.f32 %v408_v20, 0.0 }
  0x9e   : > { %v332_v18 = vpop.f32.mrf.mxu2 }
  0x9f   : > { %v417_v19 = vpop.f32.mrf.mxu3 }
  0xa0   : > { %v324_v21 = vpop.f32.mrf.mxu0  ;;  %v418_v26 = vadd.f32 %v417_v19, %v332_v18 }
  0xa1   : > { %v409_v22 = vpop.f32.mrf.mxu1 }
  0xa2   : > { %v410_v23 = vadd.f32 %v409_v22, %v324_v21  ;;  %v431_v33 = vmax.f32 %v418_v26, 0.0 }
  0xa4   : > { %v428_v25 = vmax.f32 %v410_v23, 0.0 }
  0xa6   : > { %v623_v27 = vpack.c.bf16 %v428_v25, %v427_v24  ;;  %v334_v28 = vpop.f32.mrf.mxu2 }
  0xa7   : > { %v419_v29 = vpop.f32.mrf.mxu3 }
  0xa8   : > { %624 = vst [vmem:[%s221_s18] sm:$0xff] %v623_v27   ;;  %v420_v30 = vadd.f32 %v419_v29, %v334_v28  ;;  %v327_v31 = vpop.f32.mrf.mxu0 }
  0xa9   : > { %v412_v32 = vpop.f32.mrf.mxu1 }
  0xaa   : > { %v432_v34 = vmax.f32 %v420_v30, 0.0  ;;  %v413_v38 = vadd.f32 %v412_v32, %v327_v31 }
  0xac   : > { %v633_v35 = vpack.c.bf16 %v432_v34, %v431_v33  ;;  %v429_v42 = vmax.f32 %v413_v38, 0.0 }
  0xae   : > { %641 = vst [vmem:[%s221_s18 + $0x10] sm:$0xff] %v633_v35   ;;  %v337_v36 = vpop.f32.mrf.mxu2 }
  0xaf   : > { %v422_v37 = vpop.f32.mrf.mxu3 }
  0xb0   : > { %v329_v39 = vpop.f32.mrf.mxu0  ;;  %v423_v44 = vadd.f32 %v422_v37, %v337_v36 }
  0xb1   : > { %v414_v40 = vpop.f32.mrf.mxu1 }
  0xb2   : > { %v415_v41 = vadd.f32 %v414_v40, %v329_v39  ;;  %v433_v49 = vmax.f32 %v423_v44, 0.0 }
  0xb4   : > { %v430_v43 = vmax.f32 %v415_v41, 0.0 }
  0xb6   : > { %v628_v45 = vpack.c.bf16 %v430_v43, %v429_v42  ;;  %v339_v46 = vpop.f32.mrf.mxu2 }
  0xb7   : > { %v424_v47 = vpop.f32.mrf.mxu3 }
  0xb8   : > { %640 = vst [vmem:[%s221_s18 + $0x8] sm:$0xff] %v628_v45   ;;  %v425_v48 = vadd.f32 %v424_v47, %v339_v46 }
  0xba   : > { %v434_v50 = vmax.f32 %v425_v48, 0.0 }
  0xbc   : > { %v638_v51 = vpack.c.bf16 %v434_v50, %v433_v49 }
  0xbe   : > { %642 = vst [vmem:[%s221_s18 + $0x18] sm:$0xff] %v638_v51  }
  0xbf PF: > { %s14_s15 = sadd.s32 1, %s665_s15  }
  0xc0   : > { %p11_p4 = scmp.ge.s32.totalorder %s14_s15, 4  }
  0xc2   :  { %13 = sbr.rel (!%p11_p4) target bundleno = 1 (0x1), region = 69 }

// kernel: loftr_forward.49
= control target key start
LH: loop header
LB: loop body
LE: loop exit
PB: predicated region body
PF: predicated region fallthrough
CT: control target
= control target key end

     0   :  { %s876_s18 = smov 0   ;;  %s1108_s0 = inlined_call_operand.vmem [shape: bf16[128,128], index: 0, kind: input, shape index: {}]   ;;  %s1109_s1 = inlined_call_operand.vmem [shape: bf16[128,64], index: 1, kind: input, shape index: {}]   ;;  %s1110_s2 = inlined_call_operand.vmem [shape: f32[1,64], index: 2, kind: input, shape index: {}]   ;;  %s1111_s3 = inlined_call_operand.vmem [shape: f32[1,64], index: 3, kind: input, shape index: {}]   ;;  %s1112_s4 = inlined_call_operand.vmem [shape: bf16[128,64], index: 4, kind: input, shape index: {}]   ;;  %s1113_s5 = inlined_call_operand.vmem [shape: bf16[128,64], index: 5, kind: output, shape index: {}]  }
   0x1 LB: > { %s692_s19 = sadd.s32 4294967295, %s843_s18   ;;  %p696_p0 = scmp.ge.s32.totalorder %s843_s18, 1  ;;  %s843_s18 = sphi %s876_s18, %s15_s18  }
   0x2   : > { %p199_p1 = scmp.lt.s32.totalorder %s843_s18, 3 }
   0x4   : > { %p200_p2 = pnand %p696_p0, %p199_p1 }
   0x5   : > { %s697_s28 = sshll.u32 (!%p200_p2), %s692_s19, 3 }
   0x6   : > { %203 = sbr.rel (%p200_p2) target bundleno = 465 (0x1d1), region = 40  ;;  %p233_p3 = scmp.lt.s32.totalorder (!%p200_p2), %s697_s28, 15 }
   0xb   : > { %v764_v0 = vld [vmem:[%s1109_s1 + $0x38] sm:$0xff]  ;;  %v763_v1 = vld [vmem:[%s1109_s1 + $0x30] sm:$0xff]  ;;  %v762_v2 = vld [vmem:[%s1109_s1 + $0x28] sm:$0xff]  ;;  %s1115_s28 = smov (!%p233_p3, %s697_s28), 15  ;;  %vm375_vm0 = vcmask 523264   ;;  %v845_v28 = vmov 64.0  }
   0xc   : > { %346 = vmatpush.bf16.msra.mxu0 %v764_v0  ;;  %784 = vmatpush.bf16.msra.mxu1 %v764_v0  ;;  %v761_v3 = vld [vmem:[%s1109_s1 + $0x20] sm:$0xff]  ;;  %v760_v4 = vld [vmem:[%s1109_s1 + $0x18] sm:$0xff]  ;;  %v759_v5 = vld [vmem:[%s1109_s1 + $0x10] sm:$0xff]  ;;  %s905_s10 = sshll.u32 %s1115_s28, 2  ;;  %819 = vrcp.f32 %v845_v28  ;;  %vm615_vm7 = vcmask 519168  }
   0xd   : > { %785 = vmatpush.bf16.msra.mxu2 %v764_v0  ;;  %786 = vmatpush.bf16.msra.mxu3 %v764_v0  ;;  %v758_v6 = vld [vmem:[%s1109_s1 + $0x8] sm:$0xff]  ;;  %v757_v7 = vld [vmem:[%s1109_s1] sm:$0xff]  ;;  %s236_s15 = scalar_lea.vmem %s1108_s0, %s905_s10  ;;  %s986_s19 = scalar_lea.vmem %s1112_s4, %s905_s10 }
   0xe   : > { %v753_v8 = vld [vmem:[%s236_s15] sm:$0xff]  ;;  %v754_v9 = vld [vmem:[%s236_s15 + $0x8] sm:$0xff]  ;;  %v755_v10 = vld [vmem:[%s236_s15 + $0x10] sm:$0xff]  ;;  %s1058_s26 = scalar_lea.vmem %s1113_s5, %s905_s10 }
   0xf   : > { %v756_v11 = vld [vmem:[%s236_s15 + $0x18] sm:$0xff] }
  0x10   : > { %347 = vmatpush.bf16.msra.mxu0 %v763_v1  ;;  %787 = vmatpush.bf16.msra.mxu1 %v763_v1 }
  0x11   : > { %788 = vmatpush.bf16.msra.mxu2 %v763_v1  ;;  %789 = vmatpush.bf16.msra.mxu3 %v763_v1 }
  0x12   : > { %v820_v29 = vpop.eup %819 }
  0x13   : > { %v401_v30 = vmul.f32 64.0, %v820_v29  ;;  %vm405_vm1 = vweird.f32 %v820_v29 }
  0x14   : > { %348 = vmatpush.bf16.msra.mxu0 %v762_v2  ;;  %790 = vmatpush.bf16.msra.mxu1 %v762_v2 }
  0x15   : > { %791 = vmatpush.bf16.msra.mxu2 %v762_v2  ;;  %792 = vmatpush.bf16.msra.mxu3 %v762_v2  ;;  %v402_v31 = vsub.f32 1.0, %v401_v30 }
  0x17   : > { %v403_v32 = vmul.f32 %v820_v29, %v402_v31 }
  0x18   : > { %349 = vmatpush.bf16.msra.mxu0 %v761_v3  ;;  %793 = vmatpush.bf16.msra.mxu1 %v761_v3 }
  0x19   : > { %794 = vmatpush.bf16.msra.mxu2 %v761_v3  ;;  %795 = vmatpush.bf16.msra.mxu3 %v761_v3  ;;  %v404_v33 = vadd.f32 %v820_v29, %v403_v32 }
  0x1b   : > { %v922_v34 = vsel %vm405_vm1, %v820_v29, %v404_v33 }
  0x1c   : > { %350 = vmatpush.bf16.msra.mxu0 %v760_v4  ;;  %796 = vmatpush.bf16.msra.mxu1 %v760_v4 }
  0x1d   : > { %797 = vmatpush.bf16.msra.mxu2 %v760_v4  ;;  %798 = vmatpush.bf16.msra.mxu3 %v760_v4 }
  0x20   : > { %351 = vmatpush.bf16.msra.mxu0 %v759_v5  ;;  %799 = vmatpush.bf16.msra.mxu1 %v759_v5 }
  0x21   : > { %800 = vmatpush.bf16.msra.mxu2 %v759_v5  ;;  %801 = vmatpush.bf16.msra.mxu3 %v759_v5 }
  0x24   : > { %352 = vmatpush.bf16.msra.mxu0 %v758_v6  ;;  %802 = vmatpush.bf16.msra.mxu1 %v758_v6 }
  0x25   : > { %803 = vmatpush.bf16.msra.mxu2 %v758_v6  ;;  %804 = vmatpush.bf16.msra.mxu3 %v758_v6 }
  0x28   : > { %353 = vmatpush.bf16.msra.mxu0 %v757_v7  ;;  %805 = vmatpush.bf16.msra.mxu1 %v757_v7 }
  0x29   : > { %806 = vmatpush.bf16.msra.mxu2 %v757_v7  ;;  %807 = vmatpush.bf16.msra.mxu3 %v757_v7 }
  0x2b   : > { %354 = vmatmul.bf16.vlgmr.msra.gmra.mxu0 %v753_v8  ;;  %359 = vmatmul.bf16.vlgmr.msra.gmra.mxu1 %v754_v9 }
  0x2c   : > { %364 = vmatmul.bf16.vlgmr.msra.gmra.mxu2 %v755_v10  ;;  %369 = vmatmul.bf16.vlgmr.msra.gmra.mxu3 %v756_v11 }
  0xa8   : > { %v355_v12 = vpop.f32.mrf.mxu0  ;;  %v360_v13 = vpop.f32.mrf.mxu1 }
  0xa9   : > { %v382_v14 = vsel %vm375_vm0, %v360_v13, 0.0  ;;  %v376_v15 = vsel %vm375_vm0, %v355_v12, 0.0 }
  0xaa   : > { %383 = vadd.xlane.f32.xlu1 %v382_v14  ;;  %377 = vadd.xlane.f32.xlu0 %v376_v15 }
  0xaf   : > { %v365_v16 = vpop.f32.mrf.mxu2  ;;  %v370_v17 = vpop.f32.mrf.mxu3 }
  0xb0   : > { %v388_v18 = vsel %vm375_vm0, %v365_v16, 0.0  ;;  %v357_v19 = vpop.f32.mrf.mxu0  ;;  %v362_v20 = vpop.f32.mrf.mxu1  ;;  %v394_v27 = vsel %vm375_vm0, %v370_v17, 0.0 }
  0xb1   : > { %389 = vadd.xlane.f32.xlu2 %v388_v18  ;;  %v385_v21 = vsel %vm375_vm0, %v362_v20, 0.0  ;;  %v379_v22 = vsel %vm375_vm0, %v357_v19, 0.0 }
  0xb2   : > { %386 = vadd.xlane.f32.xlu1 %v385_v21  ;;  %380 = vadd.xlane.f32.xlu0 %v379_v22 }
  0xb7   : > { %v367_v23 = vpop.f32.mrf.mxu2  ;;  %v372_v24 = vpop.f32.mrf.mxu3 }
  0xb8   : > { %v391_v25 = vsel %vm375_vm0, %v367_v23, 0.0  ;;  %v397_v26 = vsel %vm375_vm0, %v372_v24, 0.0 }
  0xb9   : > { %392 = vadd.xlane.f32.xlu2 %v391_v25 }
  0xba   : > { %398 = vadd.xlane.f32.xlu1 %v397_v26  ;;  %395 = vadd.xlane.f32.xlu0 %v394_v27 }
 0x11d   : > { %v384_v35 = vpop.xlane.xlu1 %383  ;;  %v378_v36 = vpop.xlane.xlu0 %377 }
 0x11e   : > { %v409_v37 = vmul.f32 %v922_v34, %v384_v35  ;;  %v407_v38 = vmul.f32 %v922_v34, %v378_v36 }
 0x120   : > { %v926_v39 = vsub.f32 %v360_v13, %v409_v37  ;;  %v928_v40 = vsub.f32 %v355_v12, %v407_v38 }
 0x122   : > { %v425_v41 = vmul.f32 %v926_v39, %v926_v39  ;;  %v423_v42 = vmul.f32 %v928_v40, %v928_v40 }
 0x124   : > { %v390_v43 = vpop.xlane.xlu2 %389  ;;  %v437_v44 = vsel %vm375_vm0, %v425_v41, 0.0  ;;  %v431_v45 = vsel %vm375_vm0, %v423_v42, 0.0 }
 0x125   : > { %v411_v46 = vmul.f32 %v922_v34, %v390_v43  ;;  %438 = vadd.xlane.f32.xlu1 %v437_v44  ;;  %v387_v47 = vpop.xlane.xlu1 %386  ;;  %432 = vadd.xlane.f32.xlu2 %v431_v45  ;;  %v381_v48 = vpop.xlane.xlu0 %380  ;;  %v1000_v45 = vld [vmem:[%s986_s19 + $0x8] sm:$0xff]  }
 0x126   : > { %v410_v49 = vmul.f32 %v922_v34, %v387_v47  ;;  %v408_v51 = vmul.f32 %v922_v34, %v381_v48 }
 0x127   : > { %v938_v50 = vsub.f32 %v365_v16, %v411_v46 }
 0x128   : > { %v941_v52 = vsub.f32 %v362_v20, %v410_v49  ;;  %v947_v55 = vsub.f32 %v357_v19, %v408_v51  ;;  %v1007_v51 = vld [vmem:[%s986_s19] sm:$0xff]  }
 0x129   : > { %v427_v53 = vmul.f32 %v938_v50, %v938_v50 }
 0x12a   : > { %v426_v54 = vmul.f32 %v941_v52, %v941_v52  ;;  %v424_v1 = vmul.f32 %v947_v55, %v947_v55 }
 0x12b   : > { %v443_v56 = vsel %vm375_vm0, %v427_v53, 0.0 }
 0x12c   : > { %v393_v57 = vpop.xlane.xlu2 %392  ;;  %444 = vadd.xlane.f32.xlu0 %v443_v56  ;;  %v440_v58 = vsel %vm375_vm0, %v426_v54, 0.0  ;;  %v434_v7 = vsel %vm375_vm0, %v424_v1, 0.0  ;;  %v1015_v54 = vld [vmem:[%s1110_s2] ss:$0 sm:$0xff]  ;;  %v767_v1 = vunpack.c.l.bf16 %v1007_v51 }
 0x12d   : > { %v412_v59 = vmul.f32 %v922_v34, %v393_v57  ;;  %v399_v60 = vpop.xlane.xlu1 %398  ;;  %441 = vadd.xlane.f32.xlu2 %v440_v58  ;;  %v396_v61 = vpop.xlane.xlu0 %395  ;;  %v1019_v57 = vld [vmem:[%s986_s19 + $0x10] sm:$0xff]  }
 0x12e   : > { %v413_v62 = vmul.f32 %v922_v34, %v396_v61  ;;  %v414_v0 = vmul.f32 %v922_v34, %v399_v60 }
 0x12f   : > { %v953_v63 = vsub.f32 %v367_v23, %v412_v59  ;;  %v771_v59 = vunpack.c.l.bf16 %v1000_v45 }
 0x130   : > { %v958_v2 = vsub.f32 %v370_v17, %v413_v62  ;;  %v964_v5 = vsub.f32 %v372_v24, %v414_v0  ;;  %v1030_v62 = vld [vmem:[%s1111_s3] ss:$0 sm:$0xff] }
 0x131   : > { %v428_v3 = vmul.f32 %v953_v63, %v953_v63 }
 0x132   : > { %v429_v4 = vmul.f32 %v958_v2, %v958_v2  ;;  %v430_v9 = vmul.f32 %v964_v5, %v964_v5 }
 0x133   : > { %v446_v6 = vsel %vm375_vm0, %v428_v3, 0.0 }
 0x134   : > { %447 = vadd.xlane.f32.xlu1 %v446_v6  ;;  %435 = vadd.xlane.f32.xlu0 %v434_v7  ;;  %v449_v8 = vsel %vm375_vm0, %v429_v4, 0.0  ;;  %v452_v10 = vsel %vm375_vm0, %v430_v9, 0.0 }
 0x135   : > { %450 = vadd.xlane.f32.xlu2 %v449_v8  ;;  %v775_v8 = vunpack.c.l.bf16 %v1019_v57 }
 0x13c   : > { %453 = vadd.xlane.f32.xlu0 %v452_v10 }
 0x198   : > { %v439_v11 = vpop.xlane.xlu1 %438  ;;  %v433_v12 = vpop.xlane.xlu2 %432 }
 0x199   : > { %v457_v13 = vmul.f32 %v439_v11, %v922_v34  ;;  %v455_v14 = vmul.f32 %v433_v12, %v922_v34 }
 0x19b   : > { %v465_v15 = vadd.f32 1e-05, %v457_v13  ;;  %v463_v16 = vadd.f32 1e-05, %v455_v14  ;;  %v772_v13 = vunpack.c.h.bf16 %v1000_v45 }
 0x19d   : > { %821 = vrsqrt.f32 %v465_v15  ;;  %vm497_vm4 = vweird.f32 %v465_v15  ;;  %vm477_vm6 = vweird.f32 %v463_v16 }
 0x19e   : > { %823 = vrsqrt.f32 %v463_v16 }
 0x19f   : > { %v445_v17 = vpop.xlane.xlu0 %444 }
 0x1a0   : > { %v459_v18 = vmul.f32 %v445_v17, %v922_v34  ;;  %v442_v19 = vpop.xlane.xlu2 %441 }
 0x1a1   : > { %v458_v20 = vmul.f32 %v442_v19, %v922_v34 }
 0x1a2   : > { %v976_v21 = vadd.f32 1e-05, %v459_v18 }
 0x1a3   : > { %v822_v22 = vpop.eup %821  ;;  %v978_v23 = vadd.f32 1e-05, %v458_v20 }
 0x1a4   : > { %v824_v24 = vpop.eup %823  ;;  %v492_v25 = vmul.f32 %v822_v22, %v465_v15  ;;  %825 = vrsqrt.f32 %v976_v21  ;;  %vm498_vm2 = vweird.f32 %v822_v22  ;;  %vm517_vm10 = vweird.f32 %v976_v21 }
 0x1a5   : > { %v472_v26 = vmul.f32 %v824_v24, %v463_v16  ;;  %827 = vrsqrt.f32 %v978_v23  ;;  %vm478_vm3 = vweird.f32 %v824_v24  ;;  %vm499_vm5 = vmor %vm497_vm4, %vm498_vm2  ;;  %vm507_vm12 = vweird.f32 %v978_v23 }
 0x1a6   : > { %v493_v27 = vmul.f32 %v822_v22, %v492_v25  ;;  %vm479_vm8 = vmor %vm477_vm6, %vm478_vm3 }
 0x1a7   : > { %v473_v28 = vmul.f32 %v824_v24, %v472_v26  ;;  %v448_v29 = vpop.xlane.xlu1 %447  ;;  %v436_v30 = vpop.xlane.xlu0 %435 }
 0x1a8   : > { %v494_v31 = vmul.f32 0.5, %v493_v27  ;;  %v460_v32 = vmul.f32 %v448_v29, %v922_v34  ;;  %v456_v33 = vmul.f32 %v436_v30, %v922_v34  ;;  %v451_v35 = vpop.xlane.xlu2 %450 }
 0x1a9   : > { %v474_v36 = vmul.f32 0.5, %v473_v28  ;;  %v461_v37 = vmul.f32 %v451_v35, %v922_v34 }
 0x1aa   : > { %v991_v38 = vpop.eup %825  ;;  %v495_v41 = vsub.f32 1.5, %v494_v31  ;;  %v993_v42 = vadd.f32 1e-05, %v460_v32  ;;  %v995_v43 = vadd.f32 1e-05, %v456_v33 }
 0x1ab   : > { %v997_v44 = vpop.eup %827  ;;  %v475_v46 = vsub.f32 1.5, %v474_v36  ;;  %v512_v47 = vmul.f32 %v991_v38, %v976_v21  ;;  %v1004_v48 = vadd.f32 1e-05, %v461_v37  ;;  %vm518_vm9 = vweird.f32 %v991_v38 }
 0x1ac   : > { %v496_v49 = vmul.f32 %v822_v22, %v495_v41  ;;  %v502_v53 = vmul.f32 %v997_v44, %v978_v23  ;;  %829 = vrsqrt.f32 %v993_v42  ;;  %vm508_vm11 = vweird.f32 %v997_v44  ;;  %vm519_vm13 = vmor %vm517_vm10, %vm518_vm9 }
 0x1ad   : > { %v476_v56 = vmul.f32 %v824_v24, %v475_v46  ;;  %v513_v58 = vmul.f32 %v991_v38, %v512_v47  ;;  %831 = vrsqrt.f32 %v995_v43  ;;  %vm509_vm14 = vmor %vm507_vm12, %vm508_vm11  ;;  %vm527_vm0 = vweird.f32 %v993_v42 }
 0x1ae   : > { %v500_v60 = vsel %vm499_vm5, %v822_v22, %v496_v49  ;;  %v503_v61 = vmul.f32 %v997_v44, %v502_v53  ;;  %833 = vrsqrt.f32 %v1004_v48  ;;  %vm487_vm4 = vweird.f32 %v995_v43 }
 0x1af   : > { %v553_v0 = vmul.f32 %v500_v60, %v926_v39  ;;  %v480_v3 = vsel %vm479_vm8, %v824_v24, %v476_v56  ;;  %v514_v4 = vmul.f32 0.5, %v513_v58  ;;  %v454_v6 = vpop.xlane.xlu0 %453  ;;  %vm537_vm6 = vweird.f32 %v1004_v48 }
 0x1b0   : > { %v551_v7 = vmul.f32 %v480_v3, %v928_v40  ;;  %v504_v9 = vmul.f32 0.5, %v503_v61  ;;  %v462_v10 = vmul.f32 %v454_v6, %v922_v34  ;;  %v783_v6 = vld [vmem:[%s986_s19 + $0x18] sm:$0xff]  }
 0x1b1   : > { %v565_v11 = vmul.f32 %v1015_v54, %v553_v0  ;;  %v515_v12 = vsub.f32 1.5, %v514_v4 }
 0x1b2   : > { %v830_v39 = vpop.eup %829  ;;  %v563_v14 = vmul.f32 %v1015_v54, %v551_v7  ;;  %v505_v15 = vsub.f32 1.5, %v504_v9  ;;  %v1050_v22 = vadd.f32 1e-05, %v462_v10 }
 0x1b3   : > { %v832_v40 = vpop.eup %831  ;;  %v577_v16 = vadd.f32 %v1030_v62, %v565_v11  ;;  %v516_v34 = vmul.f32 %v991_v38, %v515_v12  ;;  %v522_v17 = vmul.f32 %v830_v39, %v993_v42  ;;  %vm528_vm15 = vweird.f32 %v830_v39 }
 0x1b4   : > { %v834_v18 = vpop.eup %833  ;;  %v575_v19 = vadd.f32 %v1030_v62, %v563_v14  ;;  %v506_v20 = vmul.f32 %v997_v44, %v505_v15  ;;  %v482_v21 = vmul.f32 %v832_v40, %v995_v43  ;;  %835 = vrsqrt.f32 %v1050_v22  ;;  %vm529_vm3 = vmor %vm527_vm0, %vm528_vm15 }
 0x1b5   : > { %v601_v24 = vadd.f32 %v771_v59, %v577_v16  ;;  %v520_v25 = vsel %vm519_vm13, %v991_v38, %v516_v34  ;;  %v523_v26 = vmul.f32 %v830_v39, %v522_v17  ;;  %v532_v27 = vmul.f32 %v834_v18, %v1004_v48 }
 0x1b6   : > { %v599_v23 = vadd.f32 %v767_v1, %v575_v19  ;;  %v555_v28 = vmul.f32 %v520_v25, %v938_v50  ;;  %v510_v29 = vsel %vm509_vm14, %v997_v44, %v506_v20  ;;  %v483_v30 = vmul.f32 %v832_v40, %v482_v21 }
 0x1b7   : > { %v609_v31 = vpack.c.bf16 %v601_v24, %v601_v24  ;;  %v554_v32 = vmul.f32 %v510_v29, %v941_v52  ;;  %v524_v33 = vmul.f32 0.5, %v523_v26  ;;  %v533_v35 = vmul.f32 %v834_v18, %v532_v27 }
 0x1b8   : > { %v607_v36 = vpack.c.bf16 %v599_v23, %v599_v23  ;;  %v567_v37 = vmul.f32 %v1015_v54, %v555_v28  ;;  %v484_v38 = vmul.f32 0.5, %v483_v30  ;;  %vm488_vm1 = vweird.f32 %v832_v40 }
 0x1b9   : > { %618 = vst.msk [vmem:[%s1058_s26 + $0x8] sm:$0xf] %vm615_vm7, %v609_v31  ;;  %v566_v41 = vmul.f32 %v1015_v54, %v554_v32  ;;  %v525_v45 = vsub.f32 1.5, %v524_v33  ;;  %v534_v50 = vmul.f32 0.5, %v533_v35  ;;  %vm538_vm2 = vweird.f32 %v834_v18  ;;  %vm489_vm5 = vmor %vm487_vm4, %vm488_vm1 }
 0x1ba   : > { %616 = vst.msk [vmem:[%s1058_s26] sm:$0xf] %vm615_vm7, %v607_v36  ;;  %v579_v44 = vadd.f32 %v1030_v62, %v567_v37  ;;  %v485_v52 = vsub.f32 1.5, %v484_v38  ;;  %vm539_vm8 = vmor %vm537_vm6, %vm538_vm2  ;;  %v836_v1 = vpop.eup %835  ;;  %v776_v43 = vunpack.c.h.bf16 %v1019_v57  ;;  %v779_v11 = vunpack.c.l.bf16 %v783_v6 }
 0x1bb   : > { %v578_v46 = vadd.f32 %v1030_v62, %v566_v41  ;;  %v526_v47 = vmul.f32 %v830_v39, %v525_v45  ;;  %v535_v49 = vsub.f32 1.5, %v534_v50  ;;  %v542_v48 = vmul.f32 %v836_v1, %v1050_v22 }
 0x1bc   : > { %v603_v53 = vadd.f32 %v775_v8, %v579_v44  ;;  %v486_v56 = vmul.f32 %v832_v40, %v485_v52  ;;  %vm548_vm9 = vweird.f32 %v836_v1  ;;  %vm547_vm10 = vweird.f32 %v1050_v22 }
 0x1bd   : > { %v602_v58 = vadd.f32 %v772_v13, %v578_v46  ;;  %v530_v59 = vsel %vm529_vm3, %v830_v39, %v526_v47  ;;  %v536_v60 = vmul.f32 %v834_v18, %v535_v49  ;;  %v543_v57 = vmul.f32 %v836_v1, %v542_v48  ;;  %vm549_vm11 = vmor %vm547_vm10, %vm548_vm9 }
 0x1be   : > { %v611_v42 = vpack.c.bf16 %v603_v53, %v603_v53  ;;  %v556_v61 = vmul.f32 %v530_v59, %v953_v63  ;;  %v490_v0 = vsel %vm489_vm5, %v832_v40, %v486_v56  ;;  %v768_v63 = vunpack.c.h.bf16 %v1007_v51 }
 0x1bf   : > { %v610_v3 = vpack.c.bf16 %v602_v58, %v602_v58  ;;  %v552_v4 = vmul.f32 %v490_v0, %v947_v55  ;;  %v540_v7 = vsel %vm539_vm8, %v834_v18, %v536_v60  ;;  %v544_v14 = vmul.f32 0.5, %v543_v57 }
 0x1c0   : > { %620 = vst.msk [vmem:[%s1058_s26 + $0x10] sm:$0xf] %vm615_vm7, %v611_v42  ;;  %v568_v8 = vmul.f32 %v1015_v54, %v556_v61  ;;  %v557_v9 = vmul.f32 %v540_v7, %v958_v2  ;;  %v780_v21 = vunpack.c.h.bf16 %v783_v6 }
 0x1c1   : > { %619 = vst.msk [vmem:[%s1058_s26 + $0xc] sm:$0xf] %vm615_vm7, %v610_v3  ;;  %v564_v10 = vmul.f32 %v1015_v54, %v552_v4  ;;  %v545_v16 = vsub.f32 1.5, %v544_v14 }
 0x1c2   : > { %v580_v55 = vadd.f32 %v1030_v62, %v568_v8  ;;  %v569_v12 = vmul.f32 %v1015_v54, %v557_v9 }
 0x1c3   : > { %v576_v13 = vadd.f32 %v1030_v62, %v564_v10  ;;  %v546_v18 = vmul.f32 %v836_v1, %v545_v16 }
 0x1c4   : > { %v604_v2 = vadd.f32 %v776_v43, %v580_v55  ;;  %v581_v39 = vadd.f32 %v1030_v62, %v569_v12 }
 0x1c5   : > { %v600_v15 = vadd.f32 %v768_v63, %v576_v13  ;;  %v550_v19 = vsel %vm549_vm11, %v836_v1, %v546_v18 }
 0x1c6   : > { %v612_v40 = vpack.c.bf16 %v604_v2, %v604_v2  ;;  %v605_v51 = vadd.f32 %v779_v11, %v581_v39  ;;  %v558_v20 = vmul.f32 %v550_v19, %v964_v5 }
 0x1c7   : > { %v608_v34 = vpack.c.bf16 %v600_v15, %v600_v15 }
 0x1c8   : > { %621 = vst.msk [vmem:[%s1058_s26 + $0x14] sm:$0xf] %vm615_vm7, %v612_v40  ;;  %v613_v17 = vpack.c.bf16 %v605_v51, %v605_v51  ;;  %v570_v24 = vmul.f32 %v1015_v54, %v558_v20 }
 0x1c9   : > { %617 = vst.msk [vmem:[%s1058_s26 + $0x4] sm:$0xf] %vm615_vm7, %v608_v34 }
 0x1ca   : > { %622 = vst.msk [vmem:[%s1058_s26 + $0x18] sm:$0xf] %vm615_vm7, %v613_v17  ;;  %v582_v25 = vadd.f32 %v1030_v62, %v570_v24 }
 0x1cc   : > { %v606_v26 = vadd.f32 %v780_v21, %v582_v25 }
 0x1ce   : > { %v614_v27 = vpack.c.bf16 %v606_v26, %v606_v26 }
 0x1d0   : > { %623 = vst.msk [vmem:[%s1058_s26 + $0x1c] sm:$0xf] %vm615_vm7, %v614_v27 }
 0x1d1 PF: > { %s15_s18 = sadd.s32 1, %s843_s18  }
 0x1d2   : > { %p12_p4 = scmp.ge.s32.totalorder %s15_s18, 4  }
 0x1d4   :  { %14 = sbr.rel (!%p12_p4) target bundleno = 1 (0x1), region = 73 }

// kernel: loftr_forward.67
= control target key start
LH: loop header
LB: loop body
LE: loop exit
PB: predicated region body
PF: predicated region fallthrough
CT: control target
= control target key end

     0   :  { %8 = vsyncpa [#allocation3], 0  ;;  %s1229_s0 = inlined_call_operand.vmem [shape: f32[2,64,64], index: 0, kind: input, shape index: {}]   ;;  %s1230_s1 = inlined_call_operand.vmem [shape: f32[2,1,64], index: 1, kind: input, shape index: {}]   ;;  %s1231_s2 = inlined_call_operand.vmem [shape: f32[2,1,64], index: 2, kind: input, shape index: {}]   ;;  %s1232_s3 = inlined_call_operand.hbm [shape: f32[2,64,64], index: 3, kind: output, shape index: {}]  }
   0x1   :  { %10 = vsyncpa [#allocation3 + $0x1], 0  ;;  %s877_s12 = smov 0   ;;  %s879_s13 = smov 0  }
   0x2   :  { %s881_s14 = smov 0   ;;  %s883_s15 = smov 0  }
   0x3   :  { %s885_s16 = smov 0   ;;  %s887_s17 = smov 0  }
   0x4 LB: > { %s649_s18 = sadd.s32 4294967295, %s853_s17   ;;  %s650_s19 = sadd.s32 4294967294, %s853_s17   ;;  %s853_s17 = sphi %s887_s17, %s16_s17   ;;  %s849_s16 = sphi %s885_s16, %s1247_s16   ;;  %s845_s15 = sphi %s883_s15, %s1246_s15   ;;  %s841_s14 = sphi %s881_s14, %s1245_s14   ;;  %s837_s13 = sphi %s879_s13, %s1244_s13   ;;  %s833_s12 = sphi %s877_s12, %s1243_s12  }
   0x5   : > { %s28_s20 = sadd.s32 1, %s849_s16  ;;  %s117_s21 = sadd.s32 1, %s841_s14 }
   0x6   : > { %p30_p0 = scmp.ge.s32.totalorder %s28_s20, 2  ;;  %p127_p1 = scmp.ne.s32.totalorder %s841_s14, %s837_s13 }
   0x7   : > { %p128_p2 = scmp.eq.s32.totalorder %s649_s18, 1  ;;  %p133_p3 = scmp.ne.s32.totalorder %s837_s13, %s833_s12 }
   0x8   : > { %s1249_s20 = smov (%p30_p0, %s28_s20), 0  ;;  %p134_p5 = scmp.eq.s32.totalorder %s650_s19, 1 }
   0x9   : > { %p917_p4 = por %p128_p2, %p127_p1  ;;  %s112_s23 = ssub.s32 %s849_s16, %s1249_s20 }
   0xa   : > { %p653_p6 = scmp.ge.s32.totalorder %s853_s17, 1  ;;  %p115_p7 = scmp.eq.s32.totalorder %s112_s23, 0 }
   0xb   : > { %p924_p8 = por %p134_p5, %p133_p3  ;;  %p177_p9 = scmp.lt.s32.totalorder %s853_s17, 3 }
   0xc   : > { %s930_s25 = scalar_select %p115_p7, %s841_s14, %s117_s21  }
   0xd   : > { %p178_p10 = pnand %p653_p6, %p177_p9 }
   0xe   : > { %p212_p11 = scmp.lt.s32.totalorder (!%p178_p10), %s845_s15, 1  ;;  %s208_s18 = sand.u32 (!%p178_p10), 1, %s837_s13  }
   0xf   : > { %181 = sbr.rel (%p178_p10) target bundleno = 322 (0x142), region = 32  ;;  %s654_s19 = sshll.u32 (!%p178_p10), %s208_s18, 6 }
  0x10   : > { %s1126_s21 = scalar_lea.vmem (!%p178_p10), [#allocation2], %s654_s19  ;;  %s663_s23 = sshll.u32 (!%p178_p10), %s845_s15, 6 }
  0x11   : > { %s549_s28 = sshll.u32 (!%p178_p10), %s1126_s21, 4  ;;  %s535_s30 = scalar_lea.sflag (!%p178_p10), [#allocation3], %s208_s18  ;;  %s550_s28 = int_to_ptr.vmem [resolvable:$true] %s549_s28 }
  0x12   : > { %s795_s8 = scalar_lea.hbm (!%p178_p10), %s1232_s3, 128 }
  0x14   : > { %s934_s26 = scalar_select %p212_p11, %s845_s15, 1  ;;  %vm315_vm0 = vcmask 516096   ;;  %vm290_vm1 = vcmask 523264  }
  0x15   : > { %s548_s15 = scalar_lea.hbm %s1232_s3, %s663_s23 }
  0x16   : > { %s223_s29 = scalar_lea.vmem %s1230_s1, %s934_s26  ;;  %s226_s5 = scalar_lea.vmem %s1231_s2, %s934_s26 }
  0x17   : > { %v236_v0 = vld [vmem:[%s223_s29] sm:$0x1]  ;;  %s662_s6 = sshll.u32 %s934_s26, 6 }
  0x18   : > { %v316_v1 = vsel %vm315_vm0, %v236_v0, -inf  ;;  %v945_v2 = vld [vmem:[%s223_s29] ss:$0 sm:$0xff]  ;;  %s219_s9 = scalar_lea.vmem %s1229_s0, %s662_s6  ;;  %s551_s29 = sshll.u32 %s548_s15, 4  ;;  %s552_s29 = int_to_ptr.hbm [resolvable:$true] %s551_s29 }
  0x19   : > { %317 = vmax.xlane.f32.xlu0 %v316_v1  ;;  %v231_v3 = vld [vmem:[%s219_s9 + $0x18] sm:$0xff]  ;;  %v229_v4 = vld [vmem:[%s219_s9 + $0x8] sm:$0xff]  ;;  %v228_v7 = vld [vmem:[%s219_s9] sm:$0xff]  ;;  %s789_s4 = sshra.s32 %s552_s29, 4  ;;  %s790_s4 = int_to_ptr.hbm [resolvable:$true] %s789_s4 }
  0x1a   : > { %v300_v5 = vsel %vm290_vm1, %v231_v3, -inf  ;;  %v244_v6 = vsub.f32 %v231_v3, %v945_v2  ;;  %v294_v8 = vsel %vm290_vm1, %v229_v4, -inf  ;;  %v242_v9 = vsub.f32 %v229_v4, %v945_v2  ;;  %v232_v11 = vld [vmem:[%s219_s9 + $0x20] sm:$0xff]  ;;  %v230_v12 = vld [vmem:[%s219_s9 + $0x10] sm:$0xff]  ;;  %v233_v15 = vld [vmem:[%s219_s9 + $0x28] sm:$0xff]  ;;  %p796_p1 = scmp.lt.s32.totalorder %s790_s4, %s1232_s3 }
  0x1b   : > { %301 = vmax.xlane.f32.xlu2 %v300_v5  ;;  %v241_v10 = vsub.f32 %v228_v7, %v945_v2  ;;  %295 = vmax.xlane.f32.xlu1 %v294_v8  ;;  %v245_v13 = vsub.f32 %v232_v11, %v945_v2  ;;  %v243_v14 = vsub.f32 %v230_v12, %v945_v2  ;;  %v291_v16 = vsel %vm290_vm1, %v228_v7, -inf  ;;  %v959_v18 = vld [vmem:[%s219_s9 + $0x38] sm:$0xff]  ;;  %v961_v19 = vld [vmem:[%s219_s9 + $0x30] sm:$0xff] }
  0x1c   : > { %v246_v17 = vsub.f32 %v233_v15, %v945_v2  ;;  %v303_v20 = vsel %vm290_vm1, %v232_v11, -inf  ;;  %v248_v21 = vsub.f32 %v959_v18, %v945_v2  ;;  %v247_v22 = vsub.f32 %v961_v19, %v945_v2 }
  0x1d   : > { %v297_v23 = vsel %vm290_vm1, %v230_v12, -inf  ;;  %v306_v24 = vsel %vm290_vm1, %v233_v15, -inf  ;;  %v312_v25 = vsel %vm290_vm1, %v959_v18, -inf  ;;  %v309_v26 = vsel %vm290_vm1, %v961_v19, -inf }
  0x1e   : > { %v251_v27 = vmul.f32 1.442695, %v242_v9  ;;  %v249_v36 = vmul.f32 1.442695, %v241_v10  ;;  %v255_v38 = vmul.f32 1.442695, %v244_v6 }
  0x1f   : > { %v257_v40 = vmul.f32 1.442695, %v245_v13  ;;  %v253_v45 = vmul.f32 1.442695, %v243_v14  ;;  %v259_v49 = vmul.f32 1.442695, %v246_v17 }
  0x20   : > { %723 = vpow2.f32 %v251_v27  ;;  %v263_v3 = vmul.f32 1.442695, %v248_v21  ;;  %v261_v14 = vmul.f32 1.442695, %v247_v22 }
  0x21   : > { %292 = vmax.xlane.f32.xlu0 %v291_v16 }
  0x23   : > { %304 = vmax.xlane.f32.xlu2 %v303_v20  ;;  %298 = vmax.xlane.f32.xlu1 %v297_v23 }
  0x26   : > { %v979_v44 = vpop.eup %723 }
  0x29   : > { %307 = vmax.xlane.f32.xlu0 %v306_v24 }
  0x2b   : > { %313 = vmax.xlane.f32.xlu2 %v312_v25  ;;  %310 = vmax.xlane.f32.xlu1 %v309_v26 }
  0x8c   : > { %v318_v28 = vpop.xlane.xlu0 %317 }
  0x8d   : > { %v319_v29 = vsub.f32 %v236_v0, %v318_v28  ;;  %v974_v30 = vperm.slane %v318_v28, 0 }
  0x8e   : > { %v302_v32 = vpop.xlane.xlu2 %301  ;;  %v296_v33 = vpop.xlane.xlu1 %295 }
  0x8f   : > { %v320_v31 = vmul.f32 1.442695, %v319_v29  ;;  %v326_v34 = vsub.f32 %v974_v30, %v302_v32  ;;  %v324_v35 = vsub.f32 %v974_v30, %v296_v33 }
  0x91   : > { %725 = vpow2.f32 %v320_v31  ;;  %v332_v37 = vmin.f32 %v324_v35, 80.0  ;;  %v334_v41 = vmin.f32 %v326_v34, 80.0 }
  0x92   : > { %727 = vpow2.f32 %v249_v36 }
  0x93   : > { %v341_v42 = vmul.f32 1.442695, %v332_v37  ;;  %v345_v53 = vmul.f32 1.442695, %v334_v41 }
  0x94   : > { %v293_v39 = vpop.xlane.xlu0 %292 }
  0x95   : > { %v323_v43 = vsub.f32 %v974_v30, %v293_v39  ;;  %729 = vpow2.f32 %v341_v42 }
  0x96   : > { %v305_v48 = vpop.xlane.xlu2 %304  ;;  %731 = vpow2.f32 %v255_v38  ;;  %v299_v52 = vpop.xlane.xlu1 %298 }
  0x97   : > { %v726_v46 = vpop.eup %725  ;;  %v331_v47 = vmin.f32 %v323_v43, 80.0  ;;  %v327_v51 = vsub.f32 %v974_v30, %v305_v48  ;;  %733 = vpow2.f32 %v257_v40  ;;  %v325_v55 = vsub.f32 %v974_v30, %v299_v52 }
  0x98   : > { %v981_v50 = vperm.slane %v726_v46, 0  ;;  %735 = vpow2.f32 %v253_v45  ;;  %v987_v59 = vpop.eup %727 }
  0x99   : > { %v339_v54 = vmul.f32 1.442695, %v331_v47  ;;  %v335_v56 = vmin.f32 %v327_v51, 80.0  ;;  %v333_v58 = vmin.f32 %v325_v55, 80.0  ;;  %v721_v51 = vld [vmem:[%s226_s5] ss:$0 sm:$0xff] }
  0x9a   : > { %v359_v57 = vmul.f32 %v979_v44, %v981_v50  ;;  %v358_v12 = vmul.f32 %v987_v59, %v981_v50  ;;  %vm273_vm2 = vweird.f32 %v721_v51  ;;  %v279_v55 = vand.u32 2147483648, %v721_v51  ;;  %s791_s5 = scalar_lea.hbm %s790_s4, 64 }
  0x9b   : > { %737 = vpow2.f32 %v339_v54  ;;  %v347_v60 = vmul.f32 1.442695, %v335_v56  ;;  %v730_v62 = vpop.eup %729  ;;  %v343_v63 = vmul.f32 1.442695, %v333_v58  ;;  %p792_p12 = scmp.ne.s32.totalorder %s790_s4, %s791_s5  ;;  %p797_p2 = scmp.lt.s32.totalorder %s795_s8, %s791_s5 }
  0x9c   : > { %739 = vpow2.f32 %v259_v49  ;;  %v308_v61 = vpop.xlane.xlu0 %307  ;;  %v990_v1 = vpop.eup %731  ;;  %v992_v4 = vmul.f32 %v730_v62, %v359_v57  ;;  %v277_v57 = vand.u32 2147483647, %v721_v51 }
  0x9d   : > { %741 = vpow2.f32 %v345_v53  ;;  %v328_v0 = vsub.f32 %v974_v30, %v308_v61  ;;  %v994_v5 = vpop.eup %733  ;;  %v361_v22 = vmul.f32 %v990_v1, %v981_v50  ;;  %p793_p13 = pnand %p792_p12, %p917_p4  ;;  %p798_p3 = por %p797_p2, %p796_p1 }
  0x9e   : > { %743 = vpow2.f32 %v347_v60  ;;  %v314_v7 = vpop.xlane.xlu2 %313  ;;  %v996_v8 = vpop.eup %735  ;;  %v377_v11 = vsel %vm290_vm1, %v992_v4, 0.0  ;;  %v362_v24 = vmul.f32 %v994_v5, %v981_v50  ;;  %v280_v60 = vor.u32 1.1754944e-38, %v279_v55 }
  0x9f   : > { %745 = vpow2.f32 %v343_v63  ;;  %v336_v6 = vmin.f32 %v328_v0, 80.0  ;;  %v330_v9 = vsub.f32 %v974_v30, %v314_v7  ;;  %v311_v10 = vpop.xlane.xlu1 %310  ;;  %378 = vadd.xlane.f32.xlu1 %v377_v11  ;;  %v360_v19 = vmul.f32 %v996_v8, %v981_v50  ;;  %p794_p0 = pneg %p793_p13 }
  0xa0   : > { %v329_v16 = vsub.f32 %v974_v30, %v311_v10  ;;  %747 = vpow2.f32 %v263_v3  ;;  %vm278_vm5 = vcmp.eq.f32.partialorder %v277_v57, 8.507059e+37 }
  0xa1   : > { %v738_v13 = vpop.eup %737  ;;  %v349_v15 = vmul.f32 1.442695, %v336_v6  ;;  %v338_v18 = vmin.f32 %v330_v9, 80.0  ;;  %p799_p5 = pnand %p798_p3, %p794_p0 }
  0xa2   : > { %v1007_v17 = vpop.eup %739  ;;  %v1009_v20 = vmul.f32 %v738_v13, %v358_v12  ;;  %v337_v23 = vmin.f32 %v329_v16, 80.0 }
  0xa3   : > { %v742_v21 = vpop.eup %741  ;;  %749 = vpow2.f32 %v349_v15  ;;  %v353_v26 = vmul.f32 1.442695, %v338_v18  ;;  %v363_v35 = vmul.f32 %v1007_v17, %v981_v50 }
  0xa4   : > { %v744_v25 = vpop.eup %743  ;;  %v374_v2 = vsel %vm290_vm1, %v1009_v20, 0.0  ;;  %751 = vpow2.f32 %v261_v14  ;;  %v351_v28 = vmul.f32 1.442695, %v337_v23  ;;  %v1029_v34 = vmul.f32 %v742_v21, %v361_v22 }
  0xa5   : > { %v746_v27 = vpop.eup %745  ;;  %375 = vadd.xlane.f32.xlu0 %v374_v2  ;;  %v1019_v29 = vmul.f32 %v744_v25, %v362_v24  ;;  %753 = vpow2.f32 %v353_v26 }
  0xa6   : > { %v1021_v30 = vmul.f32 %v746_v27, %v360_v19  ;;  %755 = vpow2.f32 %v351_v28  ;;  %v1025_v32 = vpop.eup %747  ;;  %v383_v41 = vsel %vm290_vm1, %v1029_v34, 0.0 }
  0xa7   : > { %v386_v31 = vsel %vm290_vm1, %v1019_v29, 0.0  ;;  %v365_v39 = vmul.f32 %v1025_v32, %v981_v50  ;;  %757 = vrcp.f32 %v721_v51 }
  0xa8   : > { %v380_v33 = vsel %vm290_vm1, %v1021_v30, 0.0  ;;  %387 = vadd.xlane.f32.xlu1 %v386_v31 }
  0xa9   : > { %v750_v36 = vpop.eup %749  ;;  %381 = vadd.xlane.f32.xlu2 %v380_v33 }
  0xaa   : > { %v1033_v37 = vmul.f32 %v750_v36, %v363_v35  ;;  %v1035_v38 = vpop.eup %751 }
  0xab   : > { %v754_v40 = vpop.eup %753  ;;  %v364_v46 = vmul.f32 %v1035_v38, %v981_v50 }
  0xac   : > { %v756_v42 = vpop.eup %755  ;;  %v1041_v43 = vmul.f32 %v754_v40, %v365_v39  ;;  %v389_v45 = vsel %vm290_vm1, %v1033_v37, 0.0 }
  0xad   : > { %384 = vadd.xlane.f32.xlu0 %v383_v41  ;;  %v1049_v48 = vmul.f32 %v756_v42, %v364_v46  ;;  %v758_v52 = vpop.eup %757 }
  0xae   : > { %v395_v47 = vsel %vm290_vm1, %v1041_v43, 0.0  ;;  %v269_v53 = vmul.f32 %v758_v52, %v721_v51  ;;  %vm274_vm3 = vweird.f32 %v758_v52 }
  0xaf   : > { %v392_v49 = vsel %vm290_vm1, %v1049_v48, 0.0  ;;  %vm275_vm4 = vmor %vm273_vm2, %vm274_vm3 }
  0xb0   : > { %396 = vadd.xlane.f32.xlu1 %v395_v47  ;;  %v270_v50 = vsub.f32 1.0, %v269_v53 }
  0xb1   : > { %390 = vadd.xlane.f32.xlu2 %v389_v45 }
  0xb2   : > { %v271_v54 = vmul.f32 %v758_v52, %v270_v50 }
  0xb4   : > { %v272_v56 = vadd.f32 %v758_v52, %v271_v54 }
  0xb5   : > { %393 = vadd.xlane.f32.xlu0 %v392_v49 }
  0xb6   : > { %v276_v61 = vsel %vm275_vm4, %v758_v52, %v272_v56 }
  0xb7   : > { %v1058_v0 = vsel %vm278_vm5, %v280_v60, %v276_v61 }
  0xb8   : > { %v1066_v9 = vmul.f32 %v990_v1, %v1058_v0  ;;  %v283_v12 = vmul.f32 %v979_v44, %v1058_v0  ;;  %v1074_v16 = vmul.f32 %v987_v59, %v1058_v0  ;;  %v1078_v1 = vmul.f32 %v994_v5, %v1058_v0 }
  0xb9   : > { %v1082_v18 = vmul.f32 %v996_v8, %v1058_v0 }
 0x112   : > { %v379_v58 = vpop.xlane.xlu1 %378 }
 0x113   : > { %759 = vrcp.f32 %v379_v58  ;;  %v422_v10 = vand.u32 2147483647, %v379_v58  ;;  %v424_v11 = vand.u32 2147483648, %v379_v58  ;;  %vm418_vm6 = vweird.f32 %v379_v58 }
 0x115   : > { %vm1087_vm8 = vcmp.eq.f32.partialorder %v422_v10, 8.507059e+37  ;;  %v425_v25 = vor.u32 1.1754944e-38, %v424_v11 }
 0x118   : > { %v376_v62 = vpop.xlane.xlu0 %375 }
 0x119   : > { %761 = vrcp.f32 %v376_v62  ;;  %v760_v63 = vpop.eup %759  ;;  %v407_v14 = vand.u32 2147483647, %v376_v62  ;;  %v409_v21 = vand.u32 2147483648, %v376_v62  ;;  %vm403_vm9 = vweird.f32 %v376_v62 }
 0x11a   : > { %v414_v3 = vmul.f32 %v760_v63, %v379_v58  ;;  %vm419_vm7 = vweird.f32 %v760_v63 }
 0x11b   : > { %v1062_v7 = vpop.xlane.xlu1 %387  ;;  %vm1093_vm10 = vcmp.eq.f32.partialorder %v407_v14, 8.507059e+37  ;;  %vm420_vm11 = vmor %vm418_vm6, %vm419_vm7  ;;  %v410_v22 = vor.u32 1.1754944e-38, %v409_v21 }
 0x11c   : > { %v1060_v6 = vpop.xlane.xlu2 %381  ;;  %v415_v13 = vsub.f32 1.0, %v414_v3  ;;  %vm463_vm13 = vweird.f32 %v1062_v7  ;;  %v467_v42 = vand.u32 2147483647, %v1062_v7  ;;  %v469_v53 = vand.u32 2147483648, %v1062_v7 }
 0x11d   : > { %763 = vrcp.f32 %v1060_v6  ;;  %v437_v5 = vand.u32 2147483647, %v1060_v6  ;;  %vm433_vm12 = vweird.f32 %v1060_v6  ;;  %v439_v27 = vand.u32 2147483648, %v1060_v6 }
 0x11e   : > { %765 = vrcp.f32 %v1062_v7  ;;  %v416_v23 = vmul.f32 %v760_v63, %v415_v13  ;;  %vm1122_vm4 = vcmp.eq.f32.partialorder %v467_v42, 8.507059e+37  ;;  %v470_v11 = vor.u32 1.1754944e-38, %v469_v53 }
 0x11f   : > { %v762_v15 = vpop.eup %761  ;;  %vm1107_vm15 = vcmp.eq.f32.partialorder %v437_v5, 8.507059e+37  ;;  %v440_v51 = vor.u32 1.1754944e-38, %v439_v27 }
 0x120   : > { %v399_v44 = vmul.f32 %v762_v15, %v376_v62  ;;  %v1084_v24 = vpop.xlane.xlu0 %384  ;;  %v417_v8 = vadd.f32 %v760_v63, %v416_v23  ;;  %vm404_vm14 = vweird.f32 %v762_v15 }
 0x121   : > { %767 = vrcp.f32 %v1084_v24  ;;  %vm405_vm0 = vmor %vm403_vm9, %vm404_vm14  ;;  %v452_v3 = vand.u32 2147483647, %v1084_v24 }
 0x122   : > { %v400_v26 = vsub.f32 1.0, %v399_v44  ;;  %v421_v31 = vsel %vm420_vm11, %v760_v63, %v417_v8 }
 0x123   : > { %v764_v19 = vpop.eup %763  ;;  %v426_v39 = vsel %vm1087_vm8, %v425_v25, %v421_v31  ;;  %v1118_v57 = vpop.xlane.xlu1 %396  ;;  %vm448_vm8 = vweird.f32 %v1084_v24  ;;  %vm453_vm9 = vcmp.eq.f32.partialorder %v452_v3, 8.507059e+37 }
 0x124   : > { %v766_v28 = vpop.eup %765  ;;  %v401_v33 = vmul.f32 %v762_v15, %v400_v26  ;;  %v429_v35 = vmul.f32 %v764_v19, %v1060_v6  ;;  %v1103_v36 = vpop.xlane.xlu2 %390  ;;  %v427_v45 = vmul.f32 %v426_v39, %v992_v4  ;;  %vm434_vm2 = vweird.f32 %v764_v19 }
 0x125   : > { %v459_v41 = vmul.f32 %v766_v28, %v1062_v7  ;;  %769 = vrcp.f32 %v1103_v36  ;;  %vm464_vm3 = vweird.f32 %v766_v28  ;;  %vm435_vm5 = vmor %vm433_vm12, %vm434_vm2  ;;  %v482_v2 = vand.u32 2147483647, %v1103_v36 }
 0x126   : > { %v402_v46 = vadd.f32 %v762_v15, %v401_v33  ;;  %v430_v47 = vsub.f32 1.0, %v429_v35  ;;  %v519_v50 = vmul.f32 %v427_v45, %v283_v12  ;;  %v454_v12 = vand.u32 2147483648, %v1084_v24  ;;  %vm465_vm6 = vmor %vm463_vm13, %vm464_vm3 }
 0x127   : > { %v768_v49 = vpop.eup %767  ;;  %v460_v52 = vsub.f32 1.0, %v459_v41  ;;  %771 = vrcp.f32 %v1118_v57  ;;  %vm478_vm12 = vweird.f32 %v1103_v36  ;;  %v287_v33 = vmul.f32 %v1007_v17, %v1058_v0 }
 0x128   : > { %v406_v54 = vsel %vm405_vm0, %v762_v15, %v402_v46  ;;  %v431_v55 = vmul.f32 %v764_v19, %v430_v47  ;;  %v444_v56 = vmul.f32 %v768_v49, %v1084_v24  ;;  %527 = vst.msk [vmem:[%s1126_s21 + $0x8] sm:$0xff] %vm290_vm1, %v519_v50  ;;  %vm449_vm7 = vweird.f32 %v768_v49  ;;  %v1141_v21 = vpop.xlane.xlu0 %393 }
 0x129   : > { %v411_v4 = vsel %vm1093_vm10, %v410_v22, %v406_v54  ;;  %v461_v58 = vmul.f32 %v766_v28, %v460_v52  ;;  %vm450_vm10 = vmor %vm448_vm8, %vm449_vm7  ;;  %v455_v5 = vor.u32 1.1754944e-38, %v454_v12  ;;  %773 = vrcp.f32 %v1141_v21 }
 0x12a   : > { %v412_v61 = vmul.f32 %v411_v4, %v1009_v20  ;;  %v432_v62 = vadd.f32 %v764_v19, %v431_v55  ;;  %v445_v63 = vsub.f32 1.0, %v444_v56  ;;  %vm483_vm14 = vcmp.eq.f32.partialorder %v482_v2, 8.507059e+37 }
 0x12b   : > { %v462_v10 = vadd.f32 %v766_v28, %v461_v58  ;;  %v770_v13 = vpop.eup %769  ;;  %v514_v42 = vand.u32 2147483648, %v1118_v57  ;;  %v289_v46 = vmul.f32 %v1025_v32, %v1058_v0  ;;  %vm508_vm0 = vweird.f32 %v1118_v57 }
 0x12c   : > { %v518_v14 = vmul.f32 %v412_v61, %v1074_v16  ;;  %v436_v15 = vsel %vm435_vm5, %v764_v19, %v432_v62  ;;  %v446_v20 = vmul.f32 %v768_v49, %v445_v63  ;;  %v474_v44 = vmul.f32 %v770_v13, %v1103_v36 }
 0x12d   : > { %v441_v6 = vsel %vm1107_vm15, %v440_v51, %v436_v15  ;;  %v466_v23 = vsel %vm465_vm6, %v766_v28, %v462_v10  ;;  %v772_v19 = vpop.eup %771  ;;  %vm479_vm11 = vweird.f32 %v770_v13  ;;  %v515_v52 = vor.u32 1.1754944e-38, %v514_v42 }
 0x12e   : > { %526 = vst.msk [vmem:[%s1126_s21] sm:$0xff] %vm290_vm1, %v518_v14  ;;  %v442_v16 = vmul.f32 %v441_v6, %v1021_v30  ;;  %v471_v7 = vsel %vm1122_vm4, %v470_v11, %v466_v23  ;;  %v447_v59 = vadd.f32 %v768_v49, %v446_v20  ;;  %v475_v8 = vsub.f32 1.0, %v474_v44  ;;  %vm480_vm13 = vmor %vm478_vm12, %vm479_vm11 }
 0x12f   : > { %v472_v25 = vmul.f32 %v471_v7, %v1019_v29  ;;  %v484_v30 = vand.u32 2147483648, %v1103_v36  ;;  %v504_v31 = vmul.f32 %v772_v19, %v1118_v57  ;;  %v774_v40 = vpop.eup %773  ;;  %vm509_vm15 = vweird.f32 %v772_v19 }
 0x130   : > { %v520_v24 = vmul.f32 %v442_v16, %v1082_v18  ;;  %v451_v26 = vsel %vm450_vm10, %v768_v49, %v447_v59  ;;  %v476_v28 = vmul.f32 %v770_v13, %v475_v8  ;;  %v489_v17 = vmul.f32 %v774_v40, %v1141_v21  ;;  %vm510_vm2 = vmor %vm508_vm0, %vm509_vm15 }
 0x131   : > { %v522_v22 = vmul.f32 %v472_v25, %v1078_v1  ;;  %v456_v27 = vsel %vm453_vm9, %v455_v5, %v451_v26  ;;  %v485_v35 = vor.u32 1.1754944e-38, %v484_v30  ;;  %v505_v39 = vsub.f32 1.0, %v504_v31 }
 0x132   : > { %528 = vst.msk [vmem:[%s1126_s21 + $0x10] sm:$0xff] %vm290_vm1, %v520_v24  ;;  %v457_v29 = vmul.f32 %v456_v27, %v1029_v34  ;;  %v477_v18 = vadd.f32 %v770_v13, %v476_v28  ;;  %v512_v34 = vand.u32 2147483647, %v1118_v57  ;;  %v490_v49 = vsub.f32 1.0, %v489_v17 }
 0x133   : > { %530 = vst.msk [vmem:[%s1126_s21 + $0x20] sm:$0xff] %vm290_vm1, %v522_v22  ;;  %v506_v36 = vmul.f32 %v772_v19, %v505_v39  ;;  %v499_v53 = vand.u32 2147483648, %v1141_v21  ;;  %vm494_vm4 = vweird.f32 %v774_v40  ;;  %vm493_vm5 = vweird.f32 %v1141_v21 }
 0x134   : > { %v521_v1 = vmul.f32 %v457_v29, %v1066_v9  ;;  %v481_v41 = vsel %vm480_vm13, %v770_v13, %v477_v18  ;;  %vm513_vm3 = vcmp.eq.f32.partialorder %v512_v34, 8.507059e+37  ;;  %v491_v54 = vmul.f32 %v774_v40, %v490_v49  ;;  %vm495_vm6 = vmor %vm493_vm5, %vm494_vm4 }
 0x135   : > { %v486_v45 = vsel %vm483_vm14, %v485_v35, %v481_v41  ;;  %v507_v47 = vadd.f32 %v772_v19, %v506_v36  ;;  %v500_v57 = vor.u32 1.1754944e-38, %v499_v53  ;;  %v288_v4 = vmul.f32 %v1035_v38, %v1058_v0 }
 0x136   : > { %529 = vst.msk [vmem:[%s1126_s21 + $0x18] sm:$0xff] %vm290_vm1, %v521_v1  ;;  %v487_v9 = vmul.f32 %v486_v45, %v1033_v37  ;;  %v497_v37 = vand.u32 2147483647, %v1141_v21  ;;  %v492_v56 = vadd.f32 %v774_v40, %v491_v54 }
 0x137   : > { %v511_v50 = vsel %vm510_vm2, %v772_v19, %v507_v47 }
 0x138   : > { %v523_v51 = vmul.f32 %v487_v9, %v287_v33  ;;  %v516_v32 = vsel %vm513_vm3, %v515_v52, %v511_v50  ;;  %v496_v60 = vsel %vm495_vm6, %v774_v40, %v492_v56  ;;  %vm498_vm7 = vcmp.eq.f32.partialorder %v497_v37, 8.507059e+37 }
 0x139   : > { %v517_v55 = vmul.f32 %v516_v32, %v1041_v43  ;;  %v501_v43 = vsel %vm498_vm7, %v500_v57, %v496_v60 }
 0x13a   : > { %531 = vst.msk [vmem:[%s1126_s21 + $0x28] sm:$0xff] %vm290_vm1, %v523_v51  ;;  %v502_v61 = vmul.f32 %v501_v43, %v1049_v48 }
 0x13b   : > { %v525_v58 = vmul.f32 %v517_v55, %v289_v46 }
 0x13c   : > { %v524_v62 = vmul.f32 %v502_v61, %v288_v4 }
 0x13d   : > { %533 = vst.msk [vmem:[%s1126_s21 + $0x38] sm:$0xff] %vm290_vm1, %v525_v58 }
 0x13e   : > { %532 = vst.msk [vmem:[%s1126_s21 + $0x30] sm:$0xff] %vm290_vm1, %v524_v62 }
 0x13f   : > { %802 = shalt.err (!%p799_p5)
}
 0x140   : > { %s855_s11 = smov 128   ;;  %s856_s18 = smov 8  }
 0x141   : > { %664 = dma.vmem_to_hbm [thread:$0]  (%p917_p4), %s550_s28, 1024, %s552_s29, %s535_s30, %s855_s11, %s855_s11, %s856_s18  }
 0x142 PF: > { %p670_p6 = scmp.ge.s32.totalorder %s853_s17, 2  ;;  %s566_s19 = sand.u32 1, %s833_s12  }
 0x143   : > { %s567_s21 = scalar_lea.sflag [#allocation3], %s566_s19 }
 0x144   : > { %p667_p7 = pnand %p670_p6, %p924_p8 }
 0x146   : > { %p668_p9 = pneg %p667_p7 }
 0x148   : > { %828 = dma.done.wait (%p668_p9), %s567_s21, 1024  }
 0x149   : > { %830 = vsyncadd (%p668_p9), %s567_s21, 4294966272  ;;  %s16_s17 = sadd.s32 1, %s853_s17   ;;  %s1243_s12 = smov %s837_s13 }
 0x14a   : > { %p13_p10 = scmp.ge.s32.totalorder %s16_s17, 4   ;;  %s1244_s13 = smov %s841_s14 }
 0x14b   : > { %s1245_s14 = smov %s930_s25  ;;  %s1246_s15 = smov %s849_s16 }
 0x14c   : > { %s1247_s16 = smov %s1249_s20  ;;  %15 = sbr.rel (!%p13_p10) target bundleno = 4 (0x4), region = 73 }
 0x151   :  { %573 = vsyncpa [#allocation3], 1 }
 0x152   :  { %575 = vsyncpa [#allocation3 + $0x1], 1 }

// kernel: loftr_forward.66
= control target key start
LH: loop header
LB: loop body
LE: loop exit
PB: predicated region body
PF: predicated region fallthrough
CT: control target
= control target key end

     0   :  { %s804_s15 = smov 0   ;;  %s806_s16 = smov 0   ;;  %s908_s0 = inlined_call_operand.vmem [shape: bf16[2,64,64], index: 0, kind: input, shape index: {}]   ;;  %s909_s1 = inlined_call_operand.vmem [shape: bf16[2,64,64], index: 1, kind: input, shape index: {}]   ;;  %s910_s2 = inlined_call_operand.vmem [shape: f32[2,64,64], index: 2, kind: output, shape index: {0}]   ;;  %s911_s3 = inlined_call_operand.vmem [shape: f32[2,1,64], index: 3, kind: output, shape index: {1}]   ;;  %s912_s4 = inlined_call_operand.vmem [shape: f32[2,1,64], index: 4, kind: output, shape index: {2}]  }
   0x1   :  { %s808_s17 = smov 0  }
   0x2 LB: > { %s27_s18 = sadd.s32 1, %s771_s16  ;;  %p641_p0 = scmp.ge.s32.totalorder %s775_s17, 1  ;;  %s775_s17 = sphi %s808_s17, %s15_s17   ;;  %s771_s16 = sphi %s806_s16, %s914_s16   ;;  %s767_s15 = sphi %s804_s15, %s913_s15  }
   0x3   : > { %p29_p1 = scmp.ge.s32.totalorder %s27_s18, 2  ;;  %p198_p2 = scmp.lt.s32.totalorder %s775_s17, 3 }
   0x5   : > { %s916_s18 = smov (%p29_p1, %s27_s18), 0  ;;  %p199_p3 = pnand %p641_p0, %p198_p2 }
   0x6   : > { %p244_p4 = scmp.lt.s32.totalorder (!%p199_p3), %s767_s15, 1 }
   0x7   : > { %202 = sbr.rel (%p199_p3) target bundleno = 256 (0x100), region = 28 }
   0xc   : > { %s918_s15 = smov (!%p244_p4, %s767_s15), 1  ;;  %vm338_vm0 = vcmask 523264   ;;  %vm279_vm1 = vcmask 516096   ;;  %v777_v12 = vmov -inf   ;;  %v778_v13 = vmov 0.0  }
   0xd   : > { %s686_s19 = sshll.u32 %s918_s15, 5  ;;  %s843_s28 = scalar_lea.vmem %s911_s3, %s918_s15 }
   0xe   : > { %s257_s22 = scalar_lea.vmem %s909_s1, %s686_s19  ;;  %s251_s25 = scalar_lea.vmem %s908_s0, %s686_s19  ;;  %280 = vst.msk [vmem:[%s843_s28] sm:$0x1] %vm279_vm1, %v777_v12 }
   0xf   : > { %v696_v0 = vld [vmem:[%s257_s22 + $0x18] sm:$0xff]  ;;  %v695_v2 = vld [vmem:[%s257_s22 + $0x10] sm:$0xff]  ;;  %v694_v4 = vld [vmem:[%s257_s22 + $0x8] sm:$0xff]  ;;  %s849_s5 = scalar_lea.vmem %s912_s4, %s918_s15  ;;  %s688_s6 = sshll.u32 %s918_s15, 6 }
  0x10   : > { %v361_v1 = vsel %vm338_vm0, %v696_v0, 0  ;;  %v358_v3 = vsel %vm338_vm0, %v695_v2, 0  ;;  %v355_v5 = vsel %vm338_vm0, %v694_v4, 0  ;;  %v693_v6 = vld [vmem:[%s257_s22] sm:$0xff]  ;;  %v690_v9 = vld [vmem:[%s251_s25 + $0x8] sm:$0xff]  ;;  %v691_v10 = vld [vmem:[%s251_s25 + $0x10] sm:$0xff]  ;;  %s859_s9 = scalar_lea.vmem %s910_s2, %s688_s6 }
  0x11   : > { %367 = vmatpush.bf16.xpose.msra.mxu0 %v361_v1  ;;  %697 = vmatpush.bf16.xpose.msra.mxu1 %v361_v1  ;;  %v352_v7 = vsel %vm338_vm0, %v693_v6, 0  ;;  %v689_v8 = vld [vmem:[%s251_s25] sm:$0xff]  ;;  %v692_v11 = vld [vmem:[%s251_s25 + $0x18] sm:$0xff]  ;;  %281 = vst.msk [vmem:[%s849_s5] sm:$0x1] %vm279_vm1, %v778_v13 }
  0x12   : > { %698 = vmatpush.bf16.xpose.msra.mxu2 %v361_v1  ;;  %699 = vmatpush.bf16.xpose.msra.mxu3 %v361_v1 }
  0x15   : > { %v408_v50 = vld [vmem:[%s843_s28] sm:$0x1] }
  0x19   : > { %368 = vmatpush.bf16.xpose.msra.mxu0 %v358_v3  ;;  %700 = vmatpush.bf16.xpose.msra.mxu1 %v358_v3 }
  0x1a   : > { %701 = vmatpush.bf16.xpose.msra.mxu2 %v358_v3  ;;  %702 = vmatpush.bf16.xpose.msra.mxu3 %v358_v3 }
  0x21   : > { %369 = vmatpush.bf16.xpose.msra.mxu0 %v355_v5  ;;  %703 = vmatpush.bf16.xpose.msra.mxu1 %v355_v5 }
  0x22   : > { %704 = vmatpush.bf16.xpose.msra.mxu2 %v355_v5  ;;  %705 = vmatpush.bf16.xpose.msra.mxu3 %v355_v5 }
  0x29   : > { %370 = vmatpush.bf16.xpose.msra.mxu0 %v352_v7  ;;  %706 = vmatpush.bf16.xpose.msra.mxu1 %v352_v7 }
  0x2a   : > { %707 = vmatpush.bf16.xpose.msra.mxu2 %v352_v7  ;;  %708 = vmatpush.bf16.xpose.msra.mxu3 %v352_v7 }
  0x30   : > { %680 = vmatmul.msk.bf16.vlgmr.msra.gmra.mxu0 %vm338_vm0, %v689_v8  ;;  %681 = vmatmul.msk.bf16.vlgmr.msra.gmra.mxu1 %vm338_vm0, %v690_v9 }
  0x31   : > { %682 = vmatmul.msk.bf16.vlgmr.msra.gmra.mxu2 %vm338_vm0, %v691_v10  ;;  %683 = vmatmul.msk.bf16.vlgmr.msra.gmra.mxu3 %vm338_vm0, %v692_v11 }
  0xad   : > { %v372_v14 = vpop.f32.mrf.mxu0  ;;  %v377_v15 = vpop.f32.mrf.mxu1 }
  0xae   : > { %v392_v16 = vmul.f32 0.15625, %v372_v14  ;;  %v394_v17 = vmul.f32 0.15625, %v377_v15 }
  0xb0   : > { %400 = vst.msk [vmem:[%s859_s9] sm:$0xff] %vm338_vm0, %v392_v16  ;;  %v409_v26 = vsel %vm338_vm0, %v392_v16, -inf  ;;  %v411_v27 = vsel %vm338_vm0, %v394_v17, -inf }
  0xb1   : > { %402 = vst.msk [vmem:[%s859_s9 + $0x10] sm:$0xff] %vm338_vm0, %v394_v17 }
  0xb4   : > { %v382_v18 = vpop.f32.mrf.mxu2  ;;  %v387_v19 = vpop.f32.mrf.mxu3 }
  0xb5   : > { %v396_v20 = vmul.f32 0.15625, %v382_v18  ;;  %v398_v21 = vmul.f32 0.15625, %v387_v19  ;;  %v374_v22 = vpop.f32.mrf.mxu0  ;;  %v379_v23 = vpop.f32.mrf.mxu1 }
  0xb6   : > { %v393_v24 = vmul.f32 0.15625, %v374_v22  ;;  %v395_v25 = vmul.f32 0.15625, %v379_v23 }
  0xb7   : > { %404 = vst.msk [vmem:[%s859_s9 + $0x20] sm:$0xff] %vm338_vm0, %v396_v20  ;;  %v413_v30 = vsel %vm338_vm0, %v396_v20, -inf  ;;  %v417_v31 = vsel %vm338_vm0, %v398_v21, -inf }
  0xb8   : > { %406 = vst.msk [vmem:[%s859_s9 + $0x30] sm:$0xff] %vm338_vm0, %v398_v21  ;;  %v410_v34 = vsel %vm338_vm0, %v393_v24, -inf  ;;  %v412_v35 = vsel %vm338_vm0, %v395_v25, -inf  ;;  %v414_v38 = vmax.f32 %v409_v26, %v413_v30  ;;  %v418_v39 = vmax.f32 %v411_v27, %v417_v31 }
  0xb9   : > { %401 = vst.msk [vmem:[%s859_s9 + $0x8] sm:$0xff] %vm338_vm0, %v393_v24 }
  0xba   : > { %403 = vst.msk [vmem:[%s859_s9 + $0x18] sm:$0xff] %vm338_vm0, %v395_v25 }
  0xbc   : > { %v384_v28 = vpop.f32.mrf.mxu2  ;;  %v389_v29 = vpop.f32.mrf.mxu3 }
  0xbd   : > { %v397_v32 = vmul.f32 0.15625, %v384_v28  ;;  %v399_v33 = vmul.f32 0.15625, %v389_v29 }
  0xbf   : > { %405 = vst.msk [vmem:[%s859_s9 + $0x28] sm:$0xff] %vm338_vm0, %v397_v32  ;;  %v415_v36 = vsel %vm338_vm0, %v397_v32, -inf  ;;  %v419_v37 = vsel %vm338_vm0, %v399_v33, -inf }
  0xc0   : > { %v416_v40 = vmax.f32 %v410_v34, %v415_v36  ;;  %407 = vst.msk [vmem:[%s859_s9 + $0x38] sm:$0xff] %vm338_vm0, %v399_v33  ;;  %v420_v41 = vmax.f32 %v412_v35, %v419_v37  ;;  %v431_v36 = vld [vmem:[%s849_s5] sm:$0x1] }
  0xc2   : > { %v421_v42 = vmax.f32 %v414_v38, %v416_v40  ;;  %v422_v43 = vmax.f32 %v418_v39, %v420_v41 }
  0xc4   : > { %v423_v44 = vmax.f32 %v421_v42, %v422_v43 }
  0xc6   : > { %v424_v45 = vrot.slane %v423_v44, 4 }
  0xc8   : > { %v425_v46 = vmax.f32 %v423_v44, %v424_v45 }
  0xca   : > { %v426_v47 = vrot.slane %v425_v46, 2 }
  0xcc   : > { %v427_v48 = vmax.f32 %v425_v46, %v426_v47 }
  0xce   : > { %v428_v49 = vrot.slane %v427_v48, 1 }
  0xd0   : > { %v429_v51 = vmax.f32 %v427_v48, %v428_v49 }
  0xd2   : > { %v430_v52 = vmax.f32 %v408_v50, %v429_v51 }
  0xd4   : > { %v437_v53 = vperm.slane %v430_v52, 0  ;;  %487 = vst.msk [vmem:[%s843_s28] sm:$0x1] %vm279_vm1, %v430_v52  ;;  %v432_v22 = vsub.f32 %v408_v50, %v430_v52 }
  0xd6   : > { %v439_v54 = vsub.f32 %v392_v16, %v437_v53  ;;  %v440_v55 = vsub.f32 %v393_v24, %v437_v53  ;;  %v441_v56 = vsub.f32 %v394_v17, %v437_v53  ;;  %v442_v57 = vsub.f32 %v395_v25, %v437_v53 }
  0xd7   : > { %v443_v58 = vsub.f32 %v396_v20, %v437_v53  ;;  %v444_v61 = vsub.f32 %v397_v32, %v437_v53  ;;  %v445_v0 = vsub.f32 %v398_v21, %v437_v53  ;;  %v446_v2 = vsub.f32 %v399_v33, %v437_v53 }
  0xd8   : > { %v447_v59 = vmul.f32 1.442695, %v439_v54  ;;  %v449_v60 = vmul.f32 1.442695, %v440_v55  ;;  %v451_v62 = vmul.f32 1.442695, %v441_v56 }
  0xd9   : > { %v453_v63 = vmul.f32 1.442695, %v442_v57  ;;  %v455_v1 = vmul.f32 1.442695, %v443_v58  ;;  %v457_v3 = vmul.f32 1.442695, %v444_v61 }
  0xda   : > { %735 = vpow2.f32 %v447_v59  ;;  %v459_v4 = vmul.f32 1.442695, %v445_v0  ;;  %v461_v7 = vmul.f32 1.442695, %v446_v2  ;;  %v433_v28 = vmul.f32 1.442695, %v432_v22 }
  0xdb   : > { %737 = vpow2.f32 %v449_v60 }
  0xdc   : > { %739 = vpow2.f32 %v451_v62 }
  0xdd   : > { %741 = vpow2.f32 %v453_v63 }
  0xde   : > { %743 = vpow2.f32 %v455_v1 }
  0xdf   : > { %745 = vpow2.f32 %v457_v3 }
  0xe0   : > { %v736_v5 = vpop.eup %735  ;;  %747 = vpow2.f32 %v459_v4 }
  0xe1   : > { %v738_v6 = vpop.eup %737  ;;  %v463_v8 = vsel %vm338_vm0, %v736_v5, 0.0  ;;  %749 = vpow2.f32 %v461_v7 }
  0xe2   : > { %v740_v9 = vpop.eup %739  ;;  %v464_v10 = vsel %vm338_vm0, %v738_v6, 0.0  ;;  %751 = vpow2.f32 %v433_v28 }
  0xe3   : > { %v742_v11 = vpop.eup %741  ;;  %v465_v12 = vadd.f32 %v464_v10, %v463_v8  ;;  %v466_v13 = vsel %vm338_vm0, %v740_v9, 0.0 }
  0xe4   : > { %v744_v14 = vpop.eup %743  ;;  %v468_v16 = vsel %vm338_vm0, %v742_v11, 0.0 }
  0xe5   : > { %v467_v15 = vadd.f32 %v466_v13, %v465_v12  ;;  %v746_v17 = vpop.eup %745  ;;  %v470_v19 = vsel %vm338_vm0, %v744_v14, 0.0 }
  0xe6   : > { %v748_v20 = vpop.eup %747  ;;  %v472_v23 = vsel %vm338_vm0, %v746_v17, 0.0 }
  0xe7   : > { %v469_v18 = vadd.f32 %v468_v16, %v467_v15  ;;  %v750_v24 = vpop.eup %749  ;;  %v474_v26 = vsel %vm338_vm0, %v748_v20, 0.0 }
  0xe8   : > { %v476_v29 = vsel %vm338_vm0, %v750_v24, 0.0  ;;  %v752_v35 = vpop.eup %751 }
  0xe9   : > { %v471_v21 = vadd.f32 %v470_v19, %v469_v18  ;;  %v435_v38 = vmul.f32 %v752_v35, %v431_v36 }
  0xeb   : > { %v473_v25 = vadd.f32 %v472_v23, %v471_v21 }
  0xed   : > { %v475_v27 = vadd.f32 %v474_v26, %v473_v25 }
  0xef   : > { %v477_v30 = vadd.f32 %v476_v29, %v475_v27 }
  0xf1   : > { %v478_v31 = vrot.slane %v477_v30, 4 }
  0xf3   : > { %v479_v32 = vadd.f32 %v478_v31, %v477_v30 }
  0xf5   : > { %v480_v33 = vrot.slane %v479_v32, 2 }
  0xf7   : > { %v481_v34 = vadd.f32 %v480_v33, %v479_v32 }
  0xf9   : > { %v482_v37 = vrot.slane %v481_v34, 1 }
  0xfb   : > { %v483_v39 = vadd.f32 %v482_v37, %v481_v34 }
  0xfd   : > { %v484_v40 = vadd.f32 %v483_v39, %v435_v38 }
  0xff   : > { %486 = vst.msk [vmem:[%s849_s5] sm:$0x1] %vm279_vm1, %v484_v40 }
 0x100 PF: > { %s15_s17 = sadd.s32 1, %s775_s17   ;;  %s913_s15 = smov %s771_s16 }
 0x101   : > { %p12_p5 = scmp.ge.s32.totalorder %s15_s17, 4   ;;  %s914_s16 = smov %s916_s18 }
 0x103   :  { %14 = sbr.rel (!%p12_p5) target bundleno = 2 (0x2), region = 89 }

</bundles_post_ra>
